<compile_context>
chip_gen: v7x
topology: tpu7x:2x2x1
jax: 0.10.0
libtpu: 0.0.40
codegen_flags: <defaults>
</compile_context>

<pallas_src>
import functools

import jax
import jax.numpy as jnp
from jax import lax
from jax.experimental import pallas as pl
from jax.experimental.pallas import tpu as pltpu


def _round_up(x, m):
    return (x + m - 1) // m * m


def _vq_kernel(x_ref, e_ref, e2_ref, q_ref, part_ref, *, n_real, tile_n):
    """One grid step: quantize a tile of `tile_n` latent rows.

    x_ref    : [TN, Dp]     flattened latents tile (VMEM), zero-padded in D
    e_ref    : [Kp, Dp]     codebook (VMEM, same block every step), zero-padded
    e2_ref   : [1, Kp]      precomputed ||e||^2 (padded entries = +1e30)
    q_ref    : [TN, Dp]     quantized output tile (VMEM)
    part_ref : [1, 8, 128]  per-tile partial SSE (all elements hold the sum)
    """
    i = pl.program_id(0)

    x = x_ref[...].astype(jnp.float32)            # [TN, Dp]
    e = e_ref[...].astype(jnp.float32)            # [Kp, Dp]
    e2 = e2_ref[...]                              # [1, Kp]  (f32)
    tn, dp = x.shape
    kp = e.shape[0]

    # Squared-distance matrix: ||x||^2 + ||e||^2 - 2 <x, e>  -> [TN, Kp].
    # Contraction on dim 1 of both operands -> no explicit codebook transpose.
    x2 = jnp.sum(x * x, axis=1, keepdims=True)                        # [TN, 1]
    xe = lax.dot_general(x, e,
                         dimension_numbers=(((1,), (1,)), ((), ())),
                         preferred_element_type=jnp.float32)          # [TN, Kp]
    dist = x2 + e2 - 2.0 * xe
    # Padded codebook columns carry e2 = +1e30 so they can never win argmin.

    # First-occurrence argmin (matches torch.argmin tie-breaking), expressed
    # with min-reductions + iota so it lowers cleanly on TPU.
    dmin = jnp.min(dist, axis=1, keepdims=True)                       # [TN, 1]
    col = lax.broadcasted_iota(jnp.int32, (tn, kp), 1)                # [TN, Kp]
    inds = jnp.min(jnp.where(dist == dmin, col, kp), axis=1,
                   keepdims=True)                                     # [TN, 1]
    one_hot = (col == inds).astype(jnp.float32)                       # [TN, Kp]

    # quantized = one_hot @ embedding  (same as the PyTorch scatter + matmul).
    q = jnp.dot(one_hot, e, preferred_element_type=jnp.float32)       # [TN, Dp]
    q_ref[...] = q.astype(q_ref.dtype)

    # Partial sum of squared errors for this tile.  Rows beyond the real N
    # (zero-padded rows) are masked out; zero-padded D columns contribute 0
    # automatically (both x and e are zero there).
    diff = q - x
    row = lax.broadcasted_iota(jnp.int32, (tn, dp), 0) + i * tile_n
    valid = (row < n_real).astype(jnp.float32)
    sse = jnp.sum(diff * diff * valid)                                # scalar
    part_ref[...] = jnp.full(part_ref.shape, sse, dtype=jnp.float32)


def vector_quantizer(latents_nchw, embedding, beta=0.25, tile_n=512):
    """Forward pass of VectorQuantizer.

    latents_nchw : [B, C, H, W] with C == embedding_dim D
    embedding    : [K, D] codebook
    Returns (quantized_nchw [B, C, H, W], vq_loss scalar).
    """
    B, C, H, W = latents_nchw.shape
    K, D = embedding.shape
    assert C == D, "channel dim must equal embedding_dim"

    # NCHW -> NHWC -> [N, D]   (glue, done in plain JAX)
    x = jnp.transpose(latents_nchw, (0, 2, 3, 1)).reshape(-1, D)
    N = x.shape[0]

    # Lane-dense padding of the last dims and row padding for arbitrary N.
    Dp = _round_up(D, 128)
    Kp = _round_up(K, 128)
    tile = _round_up(min(tile_n, N), 8)
    Np = _round_up(N, tile)
    grid_n = Np // tile

    x_p = jnp.pad(x, ((0, Np - N), (0, Dp - D)))                   # zeros
    e_p = jnp.pad(embedding, ((0, Kp - K), (0, Dp - D)))           # zeros
    e2 = jnp.sum(embedding.astype(jnp.float32) ** 2, axis=1)       # [K]
    e2_p = jnp.pad(e2, (0, Kp - K), constant_values=1e30)          # sentinel
    e2_p = e2_p.reshape(1, Kp)

    # Rough VMEM budget (double-buffered I/O tiles + resident codebook +
    # [tile, Kp] intermediates), clamped to v7x's 64 MiB physical ceiling.
    # TODO(synk): for very large codebooks add K-tiling with an online
    # running-min argmin (flash-attention style) instead of a resident [Kp,Dp].
    itm = jnp.dtype(x.dtype).itemsize
    vmem_est = (2 * tile * Dp * itm          # x tiles (double-buffered)
                + 2 * tile * Dp * itm        # q tiles
                + 2 * Kp * Dp * jnp.dtype(embedding.dtype).itemsize
                + 2 * Kp * 4                 # e2
                + 2 * 8 * 128 * 4            # partial-SSE blocks
                + 4 * tile * Kp * 4          # dist / one_hot intermediates
                + 2 * tile * Dp * 4)         # f32 working copies
    vmem_limit = int(min(max(2 * vmem_est, 16 * 1024 * 1024),
                         64 * 1024 * 1024))

    kernel = functools.partial(_vq_kernel, n_real=N, tile_n=tile)

    q_pad, partials = pl.pallas_call(
        kernel,
        out_shape=(jax.ShapeDtypeStruct((Np, Dp), x.dtype),
                   jax.ShapeDtypeStruct((grid_n, 8, 128), jnp.float32)),
        grid_spec=pltpu.PrefetchScalarGridSpec(
            num_scalar_prefetch=0,
            grid=(grid_n,),
            in_specs=[
                pl.BlockSpec((tile, Dp), lambda i: (i, 0)),    # latents tile
                pl.BlockSpec((Kp, Dp), lambda i: (0, 0)),      # codebook
                pl.BlockSpec((1, Kp), lambda i: (0, 0)),       # ||e||^2
            ],
            out_specs=(
                pl.BlockSpec((tile, Dp), lambda i: (i, 0)),    # quantized tile
                pl.BlockSpec((1, 8, 128), lambda i: (i, 0, 0)),  # partial SSE
            ),
        ),
        compiler_params=pltpu.CompilerParams(
            dimension_semantics=("parallel",),   # each step writes own blocks
            vmem_limit_bytes=vmem_limit),
    )(x_p, e_p, e2_p)

    # Finalize the loss in plain JAX:
    #   vq_loss = beta*mse(q.detach, x) + mse(q, x.detach)
    #           = (1 + beta) * SSE / (N * D)   (forward value)
    vq_loss = (1.0 + float(beta)) * jnp.sum(partials[:, 0, 0]) / float(N * D)

    # Straight-through estimator: numerically the output equals `quantized`.
    q = q_pad[:N, :D].reshape(B, H, W, C).transpose(0, 3, 1, 2)
    return q, vq_loss


def _reference(latents_nchw, embedding, beta=0.25):
    """Pure-jnp reference mirroring the PyTorch forward (for verification)."""
    B, C, H, W = latents_nchw.shape
    K, D = embedding.shape
    x = jnp.transpose(latents_nchw, (0, 2, 3, 1)).reshape(-1, D)
    dist = (jnp.sum(x ** 2, axis=1, keepdims=True)
            + jnp.sum(embedding ** 2, axis=1)
            - 2.0 * x @ embedding.T)
    inds = jnp.argmin(dist, axis=1)
    q = embedding[inds]
    mse = jnp.mean((q - x) ** 2)
    vq_loss = (1.0 + beta) * mse
    q_nchw = q.reshape(B, H, W, C).transpose(0, 3, 1, 2)
    return q_nchw, vq_loss


if __name__ == "__main__":
    key = jax.random.PRNGKey(0)
    k_lat, k_emb, k_lat2 = jax.random.split(key, 3)

    # Small shapes consistent with the module: NCHW latents, codebook [K, D].
    B, C, H, W = 2, 4, 16, 16        # embedding_dim D = C = 4
    K = 16                           # num_embeddings
    beta = 0.25

    latents = jax.random.normal(k_lat, (B, C, H, W), dtype=jnp.float32)
    # nn.Embedding weight init: uniform(-1/K, 1/K), deterministic via PRNGKey.
    embedding = jax.random.uniform(k_emb, (K, C), dtype=jnp.float32,
                                   minval=-1.0 / K, maxval=1.0 / K)

    q, vq_loss = vector_quantizer(latents, embedding, beta=beta)
    q, vq_loss = jax.block_until_ready((q, vq_loss))

    q_ref, loss_ref = _reference(latents, embedding, beta=beta)
    assert q.shape == (B, C, H, W)
    assert jnp.allclose(q, q_ref, atol=1e-5, rtol=1e-5)
    assert jnp.allclose(vq_loss, loss_ref, atol=1e-5, rtol=1e-5)

    # Second check: spatial size whose N = B*H*W is not a multiple of the row
    # tile (exercises the row-padding + loss-masking path).
    latents2 = jax.random.normal(k_lat2, (1, C, 10, 10), dtype=jnp.float32)
    q2, loss2 = vector_quantizer(latents2, embedding, beta=beta)
    q2, loss2 = jax.block_until_ready((q2, loss2))
    q2_ref, loss2_ref = _reference(latents2, embedding, beta=beta)
    assert q2.shape == (1, C, 10, 10)
    assert jnp.allclose(q2, q2_ref, atol=1e-5, rtol=1e-5)
    assert jnp.allclose(loss2, loss2_ref, atol=1e-5, rtol=1e-5)

    print("KERNEL_OK")
</pallas_src>

<mosaic_0001>
module attributes {stable_mosaic.version = 11 : i64} {
  func.func @_vq_kernel(%arg0: i32, %arg1: memref<512x128xf32, #tpu.memory_space<vmem>>, %arg2: memref<128x128xf32, #tpu.memory_space<vmem>>, %arg3: memref<1x128xf32, #tpu.memory_space<vmem>>, %arg4: memref<512x128xf32, #tpu.memory_space<vmem>>, %arg5: memref<1x8x128xf32, #tpu.memory_space<vmem>>) attributes {dimension_semantics = [#tpu.dimension_semantics<parallel>], iteration_bounds = array<i64: 1>, scalar_prefetch = 0 : i64, scratch_operands = 0 : i64, tpu.core_type = #tpu.core_type<tc>, window_params = [{transform_indices = @transform_0, window_bounds = array<i64: 512, 128>}, {pipeline_mode = #tpu.pipeline_mode<synchronous>, transform_indices = @transform_1, window_bounds = array<i64: 128, 128>}, {pipeline_mode = #tpu.pipeline_mode<synchronous>, transform_indices = @transform_2, window_bounds = array<i64: 1, 128>}, {transform_indices = @transform_3, window_bounds = array<i64: 512, 128>}, {transform_indices = @transform_4, window_bounds = array<i64: 1, 8, 128>}]} {
    %c0 = arith.constant 0 : index
    %c0_0 = arith.constant 0 : index
    %0 = vector.load %arg1[%c0, %c0_0] : memref<512x128xf32, #tpu.memory_space<vmem>>, vector<512x128xf32>
    %c0_1 = arith.constant 0 : index
    %c0_2 = arith.constant 0 : index
    %1 = vector.load %arg2[%c0_1, %c0_2] : memref<128x128xf32, #tpu.memory_space<vmem>>, vector<128x128xf32>
    %c0_3 = arith.constant 0 : index
    %c0_4 = arith.constant 0 : index
    %2 = vector.load %arg3[%c0_3, %c0_4] : memref<1x128xf32, #tpu.memory_space<vmem>>, vector<1x128xf32>
    %3 = arith.mulf %0, %0 : vector<512x128xf32>
    %cst = arith.constant dense<0.000000e+00> : vector<512xf32>
    %4 = vector.multi_reduction <add>, %3, %cst [1] : vector<512x128xf32> to vector<512xf32>
    %5 = vector.shape_cast %4 : vector<512xf32> to vector<512x1xf32>
    %cst_5 = arith.constant dense<0.000000e+00> : vector<512x128xf32>
    %6 = tpu.matmul %0, %1, %cst_5 {dimension_numbers = #tpu.dot_dimension_numbers<[1], [1], [0], [0], [0, 0, 1, 0], [], []>} : vector<512x128xf32>, vector<128x128xf32>, vector<512x128xf32> -> vector<512x128xf32>
    %7 = vector.broadcast %5 : vector<512x1xf32> to vector<512x128xf32>
    %8 = vector.broadcast %2 : vector<1x128xf32> to vector<512x128xf32>
    %9 = arith.addf %7, %8 : vector<512x128xf32>
    %cst_6 = arith.constant 2.000000e+00 : f32
    %10 = vector.broadcast %cst_6 : f32 to vector<512x128xf32>
    %11 = arith.mulf %10, %6 : vector<512x128xf32>
    %12 = arith.subf %9, %11 : vector<512x128xf32>
    %cst_7 = arith.constant dense<0x7F800000> : vector<512xf32>
    %13 = vector.multi_reduction <minimumf>, %12, %cst_7 [1] : vector<512x128xf32> to vector<512xf32>
    %14 = vector.shape_cast %13 : vector<512xf32> to vector<512x1xf32>
    %15 = tpu.iota {dimensions = array<i32: 1>} : vector<512x128xi32>
    %16 = vector.broadcast %14 : vector<512x1xf32> to vector<512x128xf32>
    %17 = arith.cmpf oeq, %12, %16 : vector<512x128xf32>
    %c128_i32 = arith.constant 128 : i32
    %18 = vector.broadcast %c128_i32 : i32 to vector<512x128xi32>
    %19 = arith.select %17, %15, %18 : vector<512x128xi1>, vector<512x128xi32>
    %cst_8 = arith.constant dense<2147483647> : vector<512xi32>
    %20 = vector.multi_reduction <minsi>, %19, %cst_8 [1] : vector<512x128xi32> to vector<512xi32>
    %21 = vector.shape_cast %20 : vector<512xi32> to vector<512x1xi32>
    %22 = vector.broadcast %21 : vector<512x1xi32> to vector<512x128xi32>
    %23 = arith.cmpi eq, %15, %22 : vector<512x128xi32>
    %24 = arith.extui %23 : vector<512x128xi1> to vector<512x128xi32>
    %25 = arith.sitofp %24 : vector<512x128xi32> to vector<512x128xf32>
    %cst_9 = arith.constant dense<0.000000e+00> : vector<512x128xf32>
    %26 = tpu.matmul %25, %1, %cst_9 {dimension_numbers = #tpu.dot_dimension_numbers<[1], [0], [0], [1], [0, 0, 1, 1], [], []>} : vector<512x128xf32>, vector<128x128xf32>, vector<512x128xf32> -> vector<512x128xf32>
    %c0_10 = arith.constant 0 : index
    %c0_11 = arith.constant 0 : index
    %27 = vector.load %arg4[%c0_10, %c0_11] : memref<512x128xf32, #tpu.memory_space<vmem>>, vector<512x128xf32>
    tpu.vector_store %arg4[%c0_10, %c0_11], %26 {strides = array<i32>} : memref<512x128xf32, #tpu.memory_space<vmem>>, vector<512x128xf32>,
    %28 = arith.subf %26, %0 : vector<512x128xf32>
    %29 = tpu.iota {dimensions = array<i32: 0>} : vector<512x128xi32>
    %c512_i32 = arith.constant 512 : i32
    %30 = arith.muli %arg0, %c512_i32 : i32
    %31 = vector.broadcast %30 : i32 to vector<512x128xi32>
    %32 = arith.addi %29, %31 : vector<512x128xi32>
    %c512_i32_12 = arith.constant 512 : i32
    %33 = vector.broadcast %c512_i32_12 : i32 to vector<512x128xi32>
    %34 = arith.cmpi slt, %32, %33 : vector<512x128xi32>
    %35 = arith.extui %34 : vector<512x128xi1> to vector<512x128xi32>
    %36 = arith.sitofp %35 : vector<512x128xi32> to vector<512x128xf32>
    %37 = arith.mulf %28, %28 : vector<512x128xf32>
    %38 = arith.mulf %37, %36 : vector<512x128xf32>
    %39 = vector.shape_cast %38 : vector<512x128xf32> to vector<1x512x128xf32>
    %cst_13 = arith.constant dense<0.000000e+00> : vector<1xf32>
    %40 = vector.multi_reduction <add>, %39, %cst_13 [1, 2] : vector<1x512x128xf32> to vector<1xf32>
    %41 = vector.shape_cast %40 : vector<1xf32> to vector<1x1x1xf32>
    %42 = vector.extract %41[0, 0, 0] : f32 from vector<1x1x1xf32>
    %43 = vector.broadcast %42 : f32 to vector<1x8x128xf32>
    %c0_14 = arith.constant 0 : index
    %c0_15 = arith.constant 0 : index
    %c0_16 = arith.constant 0 : index
    %44 = vector.load %arg5[%c0_14, %c0_15, %c0_16] : memref<1x8x128xf32, #tpu.memory_space<vmem>>, vector<1x8x128xf32>
    tpu.vector_store %arg5[%c0_14, %c0_15, %c0_16], %43 {strides = array<i32>} : memref<1x8x128xf32, #tpu.memory_space<vmem>>, vector<1x8x128xf32>,
    return
  }
  func.func @transform_0(%arg0: i32) -> (i32, i32) {
    %c0_i32 = arith.constant 0 : i32
    %c0_i32_0 = arith.constant 0 : i32
    return %arg0, %c0_i32 : i32, i32
  }
  func.func @transform_1(%arg0: i32) -> (i32, i32) {
    %c0_i32 = arith.constant 0 : i32
    %c0_i32_0 = arith.constant 0 : i32
    %c0_i32_1 = arith.constant 0 : i32
    return %c0_i32, %c0_i32_0 : i32, i32
  }
  func.func @transform_2(%arg0: i32) -> (i32, i32) {
    %c0_i32 = arith.constant 0 : i32
    %c0_i32_0 = arith.constant 0 : i32
    %c0_i32_1 = arith.constant 0 : i32
    return %c0_i32, %c0_i32_0 : i32, i32
  }
  func.func @transform_3(%arg0: i32) -> (i32, i32) {
    %c0_i32 = arith.constant 0 : i32
    %c0_i32_0 = arith.constant 0 : i32
    return %arg0, %c0_i32 : i32, i32
  }
  func.func @transform_4(%arg0: i32) -> (i32, i32, i32) {
    %c0_i32 = arith.constant 0 : i32
    %c0_i32_0 = arith.constant 0 : i32
    %c0_i32_1 = arith.constant 0 : i32
    return %arg0, %c0_i32, %c0_i32_0 : i32, i32, i32
  }
}

</mosaic_0001>

<bundles_post_ra>
// kernel: tpu_custom_call.1
= control target key start
LH: loop header
LB: loop body
LE: loop exit
PB: predicated region body
PF: predicated region fallthrough
CT: control target
= control target key end

     0   :  { %10 = vsyncpa [#allocation3], 0  ;;  %s5902_s0 = inlined_call_operand.hbm [shape: f32[512,128], index: 0, kind: input, shape index: {}]   ;;  %s5903_s1 = inlined_call_operand.hbm [shape: f32[128,128], index: 1, kind: input, shape index: {}]   ;;  %s5904_s2 = inlined_call_operand.vmem [shape: f32[1,128], index: 2, kind: input, shape index: {}]   ;;  %s5905_s3 = inlined_call_operand.hbm [shape: f32[512,128], index: 3, kind: output, shape index: {0}]   ;;  %s5906_s4 = inlined_call_operand.hbm [shape: f32[1,8,128], index: 4, kind: output, shape index: {1}]  }
   0x1   :  { %11 = vsyncpa [#allocation6], 0 }
   0x2   :  { %12 = vsyncpa [#allocation4], 0 }
   0x3   :  { %13 = vsyncpa [#allocation9], 0  ;;  %s4096_s15 = smov [#allocation2]   ;;  %s4000_s19 = scalar_lea.hbm %s5902_s0, 8192 }
   0x4   :  { %s19_s16 = sshll.u32 %s4096_s15, 4  ;;  %p4001_p0 = scmp.ne.s32.totalorder %s5902_s0, %s4000_s19  ;;  %s20_s16 = int_to_ptr.vmem [resolvable:$true] %s19_s16 }
   0x5   :  { %p4004_p1 = scmp.lt.u32.totalorder %s4000_s19, %s5902_s0 }
   0x7   :  { %p4006_p2 = pnand %p4004_p1, %p4001_p0 }
   0x9   :  { %4009 = shalt.err (!%p4006_p2)
}
   0xa   :  { %s4010_s24 = scalar_lea.vmem %s20_s16, 8192  ;;  %p4015_p4 = scmp.lt.s32.totalorder %s20_s16, %s20_s16 }
   0xb   :  { %p4011_p3 = scmp.ne.s32.totalorder %s20_s16, %s4010_s24  ;;  %p4016_p5 = scmp.lt.s32.totalorder %s4010_s24, %s4010_s24 }
   0xd   :  { %p4017_p6 = por %p4016_p5, %p4015_p4 }
   0xf   :  { %p4018_p7 = pnand %p4017_p6, %p4011_p3 }
  0x11   :  { %4021 = shalt.err (!%p4018_p7)
}
  0x12   :  { %s4097_s25 = smov 128   ;;  %s4098_s26 = smov 8  }
  0x13   :  { %25 = dma.hbm_to_vmem [thread:$0]  %s5902_s0, 8192, %s20_s16, [#allocation3], %s4097_s25, %s4097_s25, %s4098_s26  }
  0x14   :  { %s4099_s29 = smov [#allocation5]   ;;  %s4022_s7 = scalar_lea.hbm %s5903_s1, 2048 }
  0x15   :  { %s31_s30 = sshll.u32 %s4099_s29, 4  ;;  %p4023_p8 = scmp.ne.s32.totalorder %s5903_s1, %s4022_s7  ;;  %s32_s30 = int_to_ptr.vmem [resolvable:$true] %s31_s30 }
  0x16   :  { %p4026_p9 = scmp.lt.u32.totalorder %s4022_s7, %s5903_s1 }
  0x18   :  { %p4028_p10 = pnand %p4026_p9, %p4023_p8 }
  0x1a   :  { %4031 = shalt.err (!%p4028_p10)
}
  0x1b   :  { %s4032_s12 = scalar_lea.vmem %s32_s30, 2048  ;;  %p4037_p12 = scmp.lt.s32.totalorder %s32_s30, %s32_s30 }
  0x1c   :  { %p4033_p11 = scmp.ne.s32.totalorder %s32_s30, %s4032_s12  ;;  %p4038_p13 = scmp.lt.s32.totalorder %s4032_s12, %s4032_s12 }
  0x1e   :  { %p4039_p0 = por %p4038_p13, %p4037_p12 }
  0x20   :  { %p4040_p1 = pnand %p4039_p0, %p4033_p11 }
  0x22   :  { %4043 = shalt.err (!%p4040_p1)
}
  0x23   :  { %37 = dma.hbm_to_vmem [thread:$0]  %s5903_s1, 2048, %s32_s30, [#allocation6], %s4097_s25, %s4097_s25, %s4098_s26  }
  0x24   :  { %4088 = dma.done.wait [#allocation3], 8192  }
  0x25   :  { %4089 = vsyncadd [#allocation3], 4294959104 }
  0x26   :  { %4090 = dma.done.wait [#allocation6], 2048  }
  0x27   :  { %4091 = vsyncadd [#allocation6], 4294965248  ;;  %v110_v0 = vld [vmem:[#allocation5] sm:$0xff]  ;;  %v111_v1 = vld [vmem:[#allocation5 + $0x8] sm:$0xff] }
  0x28   :  { %v112_v2 = vld [vmem:[#allocation5 + $0x10] sm:$0xff]  ;;  %v3863_v3 = vpack.c.bf16 %v111_v1, %v110_v0  ;;  %v113_v4 = vld [vmem:[#allocation5 + $0x18] sm:$0xff]  ;;  %v114_v6 = vld [vmem:[#allocation5 + $0x20] sm:$0xff] }
  0x29   :  { %v3867_v5 = vpack.c.bf16 %v113_v4, %v112_v2  ;;  %v115_v7 = vld [vmem:[#allocation5 + $0x28] sm:$0xff]  ;;  %v46_v8 = vld [vmem:[#allocation2] sm:$0xff]  ;;  %v116_v13 = vld [vmem:[#allocation5 + $0x30] sm:$0xff] }
  0x2a   :  { %3864 = vmatprep.subr.bf16.mxu0 %v3863_v3  ;;  %3896 = vmatprep.subr.bf16.mxu1 %v3863_v3  ;;  %v127_v9 = vmul.f32 %v46_v8, %v46_v8  ;;  %v3871_v10 = vpack.c.bf16 %v115_v7, %v114_v6  ;;  %v4158_v11 = vld [vmem:[#allocation2 + $0x8] sm:$0xff]  ;;  %v117_v14 = vld [vmem:[#allocation5 + $0x38] sm:$0xff]  ;;  %v4162_v15 = vld [vmem:[#allocation2 + $0x10] sm:$0xff] }
  0x2b   :  { %3866 = vmatpush3.bf16.xpose.msra.mxu0 %v3863_v3  ;;  %3898 = vmatpush3.bf16.msra.mxu1 %v3863_v3  ;;  %v128_v12 = vmul.f32 %v4158_v11, %v4158_v11  ;;  %v4164_v16 = vld [vmem:[#allocation2 + $0x20] sm:$0xff]  ;;  %v129_v17 = vmul.f32 %v4162_v15, %v4162_v15  ;;  %v3875_v19 = vpack.c.bf16 %v117_v14, %v116_v13  ;;  %v119_v21 = vld [vmem:[#allocation5 + $0x48] sm:$0xff]  ;;  %v4170_v22 = vld [vmem:[#allocation2 + $0x18] sm:$0xff] }
  0x2c   :  { %3868 = vmatprep.subr.bf16.mxu0 %v3867_v5  ;;  %3900 = vmatprep.subr.bf16.mxu1 %v3867_v5  ;;  %v131_v18 = vmul.f32 %v4164_v16, %v4164_v16  ;;  %v118_v20 = vld [vmem:[#allocation5 + $0x40] sm:$0xff]  ;;  %v4172_v23 = vld [vmem:[#allocation2 + $0x30] sm:$0xff]  ;;  %v130_v24 = vmul.f32 %v4170_v22, %v4170_v22  ;;  %v121_v28 = vld [vmem:[#allocation5 + $0x58] sm:$0xff] }
  0x2d   :  { %3639 = vmatprep.mubr.f32.mxu0 %v46_v8  ;;  %191 = vadd.xlane.f32.xlu0 %v127_v9  ;;  %v133_v25 = vmul.f32 %v4172_v23, %v4172_v23  ;;  %v3879_v26 = vpack.c.bf16 %v119_v21, %v118_v20  ;;  %v120_v27 = vld [vmem:[#allocation5 + $0x50] sm:$0xff]  ;;  %v4178_v29 = vld [vmem:[#allocation2 + $0x40] sm:$0xff]  ;;  %v123_v33 = vld [vmem:[#allocation5 + $0x68] sm:$0xff] }
  0x2e   :  { %195 = vadd.xlane.f32.xlu1 %v129_v17  ;;  %v135_v30 = vmul.f32 %v4178_v29, %v4178_v29  ;;  %v3883_v31 = vpack.c.bf16 %v121_v28, %v120_v27  ;;  %v122_v32 = vld [vmem:[#allocation5 + $0x60] sm:$0xff]  ;;  %v4182_v34 = vld [vmem:[#allocation2 + $0x28] sm:$0xff]  ;;  %v4184_v35 = vld [vmem:[#allocation2 + $0x50] sm:$0xff] }
  0x2f   :  { %3902 = vmatpush3.bf16.msra.mxu1 %v3867_v5  ;;  %v132_v36 = vmul.f32 %v4182_v34, %v4182_v34  ;;  %v137_v37 = vmul.f32 %v4184_v35, %v4184_v35  ;;  %v3887_v38 = vpack.c.bf16 %v123_v33, %v122_v32  ;;  %v124_v39 = vld [vmem:[#allocation5 + $0x70] sm:$0xff]  ;;  %v125_v40 = vld [vmem:[#allocation5 + $0x78] sm:$0xff]  ;;  %v4190_v41 = vld [vmem:[#allocation2 + $0x60] sm:$0xff] }
  0x30   :  { %3904 = vmatprep.subr.bf16.mxu1 %v3871_v10  ;;  %v139_v42 = vmul.f32 %v4190_v41, %v4190_v41  ;;  %v3891_v43 = vpack.c.bf16 %v125_v40, %v124_v39  ;;  %v4194_v44 = vld [vmem:[#allocation2 + $0x38] sm:$0xff]  ;;  %v4196_v45 = vld [vmem:[#allocation2 + $0x70] sm:$0xff]  ;;  %v4202_v48 = vld [vmem:[#allocation2 + $0x80] sm:$0xff] }
  0x31   :  { %193 = vadd.xlane.f32.xlu0 %v128_v12  ;;  %v134_v46 = vmul.f32 %v4194_v44, %v4194_v44  ;;  %v141_v47 = vmul.f32 %v4196_v45, %v4196_v45  ;;  %v143_v49 = vmul.f32 %v4202_v48, %v4202_v48  ;;  %v4206_v50 = vld [vmem:[#allocation2 + $0x48] sm:$0xff]  ;;  %v4208_v51 = vld [vmem:[#allocation2 + $0x90] sm:$0xff]  ;;  %v4214_v54 = vld [vmem:[#allocation2 + $0xa0] sm:$0xff] }
  0x32   :  { %197 = vadd.xlane.f32.xlu1 %v130_v24  ;;  %v136_v52 = vmul.f32 %v4206_v50, %v4206_v50  ;;  %v145_v53 = vmul.f32 %v4208_v51, %v4208_v51  ;;  %v147_v55 = vmul.f32 %v4214_v54, %v4214_v54  ;;  %v4218_v56 = vld [vmem:[#allocation2 + $0x58] sm:$0xff]  ;;  %v4220_v57 = vld [vmem:[#allocation2 + $0xb0] sm:$0xff]  ;;  %v4226_v60 = vld [vmem:[#allocation2 + $0xc0] sm:$0xff] }
  0x33   :  { %3870 = vmatpush3.bf16.xpose.msra.mxu0 %v3867_v5  ;;  %3906 = vmatpush3.bf16.msra.mxu1 %v3871_v10  ;;  %v138_v58 = vmul.f32 %v4218_v56, %v4218_v56  ;;  %v149_v59 = vmul.f32 %v4220_v57, %v4220_v57  ;;  %v151_v61 = vmul.f32 %v4226_v60, %v4226_v60  ;;  %v4230_v62 = vld [vmem:[#allocation2 + $0x68] sm:$0xff]  ;;  %v4232_v63 = vld [vmem:[#allocation2 + $0xd0] sm:$0xff]  ;;  %v4238_v2 = vld [vmem:[#allocation2 + $0xe0] sm:$0xff] }
  0x34   :  { %3872 = vmatprep.subr.bf16.mxu0 %v3871_v10  ;;  %3908 = vmatprep.subr.bf16.mxu1 %v3875_v19  ;;  %v140_v0 = vmul.f32 %v4230_v62, %v4230_v62  ;;  %v153_v1 = vmul.f32 %v4232_v63, %v4232_v63  ;;  %v155_v3 = vmul.f32 %v4238_v2, %v4238_v2  ;;  %v4242_v4 = vld [vmem:[#allocation2 + $0x78] sm:$0xff]  ;;  %v4244_v5 = vld [vmem:[#allocation2 + $0xf0] sm:$0xff]  ;;  %v4248_v7 = vld [vmem:[#allocation2 + $0x88] sm:$0xff] }
  0x35   :  { %199 = vadd.xlane.f32.xlu0 %v131_v18  ;;  %v142_v6 = vmul.f32 %v4242_v4, %v4242_v4  ;;  %v157_v8 = vmul.f32 %v4244_v5, %v4244_v5  ;;  %v144_v9 = vmul.f32 %v4248_v7, %v4248_v7  ;;  %v4258_v12 = vld [vmem:[#allocation2 + $0x98] sm:$0xff]  ;;  %v4265_v17 = vld [vmem:[#allocation2 + $0x110] sm:$0xff]  ;;  %v4288_v24 = vld [vmem:[#allocation2 + $0xc8] sm:$0xff] }
  0x36   :  { %201 = vadd.xlane.f32.xlu1 %v132_v36  ;;  %v146_v14 = vmul.f32 %v4258_v12, %v4258_v12  ;;  %v4278_v20 = vld [vmem:[#allocation2 + $0xb8] sm:$0xff]  ;;  %v79_v39 = vld [vmem:[#allocation2 + $0x108] sm:$0xff] }
  0x37   :  { %3910 = vmatpush3.bf16.msra.mxu1 %v3875_v19  ;;  %v150_v21 = vmul.f32 %v4278_v20, %v4278_v20  ;;  %v73_v27 = vld [vmem:[#allocation2 + $0xd8] sm:$0xff] }
  0x38   :  { %3912 = vmatprep.subr.bf16.mxu1 %v3879_v26 }
  0x39   :  { %203 = vadd.xlane.f32.xlu0 %v133_v25  ;;  %v152_v25 = vmul.f32 %v4288_v24, %v4288_v24 }
  0x3a   :  { %205 = vadd.xlane.f32.xlu1 %v134_v46  ;;  %v4325_v46 = vld [vmem:[#allocation2 + $0x160] sm:$0xff] }
  0x3b   :  { %3874 = vmatpush3.bf16.xpose.msra.mxu0 %v3871_v10  ;;  %3914 = vmatpush3.bf16.msra.mxu1 %v3879_v26  ;;  %v4255_v10 = vld [vmem:[#allocation2 + $0x100] sm:$0xff] }
  0x3c   :  { %3876 = vmatprep.subr.bf16.mxu0 %v3875_v19  ;;  %3916 = vmatprep.subr.bf16.mxu1 %v3883_v31  ;;  %v159_v13 = vmul.f32 %v4255_v10, %v4255_v10 }
  0x3d   :  { %207 = vadd.xlane.f32.xlu0 %v135_v30  ;;  %v4301_v30 = vld [vmem:[#allocation2 + $0x140] sm:$0xff] }
  0x3e   :  { %209 = vadd.xlane.f32.xlu1 %v136_v52  ;;  %v167_v32 = vmul.f32 %v4301_v30, %v4301_v30  ;;  %v92_v52 = vld [vmem:[#allocation2 + $0x170] sm:$0xff] }
  0x3f   :  { %3918 = vmatpush3.bf16.msra.mxu1 %v3883_v31 }
  0x40   :  { %3920 = vmatprep.subr.bf16.mxu1 %v3887_v38 }
  0x41   :  { %211 = vadd.xlane.f32.xlu0 %v137_v37 }
  0x42   :  { %213 = vadd.xlane.f32.xlu1 %v138_v58  ;;  %v95_v58 = vld [vmem:[#allocation2 + $0x188] sm:$0xff] }
  0x43   :  { %3878 = vmatpush3.bf16.xpose.msra.mxu0 %v3875_v19  ;;  %3922 = vmatpush3.bf16.msra.mxu1 %v3887_v38  ;;  %v4275_v19 = vld [vmem:[#allocation2 + $0x120] sm:$0xff] }
  0x44   :  { %3880 = vmatprep.subr.bf16.mxu0 %v3879_v26  ;;  %3924 = vmatprep.subr.bf16.mxu1 %v3891_v43 }
  0x45   :  { %215 = vadd.xlane.f32.xlu0 %v139_v42  ;;  %v4319_v42 = vld [vmem:[#allocation2 + $0x158] sm:$0xff] }
  0x46   :  { %217 = vadd.xlane.f32.xlu1 %v140_v0  ;;  %v98_v0 = vld [vmem:[#allocation2 + $0x1a0] sm:$0xff] }
  0x47   :  { %3926 = vmatpush3.bf16.msra.mxu1 %v3891_v43 }
  0x49   :  { %219 = vadd.xlane.f32.xlu0 %v141_v47  ;;  %v83_v47 = vld [vmem:[#allocation2 + $0x128] sm:$0xff] }
  0x4a   :  { %221 = vadd.xlane.f32.xlu1 %v142_v6  ;;  %v101_v6 = vld [vmem:[#allocation2 + $0x1b8] sm:$0xff] }
  0x4b   :  { %3882 = vmatpush3.bf16.xpose.msra.mxu0 %v3879_v26  ;;  %v4295_v26 = vld [vmem:[#allocation2 + $0x138] sm:$0xff] }
  0x4c   :  { %3884 = vmatprep.subr.bf16.mxu0 %v3883_v31  ;;  %v166_v28 = vmul.f32 %v4295_v26, %v4295_v26 }
  0x4d   :  { %223 = vadd.xlane.f32.xlu0 %v143_v49  ;;  %v164_v49 = vmul.f32 %v83_v47, %v83_v47 }
  0x4e   :  { %225 = vadd.xlane.f32.xlu1 %v144_v9  ;;  %v102_v9 = vld [vmem:[#allocation2 + $0x1c0] sm:$0xff] }
  0x51   :  { %227 = vadd.xlane.f32.xlu0 %v145_v53  ;;  %v173_v53 = vmul.f32 %v92_v52, %v92_v52 }
  0x52   :  { %229 = vadd.xlane.f32.xlu1 %v146_v14 }
  0x53   :  { %3886 = vmatpush3.bf16.xpose.msra.mxu0 %v3883_v31  ;;  %v75_v31 = vld [vmem:[#allocation2 + $0xe8] sm:$0xff] }
  0x54   :  { %3888 = vmatprep.subr.bf16.mxu0 %v3887_v38  ;;  %v156_v33 = vmul.f32 %v75_v31, %v75_v31 }
  0x55   :  { %231 = vadd.xlane.f32.xlu0 %v147_v55 }
  0x59   :  { %235 = vadd.xlane.f32.xlu0 %v149_v59  ;;  %v176_v59 = vmul.f32 %v95_v58, %v95_v58 }
  0x5b   :  { %3890 = vmatpush3.bf16.xpose.msra.mxu0 %v3887_v38  ;;  %v4313_v38 = vld [vmem:[#allocation2 + $0x150] sm:$0xff] }
  0x5c   :  { %3892 = vmatprep.subr.bf16.mxu0 %v3891_v43  ;;  %v169_v40 = vmul.f32 %v4313_v38, %v4313_v38 }
  0x5d   :  { %239 = vadd.xlane.f32.xlu0 %v151_v61 }
  0x61   :  { %243 = vadd.xlane.f32.xlu0 %v153_v1  ;;  %v179_v1 = vmul.f32 %v98_v0, %v98_v0 }
  0x63   :  { %3894 = vmatpush3.bf16.xpose.msra.mxu0 %v3891_v43  ;;  %v81_v43 = vld [vmem:[#allocation2 + $0x118] sm:$0xff] }
  0x65   :  { %247 = vadd.xlane.f32.xlu0 %v155_v3 }
  0x69   :  { %251 = vadd.xlane.f32.xlu0 %v157_v8 }
  0x6a   :  { %3640 = vmatmul.mubr.f32.vlgmr.msra.gmra.mrb[0].mxu0 %v4158_v11  ;;  %v4268_v11 = vld [vmem:[#allocation2 + $0xa8] sm:$0xff] }
  0x6b   :  { %3642 = vmatprep.mubr.f32.mxu0 %v4162_v15  ;;  %v161_v15 = vmul.f32 %v4265_v17, %v4265_v17  ;;  %v148_v18 = vmul.f32 %v4268_v11, %v4268_v11 }
  0x6d   :  { %255 = vadd.xlane.f32.xlu0 %v159_v13  ;;  %233 = vadd.xlane.f32.xlu1 %v148_v18  ;;  %v103_v13 = vld [vmem:[#allocation2 + $0x1c8] sm:$0xff] }
  0x6e   :  { %3643 = vmatmul.mubr.f32.gmra.mrb[2].mxu0 %v4170_v22  ;;  %v4285_v22 = vld [vmem:[#allocation2 + $0x130] sm:$0xff]  ;;  %v184_v14 = vmul.f32 %v103_v13, %v103_v13 }
  0x6f   :  { %3645 = vmatprep.mubr.f32.mxu0 %v4164_v16  ;;  %v163_v16 = vmul.f32 %v4275_v19, %v4275_v19 }
  0x71   :  { %259 = vadd.xlane.f32.xlu0 %v161_v15  ;;  %237 = vadd.xlane.f32.xlu1 %v150_v21  ;;  %v106_v21 = vld [vmem:[#allocation2 + $0x1e0] sm:$0xff] }
  0x72   :  { %3646 = vmatmul.mubr.f32.gmra.mrb[4].mxu0 %v4182_v34  ;;  %v4307_v34 = vld [vmem:[#allocation2 + $0x148] sm:$0xff] }
  0x73   :  { %3648 = vmatprep.mubr.f32.mxu0 %v4172_v23  ;;  %v165_v23 = vmul.f32 %v4285_v22, %v4285_v22  ;;  %v168_v36 = vmul.f32 %v4307_v34, %v4307_v34 }
  0x75   :  { %263 = vadd.xlane.f32.xlu0 %v163_v16  ;;  %241 = vadd.xlane.f32.xlu1 %v152_v25 }
  0x76   :  { %3649 = vmatmul.mubr.f32.gmra.mrb[6].mxu0 %v4194_v44  ;;  %v170_v44 = vmul.f32 %v4319_v42, %v4319_v42 }
  0x77   :  { %3651 = vmatprep.mubr.f32.mxu0 %v4178_v29  ;;  %v154_v29 = vmul.f32 %v73_v27, %v73_v27 }
  0x79   :  { %267 = vadd.xlane.f32.xlu0 %v165_v23  ;;  %245 = vadd.xlane.f32.xlu1 %v154_v29  ;;  %v109_v29 = vld [vmem:[#allocation2 + $0x1f8] sm:$0xff] }
  0x7a   :  { %3652 = vmatmul.mubr.f32.gmra.mrb[8].mxu0 %v4206_v50  ;;  %v91_v50 = vld [vmem:[#allocation2 + $0x168] sm:$0xff] }
  0x7b   :  { %3654 = vmatprep.mubr.f32.mxu0 %v4184_v35  ;;  %v77_v35 = vld [vmem:[#allocation2 + $0xf8] sm:$0xff] }
  0x7c   :  { %v158_v37 = vmul.f32 %v77_v35, %v77_v35 }
  0x7d   :  { %269 = vadd.xlane.f32.xlu0 %v166_v28  ;;  %249 = vadd.xlane.f32.xlu1 %v156_v33 }
  0x7e   :  { %3655 = vmatmul.mubr.f32.gmra.mrb[10].mxu0 %v4218_v56  ;;  %v94_v56 = vld [vmem:[#allocation2 + $0x180] sm:$0xff] }
  0x7f   :  { %3657 = vmatprep.mubr.f32.mxu0 %v4190_v41  ;;  %v160_v41 = vmul.f32 %v79_v39, %v79_v39 }
  0x81   :  { %271 = vadd.xlane.f32.xlu0 %v167_v32  ;;  %253 = vadd.xlane.f32.xlu1 %v158_v37 }
  0x82   :  { %3658 = vmatmul.mubr.f32.gmra.mrb[12].mxu0 %v4230_v62  ;;  %v97_v62 = vld [vmem:[#allocation2 + $0x198] sm:$0xff] }
  0x83   :  { %3660 = vmatprep.mubr.f32.mxu0 %v4196_v45  ;;  %v162_v45 = vmul.f32 %v81_v43, %v81_v43 }
  0x85   :  { %273 = vadd.xlane.f32.xlu0 %v168_v36  ;;  %257 = vadd.xlane.f32.xlu1 %v160_v41 }
  0x86   :  { %3661 = vmatmul.mubr.f32.gmra.mrb[14].mxu0 %v4242_v4  ;;  %v100_v4 = vld [vmem:[#allocation2 + $0x1b0] sm:$0xff] }
  0x87   :  { %3663 = vmatprep.mubr.f32.mxu0 %v4202_v48  ;;  %v171_v48 = vmul.f32 %v4325_v46, %v4325_v46 }
  0x89   :  { %275 = vadd.xlane.f32.xlu0 %v169_v40  ;;  %261 = vadd.xlane.f32.xlu1 %v162_v45 }
  0x8a   :  { %3664 = vmatmul.mubr.f32.gmra.mrb[16].mxu0 %v4248_v7  ;;  %v182_v7 = vmul.f32 %v101_v6, %v101_v6 }
  0x8b   :  { %3666 = vmatprep.mubr.f32.mxu0 %v4208_v51  ;;  %v172_v51 = vmul.f32 %v91_v50, %v91_v50 }
  0x8d   :  { %277 = vadd.xlane.f32.xlu0 %v170_v44  ;;  %265 = vadd.xlane.f32.xlu1 %v164_v49 }
  0x8e   :  { %3667 = vmatmul.mubr.f32.gmra.mrb[18].mxu0 %v4258_v12 }
  0x8f   :  { %3669 = vmatprep.mubr.f32.mxu0 %v4214_v54  ;;  %v93_v54 = vld [vmem:[#allocation2 + $0x178] sm:$0xff] }
  0x90   :  { %v174_v55 = vmul.f32 %v93_v54, %v93_v54 }
  0x91   :  { %279 = vadd.xlane.f32.xlu0 %v171_v48  ;;  %v4397_v48 = vld [vmem:[%s5904_s2] ss:$0 sm:$0xff]  ;;  %s4101_s2 = smov [#allocation7]  }
  0x92   :  { %3670 = vmatmul.mubr.f32.gmra.mrb[20].mxu0 %v4268_v11  ;;  %v104_v11 = vld [vmem:[#allocation2 + $0x1d0] sm:$0xff]  ;;  %s3291_s15 = sshll.u32 %s4101_s2, 4  ;;  %s3292_s15 = int_to_ptr.vmem [resolvable:$true] %s3291_s15 }
  0x93   :  { %3672 = vmatprep.mubr.f32.mxu0 %v4220_v57  ;;  %v175_v57 = vmul.f32 %v94_v56, %v94_v56  ;;  %v185_v15 = vmul.f32 %v104_v11, %v104_v11  ;;  %s4044_s16 = scalar_lea.vmem %s3292_s15, 8192  ;;  %p4049_p3 = scmp.lt.s32.totalorder %s3292_s15, %s3292_s15 }
  0x94   :  { %p4045_p2 = scmp.ne.s32.totalorder %s3292_s15, %s4044_s16  ;;  %p4050_p4 = scmp.lt.s32.totalorder %s4044_s16, %s4044_s16 }
  0x95   :  { %281 = vadd.xlane.f32.xlu0 %v172_v51 }
  0x96   :  { %3673 = vmatmul.mubr.f32.gmra.mrb[22].mxu0 %v4278_v20  ;;  %p4051_p5 = por %p4050_p4, %p4049_p3 }
  0x97   :  { %3675 = vmatprep.mubr.f32.mxu0 %v4226_v60  ;;  %v96_v60 = vld [vmem:[#allocation2 + $0x190] sm:$0xff] }
  0x98   :  { %v177_v61 = vmul.f32 %v96_v60, %v96_v60  ;;  %p4052_p6 = pnand %p4051_p5, %p4045_p2 }
  0x99   :  { %283 = vadd.xlane.f32.xlu0 %v173_v53 }
  0x9a   :  { %3676 = vmatmul.mubr.f32.gmra.mrb[24].mxu0 %v4288_v24  ;;  %v107_v24 = vld [vmem:[#allocation2 + $0x1e8] sm:$0xff] }
  0x9b   :  { %3678 = vmatprep.mubr.f32.mxu0 %v4232_v63  ;;  %v178_v63 = vmul.f32 %v97_v62, %v97_v62  ;;  %v188_v25 = vmul.f32 %v107_v24, %v107_v24 }
  0x9d   :  { %285 = vadd.xlane.f32.xlu0 %v174_v55 }
  0x9e   :  { %3679 = vmatmul.mubr.f32.gmra.mrb[26].mxu0 %v73_v27 }
  0x9f   :  { %3681 = vmatprep.mubr.f32.mxu0 %v4238_v2  ;;  %v99_v2 = vld [vmem:[#allocation2 + $0x1a8] sm:$0xff] }
  0xa0   :  { %v180_v3 = vmul.f32 %v99_v2, %v99_v2 }
  0xa1   :  { %287 = vadd.xlane.f32.xlu0 %v175_v57 }
  0xa2   :  { %3682 = vmatmul.mubr.f32.gmra.mrb[28].mxu0 %v75_v31 }
  0xa3   :  { %3684 = vmatprep.mubr.f32.mxu0 %v4244_v5  ;;  %v181_v5 = vmul.f32 %v100_v4, %v100_v4 }
  0xa5   :  { %289 = vadd.xlane.f32.xlu0 %v176_v59 }
  0xa6   :  { %3685 = vmatmul.mubr.f32.gmra.mrb[30].mxu0 %v77_v35 }
  0xa7   :  { %3687 = vmatprep.mubr.f32.mxu0 %v4255_v10  ;;  %v183_v10 = vmul.f32 %v102_v9, %v102_v9 }
  0xa9   :  { %291 = vadd.xlane.f32.xlu0 %v177_v61 }
  0xaa   :  { %3688 = vmatmul.mubr.f32.gmra.mrb[32].mxu0 %v79_v39 }
  0xab   :  { %3690 = vmatprep.mubr.f32.mxu0 %v4265_v17 }
  0xad   :  { %293 = vadd.xlane.f32.xlu0 %v178_v63 }
  0xae   :  { %3691 = vmatmul.mubr.f32.gmra.mrb[34].mxu0 %v81_v43 }
  0xaf   :  { %3693 = vmatprep.mubr.f32.mxu0 %v4275_v19  ;;  %v105_v19 = vld [vmem:[#allocation2 + $0x1d8] sm:$0xff] }
  0xb0   :  { %v186_v20 = vmul.f32 %v105_v19, %v105_v19 }
  0xb1   :  { %295 = vadd.xlane.f32.xlu0 %v179_v1 }
  0xb2   :  { %3694 = vmatmul.mubr.f32.gmra.mrb[36].mxu0 %v83_v47 }
  0xb3   :  { %3696 = vmatprep.mubr.f32.mxu0 %v4285_v22  ;;  %v187_v22 = vmul.f32 %v106_v21, %v106_v21 }
  0xb5   :  { %297 = vadd.xlane.f32.xlu0 %v180_v3 }
  0xb6   :  { %3697 = vmatmul.mubr.f32.gmra.mrb[38].mxu0 %v4295_v26  ;;  %v108_v26 = vld [vmem:[#allocation2 + $0x1f0] sm:$0xff] }
  0xb7   :  { %3699 = vmatprep.mubr.f32.mxu0 %v4301_v30  ;;  %v189_v27 = vmul.f32 %v108_v26, %v108_v26  ;;  %v190_v30 = vmul.f32 %v109_v29, %v109_v29 }
  0xb9   :  { %299 = vadd.xlane.f32.xlu0 %v181_v5 }
  0xba   :  { %3700 = vmatmul.mubr.f32.gmra.mrb[40].mxu0 %v4307_v34  ;;  %v4346_v8 = vpop.xlane.xlu0 %191 }
  0xbb   :  { %3702 = vmatprep.mubr.f32.mxu0 %v4313_v38  ;;  %v196_v47 = vpop.xlane.xlu1 %195 }
  0xbd   :  { %301 = vadd.xlane.f32.xlu0 %v182_v7 }
  0xbe   :  { %3703 = vmatmul.mubr.f32.gmra.mrb[42].mxu0 %v4319_v42  ;;  %v4350_v12 = vpop.xlane.xlu0 %193 }
  0xbf   :  { %3705 = vmatprep.mubr.f32.mxu0 %v4325_v46  ;;  %v711_v49 = vadd.f32 %v4397_v48, %v4350_v12 }
  0xc1   :  { %303 = vadd.xlane.f32.xlu0 %v183_v10 }
  0xc2   :  { %3706 = vmatmul.mubr.f32.gmra.mrb[44].mxu0 %v91_v50  ;;  %v4352_v17 = vpop.xlane.xlu0 %199 }
  0xc3   :  { %3708 = vmatprep.mubr.f32.mxu0 %v92_v52 }
  0xc5   :  { %305 = vadd.xlane.f32.xlu0 %v184_v14 }
  0xc6   :  { %3709 = vmatmul.mubr.f32.gmra.mrb[46].mxu0 %v93_v54  ;;  %v4354_v18 = vpop.xlane.xlu0 %203  ;;  %v198_v54 = vpop.xlane.xlu1 %197 }
  0xc7   :  { %3711 = vmatprep.mubr.f32.mxu0 %v94_v56  ;;  %v713_v61 = vadd.f32 %v4397_v48, %v198_v54 }
  0xc9   :  { %307 = vadd.xlane.f32.xlu0 %v185_v15 }
  0xca   :  { %3712 = vmatmul.mubr.f32.gmra.mrb[48].mxu0 %v95_v58  ;;  %v4356_v16 = vpop.xlane.xlu0 %207  ;;  %v710_v58 = vadd.f32 %v4397_v48, %v4346_v8  ;;  %v202_v3 = vpop.xlane.xlu1 %201 }
  0xcb   :  { %3714 = vmatprep.mubr.f32.mxu0 %v96_v60 }
  0xcd   :  { %309 = vadd.xlane.f32.xlu0 %v186_v20 }
  0xce   :  { %3715 = vmatmul.mubr.f32.gmra.mrb[50].mxu0 %v97_v62  ;;  %v4358_v23 = vpop.xlane.xlu0 %211  ;;  %v206_v15 = vpop.xlane.xlu1 %205 }
  0xcf   :  { %3717 = vmatprep.mubr.f32.mxu0 %v98_v0 }
  0xd1   :  { %311 = vadd.xlane.f32.xlu0 %v187_v22 }
  0xd2   :  { %3718 = vmatmul.mubr.f32.gmra.mrb[52].mxu0 %v99_v2  ;;  %v4360_v28 = vpop.xlane.xlu0 %215 }
  0xd3   :  { %3720 = vmatprep.mubr.f32.mxu0 %v100_v4  ;;  %v712_v4 = vadd.f32 %v4397_v48, %v196_v47 }
  0xd5   :  { %313 = vadd.xlane.f32.xlu0 %v188_v25 }
  0xd6   :  { %3721 = vmatmul.mubr.f32.gmra.mrb[54].mxu0 %v101_v6  ;;  %v4362_v31 = vpop.xlane.xlu0 %219 }
  0xd7   :  { %3723 = vmatprep.mubr.f32.mxu0 %v102_v9  ;;  %v715_v9 = vadd.f32 %v4397_v48, %v202_v3 }
  0xd9   :  { %315 = vadd.xlane.f32.xlu0 %v189_v27 }
  0xda   :  { %3724 = vmatmul.mubr.f32.gmra.mrb[56].mxu0 %v103_v13  ;;  %v4364_v32 = vpop.xlane.xlu0 %223 }
  0xdb   :  { %3726 = vmatprep.mubr.f32.mxu0 %v104_v11 }
  0xdd   :  { %317 = vadd.xlane.f32.xlu0 %v190_v30 }
  0xde   :  { %3727 = vmatmul.mubr.f32.gmra.mrb[58].mxu0 %v105_v19  ;;  %v4366_v33 = vpop.xlane.xlu0 %227  ;;  %v714_v19 = vadd.f32 %v4397_v48, %v4352_v17  ;;  %v210_v17 = vpop.xlane.xlu1 %209 }
  0xdf   :  { %3729 = vmatprep.mubr.f32.mxu0 %v106_v21 }
  0xe2   :  { %3730 = vmatmul.mubr.f32.gmra.mrb[60].mxu0 %v107_v24  ;;  %v4368_v34 = vpop.xlane.xlu0 %231 }
  0xe3   :  { %3732 = vmatprep.mubr.f32.mxu0 %v108_v26  ;;  %v717_v26 = vadd.f32 %v4397_v48, %v206_v15 }
  0xe6   :  { %3733 = vmatmul.mubr.f32.gmra.mrb[62].mxu0 %v109_v29  ;;  %v4370_v35 = vpop.xlane.xlu0 %235 }
  0xea   :  { %v4372_v36 = vpop.xlane.xlu0 %239 }
  0xee   :  { %v4374_v37 = vpop.xlane.xlu0 %243 }
  0xf2   :  { %v4376_v38 = vpop.xlane.xlu0 %247 }
  0xf6   :  { %v4378_v39 = vpop.xlane.xlu0 %251 }
  0xfa   :  { %v4380_v40 = vpop.xlane.xlu0 %255 }
  0xfe   :  { %v4382_v41 = vpop.xlane.xlu0 %259 }
 0x102   :  { %v4384_v42 = vpop.xlane.xlu0 %263 }
 0x106   :  { %v4386_v43 = vpop.xlane.xlu0 %267 }
 0x10a   :  { %v4388_v44 = vpop.xlane.xlu0 %269 }
 0x10e   :  { %v4390_v45 = vpop.xlane.xlu0 %271 }
 0x112   :  { %v4392_v46 = vpop.xlane.xlu0 %273 }
 0x116   :  { %v4401_v53 = vpop.xlane.xlu0 %275 }
 0x11a   :  { %v4411_v63 = vpop.xlane.xlu0 %277 }
 0x11e   :  { %v4419_v10 = vpop.xlane.xlu0 %279 }
 0x122   :  { %v4428_v21 = vpop.xlane.xlu0 %281 }
 0x13d   :  { %v3641_v50 = vpop.f32.mrb[0].mxu0 }
 0x13e   :  { %v775_v51 = vmul.f32 2.0, %v3641_v50  ;;  %v385_v52 = vpop.f32.mrb[1].mxu0  ;;  %v716_v50 = vadd.f32 %v4397_v48, %v4354_v18  ;;  %v214_v18 = vpop.xlane.xlu1 %213 }
 0x13f   :  { %v774_v55 = vmul.f32 2.0, %v385_v52 }
 0x140   :  { %v4403_v56 = vsub.f32 %v711_v49, %v775_v51  ;;  %v4437_v49 = vpop.xlane.xlu0 %283 }
 0x141   :  { %v3644_v57 = vpop.f32.mrb[2].mxu0  ;;  %v4409_v62 = vsub.f32 %v710_v58, %v774_v55 }
 0x142   :  { %v777_v59 = vmul.f32 2.0, %v3644_v57  ;;  %v395_v60 = vpop.f32.mrb[3].mxu0  ;;  %904 = vmin.xlane.f32.xlu1 %v4403_v56  ;;  %v719_v57 = vadd.f32 %v4397_v48, %v210_v17 }
 0x143   :  { %v776_v5 = vmul.f32 2.0, %v395_v60 }
 0x144   :  { %v4414_v2 = vsub.f32 %v713_v61, %v777_v59  ;;  %v4445_v59 = vpop.xlane.xlu0 %285 }
 0x145   :  { %v3647_v0 = vpop.f32.mrb[4].mxu0  ;;  %v4421_v12 = vsub.f32 %v712_v4, %v776_v5 }
 0x146   :  { %v405_v1 = vpop.f32.mrb[5].mxu0  ;;  %902 = vmin.xlane.f32.xlu1 %v4409_v62  ;;  %v779_v7 = vmul.f32 2.0, %v3647_v0 }
 0x147   :  { %v778_v20 = vmul.f32 2.0, %v405_v1  ;;  %v718_v1 = vadd.f32 %v4397_v48, %v4356_v16 }
 0x148   :  { %v4424_v11 = vsub.f32 %v715_v9, %v779_v7  ;;  %v721_v7 = vadd.f32 %v4397_v48, %v214_v18 }
 0x149   :  { %v3650_v6 = vpop.f32.mrb[6].mxu0  ;;  %v4432_v27 = vsub.f32 %v714_v19, %v778_v20  ;;  %v720_v19 = vadd.f32 %v4397_v48, %v4358_v23 }
 0x14a   :  { %v415_v8 = vpop.f32.mrb[7].mxu0  ;;  %908 = vmin.xlane.f32.xlu1 %v4414_v2  ;;  %v781_v24 = vmul.f32 2.0, %v3650_v6 }
 0x14b   :  { %v780_v51 = vmul.f32 2.0, %v415_v8  ;;  %v4460_v8 = vpop.xlane.xlu0 %287 }
 0x14c   :  { %v4435_v47 = vsub.f32 %v717_v26, %v781_v24 }
 0x14d   :  { %v3653_v13 = vpop.f32.mrb[8].mxu0  ;;  %v4443_v58 = vsub.f32 %v716_v50, %v780_v51 }
 0x14e   :  { %v425_v14 = vpop.f32.mrb[9].mxu0  ;;  %906 = vmin.xlane.f32.xlu1 %v4421_v12  ;;  %v783_v54 = vmul.f32 2.0, %v3653_v13 }
 0x14f   :  { %v782_v3 = vmul.f32 2.0, %v425_v14  ;;  %v218_v14 = vpop.xlane.xlu1 %217 }
 0x150   :  { %v4450_v0 = vsub.f32 %v719_v57, %v783_v54  ;;  %v723_v50 = vadd.f32 %v4397_v48, %v218_v14 }
 0x151   :  { %v3656_v22 = vpop.f32.mrb[10].mxu0  ;;  %v4462_v9 = vsub.f32 %v718_v1, %v782_v3  ;;  %v736_v3 = vadd.f32 %v4397_v48, %v4374_v37 }
 0x152   :  { %v435_v25 = vpop.f32.mrb[11].mxu0  ;;  %912 = vmin.xlane.f32.xlu1 %v4424_v11  ;;  %v785_v5 = vmul.f32 2.0, %v3656_v22  ;;  %v4473_v22 = vpop.xlane.xlu0 %289 }
 0x153   :  { %v784_v20 = vmul.f32 2.0, %v435_v25  ;;  %v222_v18 = vpop.xlane.xlu1 %221 }
 0x154   :  { %v4469_v16 = vsub.f32 %v721_v7, %v785_v5 }
 0x155   :  { %v3659_v29 = vpop.f32.mrb[12].mxu0  ;;  %v4481_v51 = vsub.f32 %v720_v19, %v784_v20  ;;  %v725_v19 = vadd.f32 %v4397_v48, %v222_v18 }
 0x156   :  { %v445_v30 = vpop.f32.mrb[13].mxu0  ;;  %910 = vmin.xlane.f32.xlu1 %v4432_v27  ;;  %6024 = vst [vmem:[#allocation14_spill] sm:$0xff] %v4469_v16  ;;  %v787_v26 = vmul.f32 2.0, %v3659_v29  ;;  %v4490_v25 = vpop.xlane.xlu0 %291  ;;  %v722_v29 = vadd.f32 %v4397_v48, %v4360_v28  ;;  %v738_v28 = vadd.f32 %v4397_v48, %v4376_v38  ;;  %v740_v38 = vadd.f32 %v4397_v48, %v4378_v39 }
 0x157   :  { %6025 = vst [vmem:[#allocation15_spill] sm:$0xff] %v4481_v51  ;;  %v786_v1 = vmul.f32 2.0, %v445_v30  ;;  %v226_v18 = vpop.xlane.xlu1 %225  ;;  %v742_v39 = vadd.f32 %v4397_v48, %v4380_v40  ;;  %v744_v40 = vadd.f32 %v4397_v48, %v4382_v41 }
 0x158   :  { %v4488_v23 = vsub.f32 %v723_v50, %v787_v26 }
 0x159   :  { %v3662_v52 = vpop.f32.mrb[14].mxu0  ;;  %v4500_v26 = vsub.f32 %v722_v29, %v786_v1  ;;  %v724_v29 = vadd.f32 %v4397_v48, %v4362_v31 }
 0x15a   :  { %v455_v55 = vpop.f32.mrb[15].mxu0  ;;  %916 = vmin.xlane.f32.xlu1 %v4435_v47  ;;  %6026 = vst [vmem:[#allocation16_spill] sm:$0xff] %v4488_v23  ;;  %v789_v7 = vmul.f32 2.0, %v3662_v52  ;;  %v4502_v50 = vpop.xlane.xlu0 %293 }
 0x15b   :  { %v788_v1 = vmul.f32 2.0, %v455_v55 }
 0x15c   :  { %v4511_v52 = vsub.f32 %v725_v19, %v789_v7  ;;  %v727_v7 = vadd.f32 %v4397_v48, %v226_v18 }
 0x15d   :  { %v3665_v60 = vpop.f32.mrb[16].mxu0  ;;  %v4527_v31 = vsub.f32 %v724_v29, %v788_v1  ;;  %v726_v29 = vadd.f32 %v4397_v48, %v4364_v32 }
 0x15e   :  { %v4447_v61 = vpop.f32.mrb[17].mxu0  ;;  %914 = vmin.xlane.f32.xlu1 %v4443_v58  ;;  %v4524_v19 = vpop.xlane.xlu0 %295 }
 0x15f   :  { %v790_v1 = vmul.f32 2.0, %v4447_v61  ;;  %v746_v61 = vadd.f32 %v4397_v48, %v4384_v42 }
 0x161   :  { %v4454_v4 = vpop.f32.mrb[18].mxu0  ;;  %v4554_v32 = vsub.f32 %v726_v29, %v790_v1  ;;  %v728_v29 = vadd.f32 %v4397_v48, %v4366_v33 }
 0x162   :  { %v4456_v6 = vpop.f32.mrb[19].mxu0  ;;  %920 = vmin.xlane.f32.xlu1 %v4450_v0 }
 0x163   :  { %v792_v42 = vmul.f32 2.0, %v4456_v6 }
 0x165   :  { %v4464_v13 = vpop.f32.mrb[20].mxu0  ;;  %v4581_v33 = vsub.f32 %v728_v29, %v792_v42  ;;  %v730_v29 = vadd.f32 %v4397_v48, %v4368_v34 }
 0x166   :  { %v4466_v15 = vpop.f32.mrb[21].mxu0  ;;  %918 = vmin.xlane.f32.xlu1 %v4462_v9 }
 0x167   :  { %v794_v42 = vmul.f32 2.0, %v4466_v15 }
 0x169   :  { %v4475_v24 = vpop.f32.mrb[22].mxu0  ;;  %v4610_v15 = vsub.f32 %v730_v29, %v794_v42  ;;  %v732_v29 = vadd.f32 %v4397_v48, %v4370_v35 }
 0x16a   :  { %v4477_v17 = vpop.f32.mrb[23].mxu0  ;;  %924 = vmin.xlane.f32.xlu1 %v4469_v16 }
 0x16b   :  { %v796_v42 = vmul.f32 2.0, %v4477_v17 }
 0x16d   :  { %v4483_v54 = vpop.f32.mrb[24].mxu0  ;;  %v4637_v17 = vsub.f32 %v732_v29, %v796_v42  ;;  %v734_v29 = vadd.f32 %v4397_v48, %v4372_v36 }
 0x16e   :  { %v4485_v57 = vpop.f32.mrb[25].mxu0  ;;  %922 = vmin.xlane.f32.xlu1 %v4481_v51 }
 0x16f   :  { %v798_v42 = vmul.f32 2.0, %v4485_v57 }
 0x171   :  { %v4496_v5 = vpop.f32.mrb[26].mxu0  ;;  %v4662_v36 = vsub.f32 %v734_v29, %v798_v42 }
 0x172   :  { %v515_v14 = vpop.f32.mrb[27].mxu0  ;;  %928 = vmin.xlane.f32.xlu1 %v4488_v23 }
 0x173   :  { %v800_v20 = vmul.f32 2.0, %v515_v14  ;;  %6042 = vst [vmem:[#allocation32_spill] sm:$0xff] %v4662_v36 }
 0x175   :  { %v4506_v30 = vpop.f32.mrb[28].mxu0  ;;  %v4508_v16 = vsub.f32 %v736_v3, %v800_v20  ;;  %v791_v20 = vmul.f32 2.0, %v3665_v60 }
 0x176   :  { %v525_v37 = vpop.f32.mrb[29].mxu0  ;;  %926 = vmin.xlane.f32.xlu1 %v4500_v26 }
 0x177   :  { %6027 = vst [vmem:[#allocation17_spill] sm:$0xff] %v4508_v16  ;;  %v802_v23 = vmul.f32 2.0, %v525_v37  ;;  %954 = vmin.xlane.f32.xlu0 %v4508_v16 }
 0x179   :  { %v4518_v14 = vpop.f32.mrb[30].mxu0  ;;  %v4520_v3 = vsub.f32 %v738_v28, %v802_v23  ;;  %v4536_v28 = vsub.f32 %v727_v7, %v791_v20  ;;  %v793_v20 = vmul.f32 2.0, %v4454_v4 }
 0x17a   :  { %v535_v51 = vpop.f32.mrb[31].mxu0  ;;  %932 = vmin.xlane.f32.xlu1 %v4511_v52 }
 0x17b   :  { %6028 = vst [vmem:[#allocation18_spill] sm:$0xff] %v4520_v3  ;;  %v804_v37 = vmul.f32 2.0, %v535_v51  ;;  %958 = vmin.xlane.f32.xlu0 %v4520_v3  ;;  %v230_v51 = vpop.xlane.xlu1 %229  ;;  %v4542_v3 = vpop.xlane.xlu0 %297 }
 0x17d   :  { %v4531_v55 = vpop.f32.mrb[32].mxu0  ;;  %v4533_v23 = vsub.f32 %v740_v38, %v804_v37 }
 0x17e   :  { %v545_v60 = vpop.f32.mrb[33].mxu0  ;;  %930 = vmin.xlane.f32.xlu1 %v4527_v31 }
 0x17f   :  { %6029 = vst [vmem:[#allocation19_spill] sm:$0xff] %v4533_v23  ;;  %v806_v18 = vmul.f32 2.0, %v545_v60  ;;  %962 = vmin.xlane.f32.xlu0 %v4533_v23  ;;  %v729_v60 = vadd.f32 %v4397_v48, %v230_v51 }
 0x181   :  { %v4546_v38 = vpop.f32.mrb[34].mxu0  ;;  %v4548_v37 = vsub.f32 %v742_v39, %v806_v18  ;;  %v4563_v4 = vsub.f32 %v729_v60, %v793_v20  ;;  %v4565_v18 = vpop.xlane.xlu0 %299  ;;  %v795_v20 = vmul.f32 2.0, %v4464_v13 }
 0x182   :  { %v555_v7 = vpop.f32.mrb[35].mxu0  ;;  %936 = vmin.xlane.f32.xlu1 %v4536_v28 }
 0x183   :  { %6030 = vst [vmem:[#allocation20_spill] sm:$0xff] %v4548_v37  ;;  %v808_v23 = vmul.f32 2.0, %v555_v7  ;;  %966 = vmin.xlane.f32.xlu0 %v4548_v37  ;;  %6032 = vst [vmem:[#allocation22_spill] sm:$0xff] %v4563_v4  ;;  %v234_v7 = vpop.xlane.xlu1 %233 }
 0x185   :  { %v4558_v41 = vsub.f32 %v744_v40, %v808_v23  ;;  %v4560_v16 = vpop.f32.mrb[36].mxu0  ;;  %v748_v23 = vadd.f32 %v4397_v48, %v4386_v43  ;;  %v4583_v6 = vpop.xlane.xlu0 %301  ;;  %v750_v43 = vadd.f32 %v4397_v48, %v4390_v45  ;;  %v752_v45 = vadd.f32 %v4397_v48, %v4401_v53 }
 0x186   :  { %v565_v39 = vpop.f32.mrb[37].mxu0  ;;  %934 = vmin.xlane.f32.xlu1 %v4554_v32  ;;  %v754_v53 = vadd.f32 %v4397_v48, %v4419_v10  ;;  %v756_v10 = vadd.f32 %v4397_v48, %v4437_v49  ;;  %v758_v49 = vadd.f32 %v4397_v48, %v4460_v8  ;;  %v760_v8 = vadd.f32 %v4397_v48, %v4490_v25 }
 0x187   :  { %6031 = vst [vmem:[#allocation21_spill] sm:$0xff] %v4558_v41  ;;  %v810_v51 = vmul.f32 2.0, %v565_v39  ;;  %970 = vmin.xlane.f32.xlu0 %v4558_v41  ;;  %v731_v39 = vadd.f32 %v4397_v48, %v234_v7  ;;  %v238_v13 = vpop.xlane.xlu1 %237  ;;  %v762_v25 = vadd.f32 %v4397_v48, %v4524_v19  ;;  %v764_v19 = vadd.f32 %v4397_v48, %v4565_v18 }
 0x189   :  { %v4573_v1 = vsub.f32 %v746_v61, %v810_v51  ;;  %v4575_v40 = vpop.f32.mrb[38].mxu0 }
 0x18a   :  { %v575_v60 = vpop.f32.mrb[39].mxu0  ;;  %940 = vmin.xlane.f32.xlu1 %v4563_v4  ;;  %v4592_v4 = vsub.f32 %v731_v39, %v795_v20  ;;  %v4607_v39 = vpop.xlane.xlu0 %303 }
 0x18b   :  { %6033 = vst [vmem:[#allocation23_spill] sm:$0xff] %v4573_v1  ;;  %v812_v41 = vmul.f32 2.0, %v575_v60  ;;  %974 = vmin.xlane.f32.xlu0 %v4573_v1  ;;  %v242_v60 = vpop.xlane.xlu1 %241  ;;  %v797_v1 = vmul.f32 2.0, %v4475_v24  ;;  %v766_v18 = vadd.f32 %v4397_v48, %v4607_v39 }
 0x18c   :  { %6035 = vst [vmem:[#allocation25_spill] sm:$0xff] %v4592_v4 }
 0x18d   :  { %v4587_v61 = vsub.f32 %v748_v23, %v812_v41  ;;  %v4589_v51 = vpop.f32.mrb[40].mxu0 }
 0x18e   :  { %v585_v37 = vpop.f32.mrb[41].mxu0  ;;  %938 = vmin.xlane.f32.xlu1 %v4581_v33 }
 0x18f   :  { %6034 = vst [vmem:[#allocation24_spill] sm:$0xff] %v4587_v61  ;;  %v814_v7 = vmul.f32 2.0, %v585_v37  ;;  %978 = vmin.xlane.f32.xlu0 %v4587_v61  ;;  %v733_v37 = vadd.f32 %v4397_v48, %v238_v13  ;;  %v246_v24 = vpop.xlane.xlu1 %245 }
 0x191   :  { %v4600_v41 = vsub.f32 %v750_v43, %v814_v7  ;;  %v4602_v23 = vpop.f32.mrb[42].mxu0 }
 0x192   :  { %v595_v20 = vpop.f32.mrb[43].mxu0  ;;  %944 = vmin.xlane.f32.xlu1 %v4592_v4  ;;  %v4619_v4 = vsub.f32 %v733_v37, %v797_v1  ;;  %v799_v1 = vmul.f32 2.0, %v4483_v54 }
 0x193   :  { %6036 = vst [vmem:[#allocation26_spill] sm:$0xff] %v4600_v41  ;;  %v816_v34 = vmul.f32 2.0, %v595_v20  ;;  %982 = vmin.xlane.f32.xlu0 %v4600_v41  ;;  %v4625_v20 = vpop.xlane.xlu0 %305  ;;  %v250_v35 = vpop.xlane.xlu1 %249 }
 0x194   :  { %6038 = vst [vmem:[#allocation28_spill] sm:$0xff] %v4619_v4 }
 0x195   :  { %v4614_v43 = vsub.f32 %v752_v45, %v816_v34  ;;  %v4616_v7 = vpop.f32.mrb[44].mxu0 }
 0x196   :  { %v605_v61 = vpop.f32.mrb[45].mxu0  ;;  %942 = vmin.xlane.f32.xlu1 %v4610_v15 }
 0x197   :  { %6037 = vst [vmem:[#allocation27_spill] sm:$0xff] %v4614_v43  ;;  %v818_v13 = vmul.f32 2.0, %v605_v61  ;;  %986 = vmin.xlane.f32.xlu0 %v4614_v43  ;;  %v735_v61 = vadd.f32 %v4397_v48, %v242_v60 }
 0x199   :  { %v4629_v45 = vsub.f32 %v754_v53, %v818_v13  ;;  %v4631_v34 = vpop.f32.mrb[46].mxu0  ;;  %v4646_v54 = vsub.f32 %v735_v61, %v799_v1  ;;  %v801_v1 = vmul.f32 2.0, %v4496_v5  ;;  %v803_v5 = vmul.f32 2.0, %v4506_v30 }
 0x19a   :  { %v615_v37 = vpop.f32.mrb[47].mxu0  ;;  %948 = vmin.xlane.f32.xlu1 %v4619_v4  ;;  %v308_v4 = vpop.xlane.xlu0 %307  ;;  %v805_v30 = vmul.f32 2.0, %v4518_v14  ;;  %v807_v14 = vmul.f32 2.0, %v4531_v55  ;;  %v809_v55 = vmul.f32 2.0, %v4546_v38 }
 0x19b   :  { %6039 = vst [vmem:[#allocation29_spill] sm:$0xff] %v4629_v45  ;;  %v820_v43 = vmul.f32 2.0, %v615_v37  ;;  %990 = vmin.xlane.f32.xlu0 %v4629_v45  ;;  %v254_v37 = vpop.xlane.xlu1 %253  ;;  %v768_v39 = vadd.f32 %v4397_v48, %v308_v4 }
 0x19d   :  { %v4641_v53 = vsub.f32 %v756_v10, %v820_v43  ;;  %v4643_v13 = vpop.f32.mrb[48].mxu0 }
 0x19e   :  { %v625_v41 = vpop.f32.mrb[49].mxu0  ;;  %946 = vmin.xlane.f32.xlu1 %v4637_v17  ;;  %v4664_v57 = vpop.xlane.xlu0 %309 }
 0x19f   :  { %6040 = vst [vmem:[#allocation30_spill] sm:$0xff] %v4641_v53  ;;  %v822_v60 = vmul.f32 2.0, %v625_v41  ;;  %994 = vmin.xlane.f32.xlu0 %v4641_v53  ;;  %v737_v41 = vadd.f32 %v4397_v48, %v246_v24  ;;  %v739_v24 = vadd.f32 %v4397_v48, %v250_v35  ;;  %v258_v42 = vpop.xlane.xlu1 %257  ;;  %v741_v35 = vadd.f32 %v4397_v48, %v254_v37 }
 0x1a0   :  { %v743_v37 = vadd.f32 %v4397_v48, %v258_v42 }
 0x1a1   :  { %v4654_v43 = vsub.f32 %v758_v49, %v822_v60  ;;  %v4656_v10 = vpop.f32.mrb[50].mxu0 }
 0x1a2   :  { %v635_v61 = vpop.f32.mrb[51].mxu0  ;;  %952 = vmin.xlane.f32.xlu1 %v4646_v54 }
 0x1a3   :  { %6041 = vst [vmem:[#allocation31_spill] sm:$0xff] %v4654_v43  ;;  %v824_v53 = vmul.f32 2.0, %v635_v61  ;;  %998 = vmin.xlane.f32.xlu0 %v4654_v43  ;;  %v4675_v61 = vsub.f32 %v737_v41, %v801_v1  ;;  %v4687_v1 = vsub.f32 %v739_v24, %v803_v5  ;;  %v4699_v5 = vsub.f32 %v741_v35, %v805_v30 }
 0x1a4   :  { %v4712_v30 = vsub.f32 %v743_v37, %v807_v14 }
 0x1a5   :  { %v4668_v49 = vsub.f32 %v760_v8, %v824_v53  ;;  %v4670_v60 = vpop.f32.mrb[52].mxu0  ;;  %6045 = vst [vmem:[#allocation35_spill] sm:$0xff] %v4687_v1 }
 0x1a6   :  { %v645_v45 = vpop.f32.mrb[53].mxu0  ;;  %950 = vmin.xlane.f32.xlu1 %v4662_v36 }
 0x1a7   :  { %6043 = vst [vmem:[#allocation33_spill] sm:$0xff] %v4668_v49  ;;  %v826_v29 = vmul.f32 2.0, %v645_v45  ;;  %1002 = vmin.xlane.f32.xlu0 %v4668_v49  ;;  %v312_v45 = vpop.xlane.xlu0 %311  ;;  %v262_v49 = vpop.xlane.xlu1 %261 }
 0x1a8   :  { %v745_v42 = vadd.f32 %v4397_v48, %v262_v49  ;;  %v770_v4 = vadd.f32 %v4397_v48, %v312_v45 }
 0x1a9   :  { %v4680_v53 = vsub.f32 %v762_v25, %v826_v29  ;;  %v4682_v8 = vpop.f32.mrb[54].mxu0 }
 0x1aa   :  { %v655_v43 = vpop.f32.mrb[55].mxu0  ;;  %956 = vmin.xlane.f32.xlu1 %v4675_v61  ;;  %v4721_v38 = vsub.f32 %v745_v42, %v809_v55  ;;  %v749_v42 = vadd.f32 %v4397_v48, %v4388_v44  ;;  %v753_v44 = vadd.f32 %v4397_v48, %v4411_v63  ;;  %v821_v63 = vmul.f32 2.0, %v4631_v34 }
 0x1ab   :  { %6044 = vst [vmem:[#allocation34_spill] sm:$0xff] %v4680_v53  ;;  %v828_v41 = vmul.f32 2.0, %v655_v43  ;;  %1006 = vmin.xlane.f32.xlu0 %v4680_v53  ;;  %v4702_v24 = vpop.xlane.xlu0 %313  ;;  %v266_v35 = vpop.xlane.xlu1 %265 }
 0x1ac   :  { %v747_v49 = vadd.f32 %v4397_v48, %v266_v35 }
 0x1ad   :  { %v4692_v25 = vsub.f32 %v764_v19, %v828_v41  ;;  %v4694_v29 = vpop.f32.mrb[56].mxu0 }
 0x1ae   :  { %v665_v36 = vpop.f32.mrb[57].mxu0  ;;  %960 = vmin.xlane.f32.xlu1 %v4687_v1 }
 0x1af   :  { %6046 = vst [vmem:[#allocation36_spill] sm:$0xff] %v4692_v25  ;;  %v830_v43 = vmul.f32 2.0, %v665_v36  ;;  %1010 = vmin.xlane.f32.xlu0 %v4692_v25  ;;  %v316_v14 = vpop.xlane.xlu0 %315 }
 0x1b0   :  { %v772_v45 = vadd.f32 %v4397_v48, %v316_v14 }
 0x1b1   :  { %v4705_v19 = vsub.f32 %v766_v18, %v830_v43  ;;  %v4707_v41 = vpop.f32.mrb[58].mxu0  ;;  %v811_v43 = vmul.f32 2.0, %v4560_v16 }
 0x1b2   :  { %v675_v53 = vpop.f32.mrb[59].mxu0  ;;  %964 = vmin.xlane.f32.xlu1 %v4699_v5 }
 0x1b3   :  { %v832_v36 = vmul.f32 2.0, %v675_v53  ;;  %1014 = vmin.xlane.f32.xlu0 %v4705_v19 }
 0x1b5   :  { %v4715_v25 = vsub.f32 %v768_v39, %v832_v36  ;;  %v4718_v18 = vpop.f32.mrb[60].mxu0  ;;  %v4731_v36 = vsub.f32 %v747_v49, %v811_v43  ;;  %v815_v49 = vmul.f32 2.0, %v4589_v51  ;;  %v757_v51 = vadd.f32 %v4397_v48, %v4445_v59 }
 0x1b6   :  { %v685_v1 = vpop.f32.mrb[61].mxu0  ;;  %968 = vmin.xlane.f32.xlu1 %v4712_v30 }
 0x1b7   :  { %v834_v53 = vmul.f32 2.0, %v685_v1  ;;  %1018 = vmin.xlane.f32.xlu0 %v4715_v25  ;;  %v813_v1 = vmul.f32 2.0, %v4575_v40  ;;  %v817_v40 = vmul.f32 2.0, %v4602_v23  ;;  %v1030_v23 = vlaneseq }
 0x1b9   :  { %v4726_v37 = vsub.f32 %v770_v4, %v834_v53  ;;  %v4728_v39 = vpop.f32.mrb[62].mxu0  ;;  %v751_v4 = vadd.f32 %v4397_v48, %v4392_v46  ;;  %v4744_v43 = vsub.f32 %v749_v42, %v813_v1  ;;  %v755_v53 = vadd.f32 %v4397_v48, %v4428_v21 }
 0x1ba   :  { %v695_v16 = vpop.f32.mrb[63].mxu0  ;;  %972 = vmin.xlane.f32.xlu1 %v4721_v38  ;;  %v819_v46 = vmul.f32 2.0, %v4616_v7  ;;  %v759_v21 = vadd.f32 %v4397_v48, %v4473_v22  ;;  %v4768_v42 = vsub.f32 %v757_v51, %v821_v63  ;;  %v823_v7 = vmul.f32 2.0, %v4643_v13 }
 0x1bb   :  { %v836_v55 = vmul.f32 2.0, %v695_v16  ;;  %1022 = vmin.xlane.f32.xlu0 %v4726_v37  ;;  %v4750_v14 = vsub.f32 %v751_v4, %v815_v49  ;;  %v4772_v1 = vand.u32 127, %v1030_v23  ;;  %v761_v4 = vadd.f32 %v4397_v48, %v4502_v50 }
 0x1bc   :  { %v4762_v16 = vsub.f32 %v755_v53, %v819_v46  ;;  %v4776_v34 = vsub.f32 %v759_v21, %v823_v7  ;;  %v825_v49 = vmul.f32 2.0, %v4656_v10  ;;  %v827_v50 = vmul.f32 2.0, %v4670_v60 }
 0x1bd   :  { %v4738_v35 = vsub.f32 %v772_v45, %v836_v55  ;;  %v4756_v45 = vsub.f32 %v753_v44, %v817_v40  ;;  %6047 = vst [vmem:[#allocation37_spill] sm:$0xff] %v4772_v1  ;;  %v763_v40 = vadd.f32 %v4397_v48, %v4542_v3  ;;  %v765_v10 = vadd.f32 %v4397_v48, %v4583_v6 }
 0x1be   :  { %976 = vmin.xlane.f32.xlu1 %v4731_v36  ;;  %v4787_v53 = vsub.f32 %v761_v4, %v825_v49  ;;  %v829_v63 = vmul.f32 2.0, %v4682_v8  ;;  %v767_v21 = vadd.f32 %v4397_v48, %v4625_v20  ;;  %v831_v6 = vmul.f32 2.0, %v4694_v29 }
 0x1bf   :  { %1026 = vmin.xlane.f32.xlu0 %v4738_v35  ;;  %v4796_v51 = vsub.f32 %v763_v40, %v827_v50  ;;  %v769_v4 = vadd.f32 %v4397_v48, %v4664_v57  ;;  %v833_v49 = vmul.f32 2.0, %v4707_v41  ;;  %v318_v40 = vpop.xlane.xlu0 %317  ;;  %v771_v57 = vadd.f32 %v4397_v48, %v4702_v24 }
 0x1c0   :  { %v4807_v7 = vsub.f32 %v765_v10, %v829_v63  ;;  %v4814_v8 = vsub.f32 %v767_v21, %v831_v6  ;;  %v773_v41 = vadd.f32 %v4397_v48, %v318_v40 }
 0x1c1   :  { %v4825_v50 = vsub.f32 %v769_v4, %v833_v49 }
 0x1c2   :  { %980 = vmin.xlane.f32.xlu1 %v4744_v43 }
 0x1c6   :  { %984 = vmin.xlane.f32.xlu1 %v4750_v14 }
 0x1ca   :  { %988 = vmin.xlane.f32.xlu1 %v4756_v45 }
 0x1ce   :  { %992 = vmin.xlane.f32.xlu1 %v4762_v16 }
 0x1cf   :  { %v905_v55 = vpop.xlane.xlu1 %904 }
 0x1d0   :  { %vm1033_vm3 = vcmp.eq.f32.partialorder %v4403_v56, %v905_v55 }
 0x1d2   :  { %996 = vmin.xlane.f32.xlu1 %v4768_v42 }
 0x1d3   :  { %v903_v59 = vpop.xlane.xlu1 %902 }
 0x1d4   :  { %vm1032_vm0 = vcmp.eq.f32.partialorder %v4409_v62, %v903_v59 }
 0x1d5   :  { %v4781_v22 = vsel %vm1032_vm0, %v4772_v1, 128 }
 0x1d6   :  { %v1161_v44 = vshra.s32 %v4781_v22, 16  ;;  %1000 = vmin.xlane.f32.xlu1 %v4776_v34 }
 0x1d7   :  { %v909_v13 = vpop.xlane.xlu1 %908 }
 0x1d8   :  { %v4790_v46 = vcvt.s32.f32 %v1161_v44  ;;  %vm1035_vm5 = vcmp.eq.f32.partialorder %v4414_v2, %v909_v13 }
 0x1da   :  { %1004 = vmin.xlane.f32.xlu1 %v4787_v53  ;;  %1164 = vmin.xlane.f32.xlu0 %v4790_v46 }
 0x1db   :  { %v907_v62 = vpop.xlane.xlu1 %906 }
 0x1dc   :  { %vm1034_vm1 = vcmp.eq.f32.partialorder %v4421_v12, %v907_v62  ;;  %v835_v62 = vmul.f32 2.0, %v4718_v18  ;;  %v4841_v18 = vsel %vm1033_vm3, %v4772_v1, 128 }
 0x1dd   :  { %v4801_v3 = vsel %vm1034_vm1, %v4772_v1, 128  ;;  %v1175_v55 = vshra.s32 %v4841_v18, 16 }
 0x1de   :  { %v1189_v60 = vshra.s32 %v4801_v3, 16  ;;  %1008 = vmin.xlane.f32.xlu1 %v4796_v51 }
 0x1df   :  { %v913_v23 = vpop.xlane.xlu1 %912  ;;  %v4862_v6 = vcvt.s32.f32 %v1175_v55 }
 0x1e0   :  { %v4810_v59 = vcvt.s32.f32 %v1189_v60  ;;  %v4837_v60 = vsub.f32 %v771_v57, %v835_v62  ;;  %vm1037_vm6 = vcmp.eq.f32.partialorder %v4424_v11, %v913_v23  ;;  %v6048_v62 = vld [vmem:[#allocation15_spill] sm:$0xff] }
 0x1e2   :  { %1012 = vmin.xlane.f32.xlu1 %v4807_v7  ;;  %1192 = vmin.xlane.f32.xlu0 %v4810_v59 }
 0x1e3   :  { %v911_v12 = vpop.xlane.xlu1 %910 }
 0x1e4   :  { %vm1036_vm2 = vcmp.eq.f32.partialorder %v4432_v27, %v911_v12  ;;  %v837_v27 = vmul.f32 2.0, %v4728_v39  ;;  %v4865_v12 = vsel %vm1037_vm6, %v4772_v1, 128 }
 0x1e5   :  { %v4821_v20 = vsel %vm1036_vm2, %v4772_v1, 128  ;;  %v1231_v49 = vshra.s32 %v4865_v12, 16 }
 0x1e6   :  { %v1217_v29 = vshra.s32 %v4821_v20, 16  ;;  %1016 = vmin.xlane.f32.xlu1 %v4814_v8  ;;  %v4848_v39 = vsub.f32 %v773_v41, %v837_v27 }
 0x1e7   :  { %v917_v44 = vpop.xlane.xlu1 %916  ;;  %v4886_v57 = vcvt.s32.f32 %v1231_v49 }
 0x1e8   :  { %v4830_v10 = vcvt.s32.f32 %v1217_v29  ;;  %vm1039_vm8 = vcmp.eq.f32.partialorder %v4435_v47, %v917_v44 }
 0x1e9   :  { %v4879_v40 = vsel %vm1039_vm8, %v4772_v1, 128 }
 0x1ea   :  { %1020 = vmin.xlane.f32.xlu1 %v4825_v50  ;;  %1220 = vmin.xlane.f32.xlu0 %v4830_v10  ;;  %v1259_v44 = vshra.s32 %v4879_v40, 16 }
 0x1eb   :  { %v915_v63 = vpop.xlane.xlu1 %914 }
 0x1ec   :  { %vm1038_vm4 = vcmp.eq.f32.partialorder %v4443_v58, %v915_v63  ;;  %v4855_v58 = vsel %vm1035_vm5, %v4772_v1, 128  ;;  %v6049_v63 = vld [vmem:[#allocation14_spill] sm:$0xff] }
 0x1ed   :  { %v4844_v24 = vsel %vm1038_vm4, %v4772_v1, 128  ;;  %v1203_v13 = vshra.s32 %v4855_v58, 16 }
 0x1ee   :  { %v1245_v56 = vshra.s32 %v4844_v24, 16  ;;  %1024 = vmin.xlane.f32.xlu1 %v4837_v60 }
 0x1ef   :  { %v921_v48 = vpop.xlane.xlu1 %920 }
 0x1f0   :  { %v4852_v21 = vcvt.s32.f32 %v1245_v56  ;;  %vm1041_vm9 = vcmp.eq.f32.partialorder %v4450_v0, %v921_v48 }
 0x1f1   :  { %v4889_v27 = vsel %vm1041_vm9, %v4772_v1, 128 }
 0x1f2   :  { %1248 = vmin.xlane.f32.xlu0 %v4852_v21  ;;  %1028 = vmin.xlane.f32.xlu1 %v4848_v39  ;;  %v1287_v48 = vshra.s32 %v4889_v27, 16 }
 0x1f3   :  { %v919_v2 = vpop.xlane.xlu1 %918 }
 0x1f4   :  { %vm1040_vm7 = vcmp.eq.f32.partialorder %v4462_v9, %v919_v2  ;;  %v4876_v9 = vcvt.s32.f32 %v1203_v13  ;;  %v4900_v2 = vcvt.s32.f32 %v1259_v44 }
 0x1f5   :  { %v4868_v4 = vsel %vm1040_vm7, %v4772_v1, 128 }
 0x1f6   :  { %v1273_v11 = vshra.s32 %v4868_v4, 16  ;;  %1178 = vmin.xlane.f32.xlu1 %v4862_v6 }
 0x1f7   :  { %v925_v23 = vpop.xlane.xlu1 %924 }
 0x1f8   :  { %v4874_v29 = vcvt.s32.f32 %v1273_v11  ;;  %vm1043_vm11 = vcmp.eq.f32.partialorder %v6049_v63, %v925_v23  ;;  %v6051_v11 = vld [vmem:[#allocation16_spill] sm:$0xff] }
 0x1f9   :  { %v4903_v13 = vsel %vm1043_vm11, %v4772_v1, 128 }
 0x1fa   :  { %1276 = vmin.xlane.f32.xlu0 %v4874_v29  ;;  %1206 = vmin.xlane.f32.xlu1 %v4876_v9  ;;  %v1315_v49 = vshra.s32 %v4903_v13, 16 }
 0x1fb   :  { %v923_v47 = vpop.xlane.xlu1 %922 }
 0x1fc   :  { %vm1042_vm10 = vcmp.eq.f32.partialorder %v6048_v62, %v923_v47  ;;  %v4910_v47 = vcvt.s32.f32 %v1287_v48 }
 0x1fd   :  { %v4892_v41 = vsel %vm1042_vm10, %v4772_v1, 128 }
 0x1fe   :  { %v1301_v0 = vshra.s32 %v4892_v41, 16  ;;  %1234 = vmin.xlane.f32.xlu1 %v4886_v57 }
 0x1ff   :  { %v929_v56 = vpop.xlane.xlu1 %928 }
 0x200   :  { %v4898_v55 = vcvt.s32.f32 %v1301_v0  ;;  %vm1045_vm12 = vcmp.eq.f32.partialorder %v6051_v11, %v929_v56 }
 0x201   :  { %v4913_v62 = vsel %vm1045_vm12, %v4772_v1, 128 }
 0x202   :  { %6050 = vst [vmem:[#allocation15_spill] sm:$0xff] %v4898_v55  ;;  %1304 = vmin.xlane.f32.xlu0 %v4898_v55  ;;  %1262 = vmin.xlane.f32.xlu1 %v4900_v2  ;;  %6052 = vst [vmem:[#allocation14_spill] sm:$0xff] %v4913_v62  ;;  %v1343_v56 = vshra.s32 %v4913_v62, 16 }
 0x203   :  { %v927_v23 = vpop.xlane.xlu1 %926 }
 0x204   :  { %vm1044_vm13 = vcmp.eq.f32.partialorder %v4500_v26, %v927_v23  ;;  %v4924_v26 = vcvt.s32.f32 %v1315_v49  ;;  %v4931_v23 = vpop.xlane.xlu0 %954  ;;  %v4935_v62 = vcvt.s32.f32 %v1343_v56 }
 0x205   :  { %v4916_v44 = vsel %vm1044_vm13, %v4772_v1, 128 }
 0x206   :  { %6053 = vst [vmem:[#allocation16_spill] sm:$0xff] %v4916_v44  ;;  %v1329_v63 = vshra.s32 %v4916_v44, 16  ;;  %1290 = vmin.xlane.f32.xlu1 %v4910_v47  ;;  %6055 = vst [vmem:[#allocation39_spill] sm:$0xff] %v4924_v26 }
 0x207   :  { %v933_v0 = vpop.xlane.xlu1 %932 }
 0x208   :  { %vm1047_vm14 = vcmp.eq.f32.partialorder %v4511_v52, %v933_v0  ;;  %v4922_v11 = vcvt.s32.f32 %v1329_v63 }
 0x209   :  { %v4927_v48 = vsel %vm1047_vm14, %v4772_v1, 128 }
 0x20a   :  { %6054 = vst [vmem:[#allocation38_spill] sm:$0xff] %v4922_v11  ;;  %6056 = vst [vmem:[#allocation40_spill] sm:$0xff] %v4927_v48  ;;  %1332 = vmin.xlane.f32.xlu0 %v4922_v11  ;;  %1318 = vmin.xlane.f32.xlu1 %v4924_v26  ;;  %v1371_v55 = vshra.s32 %v4927_v48, 16  ;;  %v4947_v26 = vpop.xlane.xlu0 %958 }
 0x20b   :  { %v931_v44 = vpop.xlane.xlu1 %930 }
 0x20c   :  { %vm1046_vm15 = vcmp.eq.f32.partialorder %v4527_v31, %v931_v44  ;;  %v4945_v11 = vcvt.s32.f32 %v1371_v55 }
 0x20d   :  { %v4938_v52 = vsel %vm1046_vm15, %v4772_v1, 128 }
 0x20e   :  { %6057 = vst [vmem:[#allocation41_spill] sm:$0xff] %v4938_v52  ;;  %v1357_v49 = vshra.s32 %v4938_v52, 16  ;;  %1346 = vmin.xlane.f32.xlu1 %v4935_v62  ;;  %6059 = vst [vmem:[#allocation43_spill] sm:$0xff] %v4945_v11 }
 0x20f   :  { %v937_v63 = vpop.xlane.xlu1 %936 }
 0x210   :  { %vm1049_vm0 = vcmp.eq.f32.partialorder %v4536_v28, %v937_v63  ;;  %v4943_v0 = vcvt.s32.f32 %v1357_v49  ;;  %v4963_v49 = vpop.xlane.xlu0 %962 }
 0x211   :  { %v4950_v31 = vsel %vm1049_vm0, %v4772_v1, 128 }
 0x212   :  { %6058 = vst [vmem:[#allocation42_spill] sm:$0xff] %v4943_v0  ;;  %6060 = vst [vmem:[#allocation44_spill] sm:$0xff] %v4950_v31  ;;  %v1399_v44 = vshra.s32 %v4950_v31, 16  ;;  %1360 = vmin.xlane.f32.xlu0 %v4943_v0  ;;  %1374 = vmin.xlane.f32.xlu1 %v4945_v11  ;;  %v6063_v31 = vld [vmem:[#allocation22_spill] sm:$0xff] }
 0x213   :  { %v935_v56 = vpop.xlane.xlu1 %934 }
 0x214   :  { %vm1048_vm1 = vcmp.eq.f32.partialorder %v4554_v32, %v935_v56  ;;  %v4956_v52 = vcvt.s32.f32 %v1399_v44 }
 0x215   :  { %v4959_v28 = vsel %vm1048_vm1, %v4772_v1, 128 }
 0x216   :  { %6061 = vst [vmem:[#allocation45_spill] sm:$0xff] %v4956_v52  ;;  %6062 = vst [vmem:[#allocation46_spill] sm:$0xff] %v4959_v28  ;;  %v1385_v55 = vshra.s32 %v4959_v28, 16  ;;  %1402 = vmin.xlane.f32.xlu1 %v4956_v52  ;;  %v4976_v52 = vpop.xlane.xlu0 %966 }
 0x217   :  { %v941_v63 = vpop.xlane.xlu1 %940 }
 0x218   :  { %vm1051_vm2 = vcmp.eq.f32.partialorder %v6063_v31, %v941_v63  ;;  %v4966_v0 = vcvt.s32.f32 %v1385_v55  ;;  %v6068_v63 = vld [vmem:[#allocation25_spill] sm:$0xff] }
 0x219   :  { %v4969_v11 = vsel %vm1051_vm2, %v4772_v1, 128 }
 0x21a   :  { %6064 = vst [vmem:[#allocation22_spill] sm:$0xff] %v4966_v0  ;;  %6065 = vst [vmem:[#allocation47_spill] sm:$0xff] %v4969_v11  ;;  %v1427_v32 = vshra.s32 %v4969_v11, 16  ;;  %1388 = vmin.xlane.f32.xlu0 %v4966_v0 }
 0x21b   :  { %v939_v44 = vpop.xlane.xlu1 %938 }
 0x21c   :  { %vm1050_vm3 = vcmp.eq.f32.partialorder %v4581_v33, %v939_v44  ;;  %v4974_v56 = vcvt.s32.f32 %v1427_v32  ;;  %v4991_v32 = vpop.xlane.xlu0 %970 }
 0x21d   :  { %v4979_v28 = vsel %vm1050_vm3, %v4772_v1, 128 }
 0x21e   :  { %6066 = vst [vmem:[#allocation48_spill] sm:$0xff] %v4974_v56  ;;  %6067 = vst [vmem:[#allocation49_spill] sm:$0xff] %v4979_v28  ;;  %v1413_v31 = vshra.s32 %v4979_v28, 16  ;;  %1430 = vmin.xlane.f32.xlu1 %v4974_v56 }
 0x21f   :  { %v945_v55 = vpop.xlane.xlu1 %944 }
 0x220   :  { %vm1053_vm4 = vcmp.eq.f32.partialorder %v6068_v63, %v945_v55  ;;  %v4984_v11 = vcvt.s32.f32 %v1413_v31  ;;  %v6073_v63 = vld [vmem:[#allocation28_spill] sm:$0xff] }
 0x221   :  { %v4987_v0 = vsel %vm1053_vm4, %v4772_v1, 128 }
 0x222   :  { %6069 = vst [vmem:[#allocation25_spill] sm:$0xff] %v4984_v11  ;;  %6070 = vst [vmem:[#allocation50_spill] sm:$0xff] %v4987_v0  ;;  %v1455_v33 = vshra.s32 %v4987_v0, 16  ;;  %1416 = vmin.xlane.f32.xlu0 %v4984_v11  ;;  %v5004_v11 = vpop.xlane.xlu0 %974 }
 0x223   :  { %v943_v44 = vpop.xlane.xlu1 %942 }
 0x224   :  { %vm1052_vm5 = vcmp.eq.f32.partialorder %v4610_v15, %v943_v44  ;;  %v4994_v28 = vcvt.s32.f32 %v1455_v33 }
 0x225   :  { %v4997_v56 = vsel %vm1052_vm5, %v4772_v1, 128 }
 0x226   :  { %6071 = vst [vmem:[#allocation51_spill] sm:$0xff] %v4994_v28  ;;  %6072 = vst [vmem:[#allocation52_spill] sm:$0xff] %v4997_v56  ;;  %v1441_v31 = vshra.s32 %v4997_v56, 16  ;;  %1458 = vmin.xlane.f32.xlu1 %v4994_v28 }
 0x227   :  { %v949_v55 = vpop.xlane.xlu1 %948 }
 0x228   :  { %vm1055_vm6 = vcmp.eq.f32.partialorder %v6073_v63, %v949_v55  ;;  %v5002_v0 = vcvt.s32.f32 %v1441_v31  ;;  %v5019_v55 = vpop.xlane.xlu0 %978 }
 0x229   :  { %v5007_v48 = vsel %vm1055_vm6, %v4772_v1, 128 }
 0x22a   :  { %6074 = vst [vmem:[#allocation28_spill] sm:$0xff] %v5002_v0  ;;  %6075 = vst [vmem:[#allocation53_spill] sm:$0xff] %v5007_v48  ;;  %v1483_v15 = vshra.s32 %v5007_v48, 16  ;;  %1444 = vmin.xlane.f32.xlu0 %v5002_v0 }
 0x22b   :  { %v947_v33 = vpop.xlane.xlu1 %946 }
 0x22c   :  { %vm1054_vm7 = vcmp.eq.f32.partialorder %v4637_v17, %v947_v33  ;;  %v5012_v44 = vcvt.s32.f32 %v1483_v15  ;;  %v6080_v17 = vld [vmem:[#allocation17_spill] sm:$0xff] }
 0x22d   :  { %v5015_v28 = vsel %vm1054_vm7, %v4772_v1, 128  ;;  %vm1058_vm9 = vcmp.eq.f32.partialorder %v6080_v17, %v4931_v23 }
 0x22e   :  { %6076 = vst [vmem:[#allocation54_spill] sm:$0xff] %v5012_v44  ;;  %6077 = vst [vmem:[#allocation55_spill] sm:$0xff] %v5015_v28  ;;  %v1469_v31 = vshra.s32 %v5015_v28, 16  ;;  %1486 = vmin.xlane.f32.xlu1 %v5012_v44  ;;  %v6081_v28 = vld [vmem:[#allocation32_spill] sm:$0xff]  ;;  %v5035_v56 = vsel %vm1058_vm9, %v4772_v1, 128 }
 0x22f   :  { %v953_v63 = vpop.xlane.xlu1 %952  ;;  %6083 = vst [vmem:[#allocation32_spill] sm:$0xff] %v5035_v56 }
 0x230   :  { %vm1057_vm8 = vcmp.eq.f32.partialorder %v4646_v54, %v953_v63  ;;  %v5022_v48 = vcvt.s32.f32 %v1469_v31  ;;  %v5037_v54 = vpop.xlane.xlu0 %982  ;;  %v6085_v63 = vld [vmem:[#allocation18_spill] sm:$0xff] }
 0x231   :  { %v5025_v0 = vsel %vm1057_vm8, %v4772_v1, 128  ;;  %vm1060_vm11 = vcmp.eq.f32.partialorder %v6085_v63, %v4947_v26 }
 0x232   :  { %6078 = vst [vmem:[#allocation56_spill] sm:$0xff] %v5022_v48  ;;  %6079 = vst [vmem:[#allocation57_spill] sm:$0xff] %v5025_v0  ;;  %v1511_v15 = vshra.s32 %v5025_v0, 16  ;;  %1472 = vmin.xlane.f32.xlu0 %v5022_v48  ;;  %v6089_v0 = vld [vmem:[#allocation19_spill] sm:$0xff] }
 0x233   :  { %v951_v33 = vpop.xlane.xlu1 %950  ;;  %vm1062_vm13 = vcmp.eq.f32.partialorder %v6089_v0, %v4963_v49  ;;  %v6093_v49 = vld [vmem:[#allocation20_spill] sm:$0xff] }
 0x234   :  { %vm1056_vm10 = vcmp.eq.f32.partialorder %v6081_v28, %v951_v33  ;;  %v5032_v44 = vcvt.s32.f32 %v1511_v15  ;;  %v1525_v28 = vshra.s32 %v5035_v56, 16  ;;  %v5051_v33 = vsel %vm1060_vm11, %v4772_v1, 128  ;;  %v5060_v63 = vpop.xlane.xlu0 %986 }
 0x235   :  { %v5040_v31 = vsel %vm1056_vm10, %v4772_v1, 128  ;;  %6087 = vst [vmem:[#allocation59_spill] sm:$0xff] %v5051_v33  ;;  %vm1064_vm15 = vcmp.eq.f32.partialorder %v6093_v49, %v4976_v52  ;;  %v6097_v49 = vld [vmem:[#allocation21_spill] sm:$0xff] }
 0x236   :  { %6082 = vst [vmem:[#allocation17_spill] sm:$0xff] %v5032_v44  ;;  %6084 = vst [vmem:[#allocation58_spill] sm:$0xff] %v5040_v31  ;;  %v1497_v23 = vshra.s32 %v5040_v31, 16  ;;  %1514 = vmin.xlane.f32.xlu1 %v5032_v44  ;;  %v5066_v44 = vcvt.s32.f32 %v1525_v28  ;;  %v5069_v31 = vsel %vm1062_vm13, %v4772_v1, 128  ;;  %vm1066_vm1 = vcmp.eq.f32.partialorder %v6097_v49, %v4991_v32  ;;  %v6101_v49 = vld [vmem:[#allocation23_spill] sm:$0xff] }
 0x237   :  { %v957_v17 = vpop.xlane.xlu1 %956  ;;  %vm1068_vm3 = vcmp.eq.f32.partialorder %v6101_v49, %v5004_v11  ;;  %v6104_v49 = vld [vmem:[#allocation24_spill] sm:$0xff] }
 0x238   :  { %vm1059_vm12 = vcmp.eq.f32.partialorder %v4675_v61, %v957_v17  ;;  %v5048_v15 = vcvt.s32.f32 %v1497_v23  ;;  %v1553_v61 = vshra.s32 %v5051_v33, 16  ;;  %v6090_v23 = vld [vmem:[#allocation35_spill] sm:$0xff]  ;;  %6091 = vst [vmem:[#allocation19_spill] sm:$0xff] %v5066_v44  ;;  %v5086_v33 = vsel %vm1064_vm15, %v4772_v1, 128 }
 0x239   :  { %v5054_v48 = vsel %vm1059_vm12, %v4772_v1, 128  ;;  %6092 = vst [vmem:[#allocation35_spill] sm:$0xff] %v5069_v31  ;;  %6096 = vst [vmem:[#allocation62_spill] sm:$0xff] %v5086_v33  ;;  %vm1070_vm5 = vcmp.eq.f32.partialorder %v6104_v49, %v5019_v55  ;;  %v6108_v49 = vld [vmem:[#allocation26_spill] sm:$0xff] }
 0x23a   :  { %6086 = vst [vmem:[#allocation18_spill] sm:$0xff] %v5048_v15  ;;  %6088 = vst [vmem:[#allocation60_spill] sm:$0xff] %v5054_v48  ;;  %v1539_v26 = vshra.s32 %v5054_v48, 16  ;;  %1500 = vmin.xlane.f32.xlu0 %v5048_v15  ;;  %v5088_v48 = vpop.xlane.xlu0 %990  ;;  %vm1072_vm7 = vcmp.eq.f32.partialorder %v6108_v49, %v5037_v54  ;;  %v6112_v49 = vld [vmem:[#allocation27_spill] sm:$0xff] }
 0x23b   :  { %v961_v56 = vpop.xlane.xlu1 %960  ;;  %vm1074_vm9 = vcmp.eq.f32.partialorder %v6112_v49, %v5060_v63  ;;  %v6115_v49 = vld [vmem:[#allocation29_spill] sm:$0xff] }
 0x23c   :  { %vm1061_vm14 = vcmp.eq.f32.partialorder %v6090_v23, %v961_v56  ;;  %v5064_v17 = vcvt.s32.f32 %v1539_v26  ;;  %v1581_v26 = vshra.s32 %v5069_v31, 16  ;;  %v5083_v23 = vcvt.s32.f32 %v1553_v61 }
 0x23d   :  { %v5072_v0 = vsel %vm1061_vm14, %v4772_v1, 128  ;;  %v5105_v31 = vsel %vm1066_vm1, %v4772_v1, 128  ;;  %vm1076_vm11 = vcmp.eq.f32.partialorder %v6115_v49, %v5088_v48  ;;  %v6119_v49 = vld [vmem:[#allocation30_spill] sm:$0xff] }
 0x23e   :  { %v1567_v15 = vshra.s32 %v5072_v0, 16  ;;  %1542 = vmin.xlane.f32.xlu1 %v5064_v17  ;;  %1528 = vmin.xlane.f32.xlu0 %v5066_v44  ;;  %6095 = vst [vmem:[#allocation61_spill] sm:$0xff] %v5083_v23  ;;  %6100 = vst [vmem:[#allocation64_spill] sm:$0xff] %v5105_v31 }
 0x23f   :  { %v965_v56 = vpop.xlane.xlu1 %964 }
 0x240   :  { %vm1063_vm0 = vcmp.eq.f32.partialorder %v4699_v5, %v965_v56  ;;  %v5081_v28 = vcvt.s32.f32 %v1567_v15  ;;  %v1609_v15 = vshra.s32 %v5086_v33, 16  ;;  %v5102_v56 = vcvt.s32.f32 %v1581_v26 }
 0x241   :  { %v5091_v52 = vsel %vm1063_vm0, %v4772_v1, 128  ;;  %v1637_v26 = vshra.s32 %v5105_v31, 16  ;;  %v5141_v31 = vsel %vm1070_vm5, %v4772_v1, 128 }
 0x242   :  { %6094 = vst [vmem:[#allocation20_spill] sm:$0xff] %v5081_v28  ;;  %v1595_v44 = vshra.s32 %v5091_v52, 16  ;;  %1570 = vmin.xlane.f32.xlu1 %v5081_v28  ;;  %1556 = vmin.xlane.f32.xlu0 %v5083_v23  ;;  %6099 = vst [vmem:[#allocation63_spill] sm:$0xff] %v5102_v56  ;;  %v5121_v33 = vcvt.s32.f32 %v1609_v15  ;;  %v5124_v28 = vsel %vm1068_vm3, %v4772_v1, 128 }
 0x243   :  { %v969_v5 = vpop.xlane.xlu1 %968  ;;  %6103 = vst [vmem:[#allocation65_spill] sm:$0xff] %v5124_v28  ;;  %6107 = vst [vmem:[#allocation67_spill] sm:$0xff] %v5141_v31 }
 0x244   :  { %vm1065_vm2 = vcmp.eq.f32.partialorder %v4712_v30, %v969_v5  ;;  %v5100_v61 = vcvt.s32.f32 %v1595_v44  ;;  %v5115_v30 = vpop.xlane.xlu0 %994  ;;  %6102 = vst [vmem:[#allocation23_spill] sm:$0xff] %v5121_v33 }
 0x245   :  { %v5108_v32 = vsel %vm1065_vm2, %v4772_v1, 128  ;;  %vm1078_vm13 = vcmp.eq.f32.partialorder %v6119_v49, %v5115_v30  ;;  %v6123_v49 = vld [vmem:[#allocation31_spill] sm:$0xff] }
 0x246   :  { %6098 = vst [vmem:[#allocation21_spill] sm:$0xff] %v5100_v61  ;;  %v1623_v23 = vshra.s32 %v5108_v32, 16  ;;  %1598 = vmin.xlane.f32.xlu1 %v5100_v61  ;;  %1584 = vmin.xlane.f32.xlu0 %v5102_v56 }
 0x247   :  { %v973_v44 = vpop.xlane.xlu1 %972 }
 0x248   :  { %vm1067_vm4 = vcmp.eq.f32.partialorder %v4721_v38, %v973_v44  ;;  %v5119_v5 = vcvt.s32.f32 %v1623_v23  ;;  %v1665_v23 = vshra.s32 %v5124_v28, 16  ;;  %v5138_v44 = vcvt.s32.f32 %v1637_v26  ;;  %v999_v61 = vpop.xlane.xlu0 %998 }
 0x249   :  { %v5127_v11 = vsel %vm1067_vm4, %v4772_v1, 128  ;;  %v5158_v28 = vsel %vm1072_vm7, %v4772_v1, 128  ;;  %vm1080_vm15 = vcmp.eq.f32.partialorder %v6123_v49, %v999_v61  ;;  %v6126_v49 = vld [vmem:[#allocation33_spill] sm:$0xff] }
 0x24a   :  { %v1651_v56 = vshra.s32 %v5127_v11, 16  ;;  %1626 = vmin.xlane.f32.xlu1 %v5119_v5  ;;  %1612 = vmin.xlane.f32.xlu0 %v5121_v33  ;;  %6106 = vst [vmem:[#allocation66_spill] sm:$0xff] %v5138_v44  ;;  %6111 = vst [vmem:[#allocation69_spill] sm:$0xff] %v5158_v28 }
 0x24b   :  { %v977_v38 = vpop.xlane.xlu1 %976 }
 0x24c   :  { %vm1069_vm6 = vcmp.eq.f32.partialorder %v4731_v36, %v977_v38  ;;  %v5136_v15 = vcvt.s32.f32 %v1651_v56  ;;  %v1693_v56 = vshra.s32 %v5141_v31, 16  ;;  %v5155_v38 = vcvt.s32.f32 %v1665_v23 }
 0x24d   :  { %v5144_v55 = vsel %vm1069_vm6, %v4772_v1, 128  ;;  %v1721_v23 = vshra.s32 %v5158_v28, 16  ;;  %v5192_v28 = vsel %vm1076_vm11, %v4772_v1, 128 }
 0x24e   :  { %6105 = vst [vmem:[#allocation24_spill] sm:$0xff] %v5136_v15  ;;  %v1679_v33 = vshra.s32 %v5144_v55, 16  ;;  %1654 = vmin.xlane.f32.xlu1 %v5136_v15  ;;  %1640 = vmin.xlane.f32.xlu0 %v5138_v44  ;;  %6110 = vst [vmem:[#allocation68_spill] sm:$0xff] %v5155_v38  ;;  %v5172_v31 = vcvt.s32.f32 %v1693_v56  ;;  %v5175_v15 = vsel %vm1074_vm9, %v4772_v1, 128 }
 0x24f   :  { %v981_v36 = vpop.xlane.xlu1 %980  ;;  %6114 = vst [vmem:[#allocation70_spill] sm:$0xff] %v5175_v15  ;;  %6118 = vst [vmem:[#allocation72_spill] sm:$0xff] %v5192_v28 }
 0x250   :  { %vm1071_vm8 = vcmp.eq.f32.partialorder %v4744_v43, %v981_v36  ;;  %v5153_v26 = vcvt.s32.f32 %v1679_v33  ;;  %v1003_v43 = vpop.xlane.xlu0 %1002  ;;  %6113 = vst [vmem:[#allocation27_spill] sm:$0xff] %v5172_v31 }
 0x251   :  { %v5161_v54 = vsel %vm1071_vm8, %v4772_v1, 128  ;;  %vm1082_vm1 = vcmp.eq.f32.partialorder %v6126_v49, %v1003_v43  ;;  %v6130_v49 = vld [vmem:[#allocation34_spill] sm:$0xff] }
 0x252   :  { %6109 = vst [vmem:[#allocation26_spill] sm:$0xff] %v5153_v26  ;;  %v1707_v44 = vshra.s32 %v5161_v54, 16  ;;  %1682 = vmin.xlane.f32.xlu1 %v5153_v26  ;;  %1668 = vmin.xlane.f32.xlu0 %v5155_v38 }
 0x253   :  { %v985_v33 = vpop.xlane.xlu1 %984 }
 0x254   :  { %vm1073_vm10 = vcmp.eq.f32.partialorder %v4750_v14, %v985_v33  ;;  %v5170_v36 = vcvt.s32.f32 %v1707_v44  ;;  %v1749_v44 = vshra.s32 %v5175_v15, 16  ;;  %v5189_v33 = vcvt.s32.f32 %v1721_v23  ;;  %v1007_v26 = vpop.xlane.xlu0 %1006 }
 0x255   :  { %v5178_v63 = vsel %vm1073_vm10, %v4772_v1, 128  ;;  %v5209_v15 = vsel %vm1078_vm13, %v4772_v1, 128  ;;  %vm1084_vm3 = vcmp.eq.f32.partialorder %v6130_v49, %v1007_v26  ;;  %v6133_v49 = vld [vmem:[#allocation36_spill] sm:$0xff] }
 0x256   :  { %v1735_v38 = vshra.s32 %v5178_v63, 16  ;;  %1710 = vmin.xlane.f32.xlu1 %v5170_v36  ;;  %1696 = vmin.xlane.f32.xlu0 %v5172_v31  ;;  %6117 = vst [vmem:[#allocation71_spill] sm:$0xff] %v5189_v33  ;;  %6122 = vst [vmem:[#allocation74_spill] sm:$0xff] %v5209_v15 }
 0x257   :  { %v989_v14 = vpop.xlane.xlu1 %988 }
 0x258   :  { %vm1075_vm12 = vcmp.eq.f32.partialorder %v4756_v45, %v989_v14  ;;  %v5187_v56 = vcvt.s32.f32 %v1735_v38  ;;  %v1777_v38 = vshra.s32 %v5192_v28, 16  ;;  %v5206_v14 = vcvt.s32.f32 %v1749_v44  ;;  %v1011_v28 = vpop.xlane.xlu0 %1010 }
 0x259   :  { %v5195_v48 = vsel %vm1075_vm12, %v4772_v1, 128  ;;  %vm1086_vm5 = vcmp.eq.f32.partialorder %v6133_v49, %v1011_v28 }
 0x25a   :  { %6116 = vst [vmem:[#allocation29_spill] sm:$0xff] %v5187_v56  ;;  %v1763_v31 = vshra.s32 %v5195_v48, 16  ;;  %1738 = vmin.xlane.f32.xlu1 %v5187_v56  ;;  %1724 = vmin.xlane.f32.xlu0 %v5189_v33  ;;  %6121 = vst [vmem:[#allocation73_spill] sm:$0xff] %v5206_v14  ;;  %v5225_v33 = vsel %vm1080_vm15, %v4772_v1, 128 }
 0x25b   :  { %v993_v45 = vpop.xlane.xlu1 %992  ;;  %6125 = vst [vmem:[#allocation75_spill] sm:$0xff] %v5225_v33 }
 0x25c   :  { %vm1077_vm14 = vcmp.eq.f32.partialorder %v4762_v16, %v993_v45  ;;  %v5204_v23 = vcvt.s32.f32 %v1763_v31  ;;  %v1805_v31 = vshra.s32 %v5209_v15, 16  ;;  %v5222_v45 = vcvt.s32.f32 %v1777_v38 }
 0x25d   :  { %v5212_v30 = vsel %vm1077_vm14, %v4772_v1, 128 }
 0x25e   :  { %6120 = vst [vmem:[#allocation30_spill] sm:$0xff] %v5204_v23  ;;  %v1791_v56 = vshra.s32 %v5212_v30, 16  ;;  %1766 = vmin.xlane.f32.xlu1 %v5204_v23  ;;  %1752 = vmin.xlane.f32.xlu0 %v5206_v14  ;;  %6124 = vst [vmem:[#allocation31_spill] sm:$0xff] %v5222_v45  ;;  %v5238_v38 = vcvt.s32.f32 %v1805_v31  ;;  %v1015_v23 = vpop.xlane.xlu0 %1014 }
 0x25f   :  { %v997_v16 = vpop.xlane.xlu1 %996  ;;  %vm1088_vm7 = vcmp.eq.f32.partialorder %v4705_v19, %v1015_v23 }
 0x260   :  { %vm1079_vm0 = vcmp.eq.f32.partialorder %v4768_v42, %v997_v16  ;;  %v5220_v44 = vcvt.s32.f32 %v1791_v56  ;;  %v1833_v42 = vshra.s32 %v5225_v33, 16  ;;  %6128 = vst [vmem:[#allocation76_spill] sm:$0xff] %v5238_v38  ;;  %v5241_v16 = vsel %vm1082_vm1, %v4772_v1, 128 }
 0x261   :  { %v5228_v61 = vsel %vm1079_vm0, %v4772_v1, 128  ;;  %6129 = vst [vmem:[#allocation77_spill] sm:$0xff] %v5241_v16  ;;  %v5257_v33 = vsel %vm1084_vm3, %v4772_v1, 128 }
 0x262   :  { %v1819_v14 = vshra.s32 %v5228_v61, 16  ;;  %1794 = vmin.xlane.f32.xlu1 %v5220_v44  ;;  %1780 = vmin.xlane.f32.xlu0 %v5222_v45  ;;  %v5254_v31 = vcvt.s32.f32 %v1833_v42  ;;  %6132 = vst [vmem:[#allocation78_spill] sm:$0xff] %v5257_v33 }
 0x263   :  { %v1001_v15 = vpop.xlane.xlu1 %1000 }
 0x264   :  { %vm1081_vm2 = vcmp.eq.f32.partialorder %v4776_v34, %v1001_v15  ;;  %v5236_v56 = vcvt.s32.f32 %v1819_v14  ;;  %v1861_v15 = vshra.s32 %v5241_v16, 16  ;;  %6131 = vst [vmem:[#allocation34_spill] sm:$0xff] %v5254_v31  ;;  %v1019_v16 = vpop.xlane.xlu0 %1018 }
 0x265   :  { %v5244_v43 = vsel %vm1081_vm2, %v4772_v1, 128  ;;  %vm1090_vm9 = vcmp.eq.f32.partialorder %v4715_v25, %v1019_v16 }
 0x266   :  { %6127 = vst [vmem:[#allocation33_spill] sm:$0xff] %v5236_v56  ;;  %v1847_v45 = vshra.s32 %v5244_v43, 16  ;;  %1822 = vmin.xlane.f32.xlu1 %v5236_v56  ;;  %1808 = vmin.xlane.f32.xlu0 %v5238_v38  ;;  %v5273_v38 = vsel %vm1086_vm5, %v4772_v1, 128 }
 0x267   :  { %v1005_v34 = vpop.xlane.xlu1 %1004  ;;  %6134 = vst [vmem:[#allocation36_spill] sm:$0xff] %v5273_v38 }
 0x268   :  { %vm1083_vm4 = vcmp.eq.f32.partialorder %v4787_v53, %v1005_v34  ;;  %v5252_v14 = vcvt.s32.f32 %v1847_v45  ;;  %v1889_v45 = vshra.s32 %v5257_v33, 16  ;;  %v5270_v34 = vcvt.s32.f32 %v1861_v15 }
 0x269   :  { %v5260_v26 = vsel %vm1083_vm4, %v4772_v1, 128 }
 0x26a   :  { %v1875_v56 = vshra.s32 %v5260_v26, 16  ;;  %1850 = vmin.xlane.f32.xlu1 %v5252_v14  ;;  %1836 = vmin.xlane.f32.xlu0 %v5254_v31  ;;  %v5286_v15 = vcvt.s32.f32 %v1889_v45  ;;  %v1023_v31 = vpop.xlane.xlu0 %1022 }
 0x26b   :  { %v1009_v53 = vpop.xlane.xlu1 %1008  ;;  %vm1092_vm11 = vcmp.eq.f32.partialorder %v4726_v37, %v1023_v31 }
 0x26c   :  { %vm1085_vm6 = vcmp.eq.f32.partialorder %v4796_v51, %v1009_v53  ;;  %v5268_v42 = vcvt.s32.f32 %v1875_v56  ;;  %v1917_v51 = vshra.s32 %v5273_v38, 16  ;;  %6135 = vst [vmem:[#allocation79_spill] sm:$0xff] %v5286_v15  ;;  %v5289_v53 = vsel %vm1088_vm7, %v4772_v1, 128 }
 0x26d   :  { %v5276_v28 = vsel %vm1085_vm6, %v4772_v1, 128  ;;  %6136 = vst [vmem:[#allocation80_spill] sm:$0xff] %v5289_v53  ;;  %v5305_v38 = vsel %vm1090_vm9, %v4772_v1, 128 }
 0x26e   :  { %v1903_v49 = vshra.s32 %v5276_v28, 16  ;;  %1878 = vmin.xlane.f32.xlu1 %v5268_v42  ;;  %1864 = vmin.xlane.f32.xlu0 %v5270_v34  ;;  %6137 = vst [vmem:[#allocation81_spill] sm:$0xff] %v5305_v38 }
 0x26f   :  { %v1013_v33 = vpop.xlane.xlu1 %1012 }
 0x270   :  { %vm1087_vm8 = vcmp.eq.f32.partialorder %v4807_v7, %v1013_v33  ;;  %v5284_v56 = vcvt.s32.f32 %v1903_v49  ;;  %v1945_v33 = vshra.s32 %v5289_v53, 16  ;;  %v5302_v49 = vcvt.s32.f32 %v1917_v51  ;;  %v1027_v53 = vpop.xlane.xlu0 %1026 }
 0x271   :  { %v5292_v19 = vsel %vm1087_vm8, %v4772_v1, 128  ;;  %vm1094_vm13 = vcmp.eq.f32.partialorder %v4738_v35, %v1027_v53 }
 0x272   :  { %v1931_v23 = vshra.s32 %v5292_v19, 16  ;;  %1906 = vmin.xlane.f32.xlu1 %v5284_v56  ;;  %1892 = vmin.xlane.f32.xlu0 %v5286_v15  ;;  %v5321_v15 = vsel %vm1092_vm11, %v4772_v1, 128 }
 0x273   :  { %v1017_v7 = vpop.xlane.xlu1 %1016  ;;  %6139 = vst [vmem:[#allocation83_spill] sm:$0xff] %v5321_v15 }
 0x274   :  { %vm1089_vm10 = vcmp.eq.f32.partialorder %v4814_v8, %v1017_v7  ;;  %v5300_v45 = vcvt.s32.f32 %v1931_v23  ;;  %v1973_v23 = vshra.s32 %v5305_v38, 16  ;;  %v5318_v7 = vcvt.s32.f32 %v1945_v33 }
 0x275   :  { %v5308_v25 = vsel %vm1089_vm10, %v4772_v1, 128 }
 0x276   :  { %v1959_v16 = vshra.s32 %v5308_v25, 16  ;;  %1934 = vmin.xlane.f32.xlu1 %v5300_v45  ;;  %1920 = vmin.xlane.f32.xlu0 %v5302_v49  ;;  %6138 = vst [vmem:[#allocation82_spill] sm:$0xff] %v5318_v7 }
 0x277   :  { %v1021_v8 = vpop.xlane.xlu1 %1020 }
 0x278   :  { %vm1091_vm12 = vcmp.eq.f32.partialorder %v4825_v50, %v1021_v8  ;;  %v5316_v51 = vcvt.s32.f32 %v1959_v16  ;;  %v2001_v50 = vshra.s32 %v5321_v15, 16  ;;  %v5334_v16 = vcvt.s32.f32 %v1973_v23 }
 0x279   :  { %v5324_v37 = vsel %vm1091_vm12, %v4772_v1, 128  ;;  %v5337_v8 = vsel %vm1094_vm13, %v4772_v1, 128 }
 0x27a   :  { %v1987_v31 = vshra.s32 %v5324_v37, 16  ;;  %1962 = vmin.xlane.f32.xlu1 %v5316_v51  ;;  %1948 = vmin.xlane.f32.xlu0 %v5318_v7  ;;  %6141 = vst [vmem:[#allocation85_spill] sm:$0xff] %v5334_v16  ;;  %6142 = vst [vmem:[#allocation86_spill] sm:$0xff] %v5337_v8  ;;  %v2029_v15 = vshra.s32 %v5337_v8, 16  ;;  %v5359_v8 = vpop.xlane.xlu0 %1164 }
 0x27b   :  { %v1025_v38 = vpop.xlane.xlu1 %1024  ;;  %vm1166_vm1 = vcmp.eq.f32.partialorder %v4790_v46, %v5359_v8  ;;  %v1230_v46 = vand.u32 65535, %v4865_v12 }
 0x27c   :  { %vm1093_vm14 = vcmp.eq.f32.partialorder %v4837_v60, %v1025_v38  ;;  %v5332_v33 = vcvt.s32.f32 %v1987_v31  ;;  %v5349_v38 = vcvt.s32.f32 %v2001_v50  ;;  %v5365_v50 = vcvt.s32.f32 %v2029_v15 }
 0x27d   :  { %v5340_v35 = vsel %vm1093_vm14, %v4772_v1, 128 }
 0x27e   :  { %6140 = vst [vmem:[#allocation84_spill] sm:$0xff] %v5332_v33  ;;  %v2015_v53 = vshra.s32 %v5340_v35, 16  ;;  %1990 = vmin.xlane.f32.xlu1 %v5332_v33  ;;  %1976 = vmin.xlane.f32.xlu0 %v5334_v16  ;;  %6143 = vst [vmem:[#allocation87_spill] sm:$0xff] %v5349_v38  ;;  %v1174_v16 = vand.u32 65535, %v4841_v18  ;;  %v1160_v33 = vand.u32 65535, %v4781_v22  ;;  %v1202_v22 = vand.u32 65535, %v4855_v58 }
 0x27f   :  { %v1029_v7 = vpop.xlane.xlu1 %1028  ;;  %v1188_v18 = vand.u32 65535, %v4801_v3  ;;  %v1216_v3 = vand.u32 65535, %v4821_v20  ;;  %v1244_v20 = vand.u32 65535, %v4844_v24  ;;  %v1272_v24 = vand.u32 65535, %v4868_v4 }
 0x280   :  { %vm1095_vm15 = vcmp.eq.f32.partialorder %v4848_v39, %v1029_v7  ;;  %v5347_v60 = vcvt.s32.f32 %v2015_v53  ;;  %v5375_v53 = vpop.xlane.xlu0 %1192  ;;  %v1176_v15 = vcvt.s32.f32 %v1174_v16  ;;  %v1204_v16 = vcvt.s32.f32 %v1202_v22 }
 0x281   :  { %v5352_v23 = vsel %vm1095_vm15, %v4772_v1, 128  ;;  %v1162_v1 = vcvt.s32.f32 %v1160_v33  ;;  %vm1194_vm3 = vcmp.eq.f32.partialorder %v4810_v59, %v5375_v53  ;;  %v1190_v33 = vcvt.s32.f32 %v1188_v18 }
 0x282   :  { %v2043_v31 = vshra.s32 %v5352_v23, 16  ;;  %2018 = vmin.xlane.f32.xlu1 %v5347_v60  ;;  %2004 = vmin.xlane.f32.xlu0 %v5349_v38  ;;  %v1258_v59 = vand.u32 65535, %v4879_v40  ;;  %v1300_v4 = vand.u32 65535, %v4892_v41 }
 0x283   :  { %v5361_v39 = vpop.xlane.xlu1 %1178 }
 0x284   :  { %v5363_v7 = vcvt.s32.f32 %v2043_v31  ;;  %vm1180_vm0 = vcmp.eq.f32.partialorder %v4862_v6, %v5361_v39  ;;  %v5385_v58 = vpop.xlane.xlu0 %1220 }
 0x285   :  { %v1181_v38 = vsel %vm1180_vm0, %v1176_v15, inf  ;;  %vm1222_vm5 = vcmp.eq.f32.partialorder %v4830_v10, %v5385_v58  ;;  %v1286_v10 = vand.u32 65535, %v4889_v27 }
 0x286   :  { %6144 = vst [vmem:[#allocation88_spill] sm:$0xff] %v5363_v7  ;;  %2046 = vmin.xlane.f32.xlu1 %v5363_v7  ;;  %2032 = vmin.xlane.f32.xlu0 %v5365_v50  ;;  %v1167_v7 = vsel %vm1166_vm1, %v1162_v1, inf  ;;  %v1195_v1 = vsel %vm1194_vm3, %v1190_v33, inf }
 0x287   :  { %v5377_v31 = vpop.xlane.xlu1 %1206 }
 0x288   :  { %vm1208_vm2 = vcmp.eq.f32.partialorder %v4876_v9, %v5377_v31  ;;  %v5395_v12 = vpop.xlane.xlu0 %1248 }
 0x289   :  { %v1209_v15 = vsel %vm1208_vm2, %v1204_v16, inf  ;;  %vm1250_vm7 = vcmp.eq.f32.partialorder %v4852_v21, %v5395_v12  ;;  %v1314_v21 = vand.u32 65535, %v4903_v13 }
 0x28a   :  { %1182 = vmin.xlane.f32.xlu1 %v1181_v38  ;;  %1168 = vmin.xlane.f32.xlu0 %v1167_v7  ;;  %v1232_v38 = vcvt.s32.f32 %v1230_v46  ;;  %v1218_v7 = vcvt.s32.f32 %v1216_v3  ;;  %v1260_v46 = vcvt.s32.f32 %v1258_v59  ;;  %v1246_v3 = vcvt.s32.f32 %v1244_v20 }
 0x28b   :  { %v5387_v6 = vpop.xlane.xlu1 %1234 }
 0x28c   :  { %vm1236_vm4 = vcmp.eq.f32.partialorder %v4886_v57, %v5387_v6  ;;  %v1223_v18 = vsel %vm1222_vm5, %v1218_v7, inf  ;;  %v5405_v40 = vpop.xlane.xlu0 %1276  ;;  %v1251_v33 = vsel %vm1250_vm7, %v1246_v3, inf  ;;  %v6148_v7 = vld [vmem:[#allocation16_spill] sm:$0xff] }
 0x28d   :  { %v1237_v22 = vsel %vm1236_vm4, %v1232_v38, inf  ;;  %vm1278_vm9 = vcmp.eq.f32.partialorder %v4874_v29, %v5405_v40  ;;  %v6145_v38 = vld [vmem:[#allocation39_spill] sm:$0xff]  ;;  %v6147_v29 = vld [vmem:[#allocation14_spill] sm:$0xff]  ;;  %v1328_v41 = vand.u32 65535, %v6148_v7 }
 0x28e   :  { %1210 = vmin.xlane.f32.xlu1 %v1209_v15  ;;  %1196 = vmin.xlane.f32.xlu0 %v1195_v1  ;;  %v1288_v15 = vcvt.s32.f32 %v1286_v10  ;;  %v1274_v1 = vcvt.s32.f32 %v1272_v24  ;;  %v1342_v13 = vand.u32 65535, %v6147_v29  ;;  %v1316_v10 = vcvt.s32.f32 %v1314_v21  ;;  %v6153_v7 = vld [vmem:[#allocation43_spill] sm:$0xff] }
 0x28f   :  { %v5397_v9 = vpop.xlane.xlu1 %1262  ;;  %v1302_v24 = vcvt.s32.f32 %v1300_v4  ;;  %v1330_v4 = vcvt.s32.f32 %v1328_v41 }
 0x290   :  { %vm1264_vm6 = vcmp.eq.f32.partialorder %v4900_v2, %v5397_v9  ;;  %v5415_v27 = vpop.xlane.xlu0 %1304  ;;  %v1279_v20 = vsel %vm1278_vm9, %v1274_v1, inf  ;;  %v6151_v1 = vld [vmem:[#allocation41_spill] sm:$0xff]  ;;  %v1344_v21 = vcvt.s32.f32 %v1342_v13 }
 0x291   :  { %v1265_v16 = vsel %vm1264_vm6, %v1260_v46, inf }
 0x292   :  { %1238 = vmin.xlane.f32.xlu1 %v1237_v22  ;;  %1224 = vmin.xlane.f32.xlu0 %v1223_v18 }
 0x293   :  { %v5407_v57 = vpop.xlane.xlu1 %1290 }
 0x294   :  { %vm1292_vm8 = vcmp.eq.f32.partialorder %v4910_v47, %v5407_v57  ;;  %v6146_v47 = vld [vmem:[#allocation15_spill] sm:$0xff] }
 0x295   :  { %v1293_v59 = vsel %vm1292_vm8, %v1288_v15, inf  ;;  %vm1306_vm11 = vcmp.eq.f32.partialorder %v6146_v47, %v5415_v27 }
 0x296   :  { %1266 = vmin.xlane.f32.xlu1 %v1265_v16  ;;  %1252 = vmin.xlane.f32.xlu0 %v1251_v33  ;;  %v1307_v3 = vsel %vm1306_vm11, %v1302_v24, inf  ;;  %v6149_v16 = vld [vmem:[#allocation38_spill] sm:$0xff]  ;;  %v6150_v33 = vld [vmem:[#allocation40_spill] sm:$0xff] }
 0x297   :  { %v5417_v2 = vpop.xlane.xlu1 %1318  ;;  %v5425_v22 = vpop.xlane.xlu0 %1332  ;;  %v1370_v15 = vand.u32 65535, %v6150_v33 }
 0x298   :  { %vm1320_vm10 = vcmp.eq.f32.partialorder %v6145_v38, %v5417_v2  ;;  %vm1334_vm13 = vcmp.eq.f32.partialorder %v6149_v16, %v5425_v22 }
 0x299   :  { %v1321_v46 = vsel %vm1320_vm10, %v1316_v10, inf  ;;  %v1335_v29 = vsel %vm1334_vm13, %v1330_v4, inf  ;;  %v6155_v10 = vld [vmem:[#allocation44_spill] sm:$0xff]  ;;  %v1372_v33 = vcvt.s32.f32 %v1370_v15  ;;  %v6158_v4 = vld [vmem:[#allocation47_spill] sm:$0xff]  ;;  %v6161_v15 = vld [vmem:[#allocation49_spill] sm:$0xff] }
 0x29a   :  { %1294 = vmin.xlane.f32.xlu1 %v1293_v59  ;;  %1280 = vmin.xlane.f32.xlu0 %v1279_v20  ;;  %v1356_v59 = vand.u32 65535, %v6151_v1  ;;  %v1398_v24 = vand.u32 65535, %v6155_v10  ;;  %v6160_v10 = vld [vmem:[#allocation22_spill] sm:$0xff] }
 0x29b   :  { %v5427_v18 = vpop.xlane.xlu1 %1346 }
 0x29c   :  { %vm1348_vm12 = vcmp.eq.f32.partialorder %v4935_v62, %v5427_v18  ;;  %v6154_v62 = vld [vmem:[#allocation42_spill] sm:$0xff]  ;;  %v1358_v1 = vcvt.s32.f32 %v1356_v59  ;;  %v1412_v59 = vand.u32 65535, %v6161_v15  ;;  %v6169_v15 = vld [vmem:[#allocation51_spill] sm:$0xff] }
 0x29d   :  { %v1349_v47 = vsel %vm1348_vm12, %v1344_v21, inf  ;;  %v6157_v21 = vld [vmem:[#allocation45_spill] sm:$0xff] }
 0x29e   :  { %1322 = vmin.xlane.f32.xlu1 %v1321_v46  ;;  %1308 = vmin.xlane.f32.xlu0 %v1307_v3  ;;  %v6156_v46 = vld [vmem:[#allocation46_spill] sm:$0xff] }
 0x29f   :  { %v5435_v20 = vpop.xlane.xlu1 %1374  ;;  %v5437_v38 = vpop.xlane.xlu0 %1360  ;;  %v1384_v3 = vand.u32 65535, %v6156_v46 }
 0x2a0   :  { %6152 = vst [vmem:[#allocation39_spill] sm:$0xff] %v5437_v38  ;;  %vm1376_vm14 = vcmp.eq.f32.partialorder %v6153_v7, %v5435_v20  ;;  %vm1362_vm15 = vcmp.eq.f32.partialorder %v6154_v62, %v5437_v38  ;;  %v1400_v7 = vcvt.s32.f32 %v1398_v24 }
 0x2a1   :  { %v1377_v13 = vsel %vm1376_vm14, %v1372_v33, inf  ;;  %v1363_v41 = vsel %vm1362_vm15, %v1358_v1, inf  ;;  %v1386_v62 = vcvt.s32.f32 %v1384_v3 }
 0x2a2   :  { %1350 = vmin.xlane.f32.xlu1 %v1349_v47  ;;  %1336 = vmin.xlane.f32.xlu0 %v1335_v29  ;;  %v1426_v47 = vand.u32 65535, %v6158_v4  ;;  %v1414_v4 = vcvt.s32.f32 %v1412_v59 }
 0x2a3   :  { %v5445_v16 = vpop.xlane.xlu1 %1402 }
 0x2a4   :  { %vm1404_vm0 = vcmp.eq.f32.partialorder %v6157_v21, %v5445_v16  ;;  %v1428_v1 = vcvt.s32.f32 %v1426_v47  ;;  %v6164_v21 = vld [vmem:[#allocation50_spill] sm:$0xff] }
 0x2a5   :  { %v1405_v46 = vsel %vm1404_vm0, %v1400_v7, inf  ;;  %v1454_v24 = vand.u32 65535, %v6164_v21  ;;  %v6166_v7 = vld [vmem:[#allocation25_spill] sm:$0xff] }
 0x2a6   :  { %1378 = vmin.xlane.f32.xlu1 %v1377_v13  ;;  %1364 = vmin.xlane.f32.xlu0 %v1363_v41  ;;  %v6163_v13 = vld [vmem:[#allocation48_spill] sm:$0xff] }
 0x2a7   :  { %v5450_v29 = vpop.xlane.xlu0 %1388  ;;  %v1456_v47 = vcvt.s32.f32 %v1454_v24 }
 0x2a8   :  { %6159 = vst [vmem:[#allocation15_spill] sm:$0xff] %v5450_v29  ;;  %vm1390_vm1 = vcmp.eq.f32.partialorder %v6160_v10, %v5450_v29 }
 0x2a9   :  { %v1391_v38 = vsel %vm1390_vm1, %v1386_v62, inf }
 0x2aa   :  { %1406 = vmin.xlane.f32.xlu1 %v1405_v46  ;;  %1392 = vmin.xlane.f32.xlu0 %v1391_v38  ;;  %v6167_v38 = vld [vmem:[#allocation52_spill] sm:$0xff] }
 0x2ab   :  { %v5455_v33 = vpop.xlane.xlu1 %1430  ;;  %v1440_v10 = vand.u32 65535, %v6167_v38 }
 0x2ac   :  { %6162 = vst [vmem:[#allocation14_spill] sm:$0xff] %v5455_v33  ;;  %vm1432_vm2 = vcmp.eq.f32.partialorder %v6163_v13, %v5455_v33  ;;  %v6170_v13 = vld [vmem:[#allocation53_spill] sm:$0xff]  ;;  %v6172_v33 = vld [vmem:[#allocation28_spill] sm:$0xff] }
 0x2ad   :  { %v1433_v41 = vsel %vm1432_vm2, %v1428_v1, inf  ;;  %v1442_v59 = vcvt.s32.f32 %v1440_v10 }
 0x2ae   :  { %1434 = vmin.xlane.f32.xlu1 %v1433_v41  ;;  %v1482_v41 = vand.u32 65535, %v6170_v13 }
 0x2af   :  { %v5460_v3 = vpop.xlane.xlu0 %1416 }
 0x2b0   :  { %6165 = vst [vmem:[#allocation16_spill] sm:$0xff] %v5460_v3  ;;  %vm1418_vm3 = vcmp.eq.f32.partialorder %v6166_v7, %v5460_v3  ;;  %v6173_v7 = vld [vmem:[#allocation55_spill] sm:$0xff]  ;;  %v1484_v24 = vcvt.s32.f32 %v1482_v41  ;;  %v6175_v3 = vld [vmem:[#allocation54_spill] sm:$0xff] }
 0x2b1   :  { %v1419_v62 = vsel %vm1418_vm3, %v1414_v4, inf }
 0x2b2   :  { %1420 = vmin.xlane.f32.xlu0 %v1419_v62  ;;  %v1468_v62 = vand.u32 65535, %v6173_v7 }
 0x2b3   :  { %v5465_v46 = vpop.xlane.xlu1 %1458 }
 0x2b4   :  { %6168 = vst [vmem:[#allocation38_spill] sm:$0xff] %v5465_v46  ;;  %vm1460_vm4 = vcmp.eq.f32.partialorder %v6169_v15, %v5465_v46  ;;  %v6176_v15 = vld [vmem:[#allocation57_spill] sm:$0xff]  ;;  %v1470_v10 = vcvt.s32.f32 %v1468_v62  ;;  %v6178_v46 = vld [vmem:[#allocation56_spill] sm:$0xff] }
 0x2b5   :  { %v1461_v1 = vsel %vm1460_vm4, %v1456_v47, inf }
 0x2b6   :  { %1462 = vmin.xlane.f32.xlu1 %v1461_v1  ;;  %v1510_v1 = vand.u32 65535, %v6176_v15  ;;  %v6182_v15 = vld [vmem:[#allocation60_spill] sm:$0xff] }
 0x2b7   :  { %v5470_v21 = vpop.xlane.xlu0 %1444 }
 0x2b8   :  { %6171 = vst [vmem:[#allocation40_spill] sm:$0xff] %v5470_v21  ;;  %vm1446_vm5 = vcmp.eq.f32.partialorder %v6172_v33, %v5470_v21  ;;  %v1512_v41 = vcvt.s32.f32 %v1510_v1  ;;  %v6180_v21 = vld [vmem:[#allocation17_spill] sm:$0xff]  ;;  %v1566_v1 = vand.u32 65535, %v5072_v0  ;;  %v1594_v0 = vand.u32 65535, %v5091_v52 }
 0x2b9   :  { %v1447_v4 = vsel %vm1446_vm5, %v1442_v59, inf  ;;  %v6179_v59 = vld [vmem:[#allocation58_spill] sm:$0xff]  ;;  %v1622_v52 = vand.u32 65535, %v5108_v32  ;;  %v1650_v32 = vand.u32 65535, %v5127_v11  ;;  %v1678_v11 = vand.u32 65535, %v5144_v55 }
 0x2ba   :  { %1448 = vmin.xlane.f32.xlu0 %v1447_v4  ;;  %v1496_v4 = vand.u32 65535, %v6179_v59  ;;  %v1706_v55 = vand.u32 65535, %v5161_v54  ;;  %v1734_v54 = vand.u32 65535, %v5178_v63  ;;  %v1762_v63 = vand.u32 65535, %v5195_v48 }
 0x2bb   :  { %v5475_v38 = vpop.xlane.xlu1 %1486  ;;  %v1790_v48 = vand.u32 65535, %v5212_v30  ;;  %v1818_v30 = vand.u32 65535, %v5228_v61  ;;  %v1846_v61 = vand.u32 65535, %v5244_v43  ;;  %v1874_v43 = vand.u32 65535, %v5260_v26 }
 0x2bc   :  { %6174 = vst [vmem:[#allocation41_spill] sm:$0xff] %v5475_v38  ;;  %vm1488_vm6 = vcmp.eq.f32.partialorder %v6175_v3, %v5475_v38  ;;  %v1538_v38 = vand.u32 65535, %v6182_v15  ;;  %v1498_v29 = vcvt.s32.f32 %v1496_v4  ;;  %v6187_v4 = vld [vmem:[#allocation19_spill] sm:$0xff]  ;;  %v1902_v26 = vand.u32 65535, %v5276_v28 }
 0x2bd   :  { %v1489_v47 = vsel %vm1488_vm6, %v1484_v24, inf  ;;  %v6181_v24 = vld [vmem:[#allocation32_spill] sm:$0xff]  ;;  %v1930_v28 = vand.u32 65535, %v5292_v19  ;;  %v1958_v19 = vand.u32 65535, %v5308_v25  ;;  %v1986_v25 = vand.u32 65535, %v5324_v37 }
 0x2be   :  { %1490 = vmin.xlane.f32.xlu1 %v1489_v47  ;;  %v1524_v47 = vand.u32 65535, %v6181_v24  ;;  %v2014_v37 = vand.u32 65535, %v5340_v35  ;;  %v2042_v35 = vand.u32 65535, %v5352_v23 }
 0x2bf   :  { %v5480_v13 = vpop.xlane.xlu0 %1472 }
 0x2c0   :  { %6177 = vst [vmem:[#allocation43_spill] sm:$0xff] %v5480_v13  ;;  %vm1474_vm7 = vcmp.eq.f32.partialorder %v6178_v46, %v5480_v13  ;;  %v6184_v46 = vld [vmem:[#allocation18_spill] sm:$0xff]  ;;  %v2044_v23 = vcvt.s32.f32 %v2042_v35 }
 0x2c1   :  { %v1475_v33 = vsel %vm1474_vm7, %v1470_v10, inf }
 0x2c2   :  { %1476 = vmin.xlane.f32.xlu0 %v1475_v33  ;;  %v6185_v33 = vld [vmem:[#allocation59_spill] sm:$0xff] }
 0x2c3   :  { %v5485_v7 = vpop.xlane.xlu1 %1514  ;;  %v1552_v59 = vand.u32 65535, %v6185_v33 }
 0x2c4   :  { %vm1516_vm8 = vcmp.eq.f32.partialorder %v6180_v21, %v5485_v7 }
 0x2c5   :  { %v1517_v3 = vsel %vm1516_vm8, %v1512_v41, inf  ;;  %v1540_v41 = vcvt.s32.f32 %v1538_v38  ;;  %v1568_v38 = vcvt.s32.f32 %v1566_v1  ;;  %v1596_v1 = vcvt.s32.f32 %v1594_v0 }
 0x2c6   :  { %1518 = vmin.xlane.f32.xlu1 %v1517_v3  ;;  %v1526_v3 = vcvt.s32.f32 %v1524_v47  ;;  %v1554_v47 = vcvt.s32.f32 %v1552_v59  ;;  %v1624_v0 = vcvt.s32.f32 %v1622_v52  ;;  %v1652_v52 = vcvt.s32.f32 %v1650_v32 }
 0x2c7   :  { %v5491_v62 = vpop.xlane.xlu0 %1500  ;;  %v1680_v32 = vcvt.s32.f32 %v1678_v11  ;;  %v1708_v11 = vcvt.s32.f32 %v1706_v55  ;;  %v1736_v55 = vcvt.s32.f32 %v1734_v54  ;;  %v1764_v54 = vcvt.s32.f32 %v1762_v63 }
 0x2c8   :  { %6183 = vst [vmem:[#allocation42_spill] sm:$0xff] %v5491_v62  ;;  %vm1502_vm9 = vcmp.eq.f32.partialorder %v6184_v46, %v5491_v62  ;;  %v6189_v62 = vld [vmem:[#allocation20_spill] sm:$0xff]  ;;  %v1792_v63 = vcvt.s32.f32 %v1790_v48  ;;  %v1820_v48 = vcvt.s32.f32 %v1818_v30  ;;  %v1848_v30 = vcvt.s32.f32 %v1846_v61 }
 0x2c9   :  { %v1503_v10 = vsel %vm1502_vm9, %v1498_v29, inf  ;;  %v6188_v29 = vld [vmem:[#allocation35_spill] sm:$0xff]  ;;  %v1876_v61 = vcvt.s32.f32 %v1874_v43  ;;  %v1904_v43 = vcvt.s32.f32 %v1902_v26  ;;  %v1932_v26 = vcvt.s32.f32 %v1930_v28 }
 0x2ca   :  { %1504 = vmin.xlane.f32.xlu0 %v1503_v10  ;;  %v1580_v46 = vand.u32 65535, %v6188_v29  ;;  %v1960_v28 = vcvt.s32.f32 %v1958_v19  ;;  %v1988_v19 = vcvt.s32.f32 %v1986_v25  ;;  %v2016_v25 = vcvt.s32.f32 %v2014_v37  ;;  %v6236_v37 = vld [vmem:[#allocation88_spill] sm:$0xff] }
 0x2cb   :  { %v5497_v13 = vpop.xlane.xlu1 %1542  ;;  %v5499_v21 = vpop.xlane.xlu0 %1528 }
 0x2cc   :  { %6186 = vst [vmem:[#allocation44_spill] sm:$0xff] %v5499_v21  ;;  %vm1544_vm10 = vcmp.eq.f32.partialorder %v5064_v17, %v5497_v13  ;;  %vm1530_vm11 = vcmp.eq.f32.partialorder %v6187_v4, %v5499_v21  ;;  %v6190_v17 = vld [vmem:[#allocation61_spill] sm:$0xff]  ;;  %v6191_v4 = vld [vmem:[#allocation62_spill] sm:$0xff]  ;;  %v1582_v59 = vcvt.s32.f32 %v1580_v46 }
 0x2cd   :  { %v1545_v24 = vsel %vm1544_vm10, %v1540_v41, inf  ;;  %v1531_v15 = vsel %vm1530_vm11, %v1526_v3, inf  ;;  %v6193_v21 = vld [vmem:[#allocation21_spill] sm:$0xff] }
 0x2ce   :  { %1546 = vmin.xlane.f32.xlu1 %v1545_v24  ;;  %1532 = vmin.xlane.f32.xlu0 %v1531_v15  ;;  %v1608_v24 = vand.u32 65535, %v6191_v4 }
 0x2cf   :  { %v5507_v10 = vpop.xlane.xlu1 %1570  ;;  %v5509_v33 = vpop.xlane.xlu0 %1556 }
 0x2d0   :  { %vm1572_vm12 = vcmp.eq.f32.partialorder %v6189_v62, %v5507_v10  ;;  %vm1558_vm13 = vcmp.eq.f32.partialorder %v6190_v17, %v5509_v33  ;;  %v6194_v62 = vld [vmem:[#allocation63_spill] sm:$0xff]  ;;  %v6195_v17 = vld [vmem:[#allocation64_spill] sm:$0xff]  ;;  %v1610_v46 = vcvt.s32.f32 %v1608_v24 }
 0x2d1   :  { %v1573_v41 = vsel %vm1572_vm12, %v1568_v38, inf  ;;  %v1559_v3 = vsel %vm1558_vm13, %v1554_v47, inf }
 0x2d2   :  { %1574 = vmin.xlane.f32.xlu1 %v1573_v41  ;;  %1560 = vmin.xlane.f32.xlu0 %v1559_v3  ;;  %v1636_v41 = vand.u32 65535, %v6195_v17 }
 0x2d3   :  { %v5517_v15 = vpop.xlane.xlu1 %1598  ;;  %v5519_v29 = vpop.xlane.xlu0 %1584 }
 0x2d4   :  { %6192 = vst [vmem:[#allocation46_spill] sm:$0xff] %v5519_v29  ;;  %vm1600_vm14 = vcmp.eq.f32.partialorder %v6193_v21, %v5517_v15  ;;  %vm1586_vm15 = vcmp.eq.f32.partialorder %v6194_v62, %v5519_v29  ;;  %v6197_v21 = vld [vmem:[#allocation23_spill] sm:$0xff]  ;;  %v6198_v62 = vld [vmem:[#allocation65_spill] sm:$0xff]  ;;  %v1638_v24 = vcvt.s32.f32 %v1636_v41  ;;  %v6199_v29 = vld [vmem:[#allocation24_spill] sm:$0xff] }
 0x2d5   :  { %v1601_v38 = vsel %vm1600_vm14, %v1596_v1, inf  ;;  %v1587_v47 = vsel %vm1586_vm15, %v1582_v59, inf }
 0x2d6   :  { %1602 = vmin.xlane.f32.xlu1 %v1601_v38  ;;  %1588 = vmin.xlane.f32.xlu0 %v1587_v47  ;;  %v1664_v38 = vand.u32 65535, %v6198_v62 }
 0x2d7   :  { %v5527_v3 = vpop.xlane.xlu1 %1626  ;;  %v5529_v4 = vpop.xlane.xlu0 %1612 }
 0x2d8   :  { %6196 = vst [vmem:[#allocation45_spill] sm:$0xff] %v5529_v4  ;;  %vm1628_vm0 = vcmp.eq.f32.partialorder %v5119_v5, %v5527_v3  ;;  %vm1614_vm1 = vcmp.eq.f32.partialorder %v6197_v21, %v5529_v4  ;;  %v6200_v5 = vld [vmem:[#allocation66_spill] sm:$0xff]  ;;  %v6201_v21 = vld [vmem:[#allocation67_spill] sm:$0xff]  ;;  %v1666_v41 = vcvt.s32.f32 %v1664_v38 }
 0x2d9   :  { %v1629_v1 = vsel %vm1628_vm0, %v1624_v0, inf  ;;  %v1615_v59 = vsel %vm1614_vm1, %v1610_v46, inf  ;;  %v6203_v4 = vld [vmem:[#allocation26_spill] sm:$0xff] }
 0x2da   :  { %1630 = vmin.xlane.f32.xlu1 %v1629_v1  ;;  %1616 = vmin.xlane.f32.xlu0 %v1615_v59  ;;  %v1692_v1 = vand.u32 65535, %v6201_v21 }
 0x2db   :  { %v5537_v47 = vpop.xlane.xlu1 %1654  ;;  %v5539_v17 = vpop.xlane.xlu0 %1640 }
 0x2dc   :  { %vm1656_vm2 = vcmp.eq.f32.partialorder %v6199_v29, %v5537_v47  ;;  %vm1642_vm3 = vcmp.eq.f32.partialorder %v6200_v5, %v5539_v17  ;;  %v6204_v29 = vld [vmem:[#allocation68_spill] sm:$0xff]  ;;  %v6205_v5 = vld [vmem:[#allocation69_spill] sm:$0xff]  ;;  %v1694_v38 = vcvt.s32.f32 %v1692_v1 }
 0x2dd   :  { %v1657_v0 = vsel %vm1656_vm2, %v1652_v52, inf  ;;  %v1643_v46 = vsel %vm1642_vm3, %v1638_v24, inf }
 0x2de   :  { %1658 = vmin.xlane.f32.xlu1 %v1657_v0  ;;  %1644 = vmin.xlane.f32.xlu0 %v1643_v46  ;;  %v1720_v0 = vand.u32 65535, %v6205_v5 }
 0x2df   :  { %v5547_v59 = vpop.xlane.xlu1 %1682  ;;  %v5549_v62 = vpop.xlane.xlu0 %1668 }
 0x2e0   :  { %6202 = vst [vmem:[#allocation47_spill] sm:$0xff] %v5549_v62  ;;  %vm1684_vm4 = vcmp.eq.f32.partialorder %v6203_v4, %v5547_v59  ;;  %vm1670_vm5 = vcmp.eq.f32.partialorder %v6204_v29, %v5549_v62  ;;  %v6207_v4 = vld [vmem:[#allocation27_spill] sm:$0xff]  ;;  %v6208_v29 = vld [vmem:[#allocation70_spill] sm:$0xff]  ;;  %v1722_v1 = vcvt.s32.f32 %v1720_v0  ;;  %v6209_v62 = vld [vmem:[#allocation29_spill] sm:$0xff] }
 0x2e1   :  { %v1685_v52 = vsel %vm1684_vm4, %v1680_v32, inf  ;;  %v1671_v24 = vsel %vm1670_vm5, %v1666_v41, inf }
 0x2e2   :  { %1686 = vmin.xlane.f32.xlu1 %v1685_v52  ;;  %1672 = vmin.xlane.f32.xlu0 %v1671_v24  ;;  %v1748_v52 = vand.u32 65535, %v6208_v29 }
 0x2e3   :  { %v5557_v46 = vpop.xlane.xlu1 %1710  ;;  %v5559_v21 = vpop.xlane.xlu0 %1696 }
 0x2e4   :  { %6206 = vst [vmem:[#allocation22_spill] sm:$0xff] %v5559_v21  ;;  %vm1712_vm6 = vcmp.eq.f32.partialorder %v5170_v36, %v5557_v46  ;;  %vm1698_vm7 = vcmp.eq.f32.partialorder %v6207_v4, %v5559_v21  ;;  %v6210_v36 = vld [vmem:[#allocation71_spill] sm:$0xff]  ;;  %v6211_v4 = vld [vmem:[#allocation72_spill] sm:$0xff]  ;;  %v1750_v0 = vcvt.s32.f32 %v1748_v52  ;;  %v6213_v21 = vld [vmem:[#allocation30_spill] sm:$0xff] }
 0x2e5   :  { %v1713_v32 = vsel %vm1712_vm6, %v1708_v11, inf  ;;  %v1699_v41 = vsel %vm1698_vm7, %v1694_v38, inf }
 0x2e6   :  { %1714 = vmin.xlane.f32.xlu1 %v1713_v32  ;;  %1700 = vmin.xlane.f32.xlu0 %v1699_v41  ;;  %v1776_v32 = vand.u32 65535, %v6211_v4 }
 0x2e7   :  { %v5567_v24 = vpop.xlane.xlu1 %1738  ;;  %v5569_v5 = vpop.xlane.xlu0 %1724 }
 0x2e8   :  { %vm1740_vm8 = vcmp.eq.f32.partialorder %v6209_v62, %v5567_v24  ;;  %vm1726_vm9 = vcmp.eq.f32.partialorder %v6210_v36, %v5569_v5  ;;  %v6214_v62 = vld [vmem:[#allocation73_spill] sm:$0xff]  ;;  %v6215_v36 = vld [vmem:[#allocation74_spill] sm:$0xff]  ;;  %v1778_v52 = vcvt.s32.f32 %v1776_v32 }
 0x2e9   :  { %v1741_v11 = vsel %vm1740_vm8, %v1736_v55, inf  ;;  %v1727_v38 = vsel %vm1726_vm9, %v1722_v1, inf }
 0x2ea   :  { %1742 = vmin.xlane.f32.xlu1 %v1741_v11  ;;  %1728 = vmin.xlane.f32.xlu0 %v1727_v38  ;;  %v1804_v11 = vand.u32 65535, %v6215_v36 }
 0x2eb   :  { %v5577_v41 = vpop.xlane.xlu1 %1766  ;;  %v5579_v29 = vpop.xlane.xlu0 %1752 }
 0x2ec   :  { %6212 = vst [vmem:[#allocation49_spill] sm:$0xff] %v5579_v29  ;;  %vm1768_vm10 = vcmp.eq.f32.partialorder %v6213_v21, %v5577_v41  ;;  %vm1754_vm11 = vcmp.eq.f32.partialorder %v6214_v62, %v5579_v29  ;;  %v6216_v21 = vld [vmem:[#allocation31_spill] sm:$0xff]  ;;  %v1806_v32 = vcvt.s32.f32 %v1804_v11  ;;  %v6218_v29 = vld [vmem:[#allocation33_spill] sm:$0xff] }
 0x2ed   :  { %v1769_v55 = vsel %vm1768_vm10, %v1764_v54, inf  ;;  %v1755_v1 = vsel %vm1754_vm11, %v1750_v0, inf  ;;  %v6217_v62 = vld [vmem:[#allocation75_spill] sm:$0xff] }
 0x2ee   :  { %1770 = vmin.xlane.f32.xlu1 %v1769_v55  ;;  %1756 = vmin.xlane.f32.xlu0 %v1755_v1  ;;  %v1832_v55 = vand.u32 65535, %v6217_v62 }
 0x2ef   :  { %v5587_v38 = vpop.xlane.xlu1 %1794  ;;  %v5589_v4 = vpop.xlane.xlu0 %1780 }
 0x2f0   :  { %vm1796_vm12 = vcmp.eq.f32.partialorder %v5220_v44, %v5587_v38  ;;  %vm1782_vm13 = vcmp.eq.f32.partialorder %v6216_v21, %v5589_v4  ;;  %v6219_v44 = vld [vmem:[#allocation76_spill] sm:$0xff]  ;;  %v6220_v21 = vld [vmem:[#allocation77_spill] sm:$0xff]  ;;  %v1834_v11 = vcvt.s32.f32 %v1832_v55 }
 0x2f1   :  { %v1797_v54 = vsel %vm1796_vm12, %v1792_v63, inf  ;;  %v1783_v0 = vsel %vm1782_vm13, %v1778_v52, inf }
 0x2f2   :  { %1798 = vmin.xlane.f32.xlu1 %v1797_v54  ;;  %1784 = vmin.xlane.f32.xlu0 %v1783_v0  ;;  %v1860_v54 = vand.u32 65535, %v6220_v21 }
 0x2f3   :  { %v5597_v1 = vpop.xlane.xlu1 %1822  ;;  %v5599_v36 = vpop.xlane.xlu0 %1808 }
 0x2f4   :  { %vm1824_vm14 = vcmp.eq.f32.partialorder %v6218_v29, %v5597_v1  ;;  %vm1810_vm15 = vcmp.eq.f32.partialorder %v6219_v44, %v5599_v36  ;;  %v6221_v29 = vld [vmem:[#allocation34_spill] sm:$0xff]  ;;  %v1862_v55 = vcvt.s32.f32 %v1860_v54 }
 0x2f5   :  { %v1825_v63 = vsel %vm1824_vm14, %v1820_v48, inf  ;;  %v1811_v52 = vsel %vm1810_vm15, %v1806_v32, inf  ;;  %v6222_v44 = vld [vmem:[#allocation78_spill] sm:$0xff] }
 0x2f6   :  { %1826 = vmin.xlane.f32.xlu1 %v1825_v63  ;;  %1812 = vmin.xlane.f32.xlu0 %v1811_v52  ;;  %v1888_v63 = vand.u32 65535, %v6222_v44 }
 0x2f7   :  { %v5607_v0 = vpop.xlane.xlu1 %1850  ;;  %v5609_v62 = vpop.xlane.xlu0 %1836 }
 0x2f8   :  { %vm1852_vm0 = vcmp.eq.f32.partialorder %v5252_v14, %v5607_v0  ;;  %vm1838_vm1 = vcmp.eq.f32.partialorder %v6221_v29, %v5609_v62  ;;  %v1890_v54 = vcvt.s32.f32 %v1888_v63 }
 0x2f9   :  { %v1853_v48 = vsel %vm1852_vm0, %v1848_v30, inf  ;;  %v1839_v32 = vsel %vm1838_vm1, %v1834_v11, inf  ;;  %v6223_v11 = vld [vmem:[#allocation36_spill] sm:$0xff] }
 0x2fa   :  { %1854 = vmin.xlane.f32.xlu1 %v1853_v48  ;;  %1840 = vmin.xlane.f32.xlu0 %v1839_v32  ;;  %v1916_v29 = vand.u32 65535, %v6223_v11 }
 0x2fb   :  { %v5617_v52 = vpop.xlane.xlu1 %1878  ;;  %v5619_v21 = vpop.xlane.xlu0 %1864 }
 0x2fc   :  { %vm1880_vm2 = vcmp.eq.f32.partialorder %v5268_v42, %v5617_v52  ;;  %vm1866_vm3 = vcmp.eq.f32.partialorder %v5270_v34, %v5619_v21  ;;  %v6224_v42 = vld [vmem:[#allocation79_spill] sm:$0xff]  ;;  %v1918_v63 = vcvt.s32.f32 %v1916_v29 }
 0x2fd   :  { %v1881_v14 = vsel %vm1880_vm2, %v1876_v61, inf  ;;  %v1867_v30 = vsel %vm1866_vm3, %v1862_v55, inf  ;;  %v6225_v61 = vld [vmem:[#allocation80_spill] sm:$0xff] }
 0x2fe   :  { %1882 = vmin.xlane.f32.xlu1 %v1881_v14  ;;  %1868 = vmin.xlane.f32.xlu0 %v1867_v30  ;;  %v1944_v55 = vand.u32 65535, %v6225_v61  ;;  %v6228_v61 = vld [vmem:[#allocation83_spill] sm:$0xff] }
 0x2ff   :  { %v5627_v48 = vpop.xlane.xlu1 %1906  ;;  %v5629_v32 = vpop.xlane.xlu0 %1892 }
 0x300   :  { %vm1908_vm4 = vcmp.eq.f32.partialorder %v5284_v56, %v5627_v48  ;;  %vm1894_vm5 = vcmp.eq.f32.partialorder %v6224_v42, %v5629_v32  ;;  %v1946_v29 = vcvt.s32.f32 %v1944_v55 }
 0x301   :  { %v1909_v34 = vsel %vm1908_vm4, %v1904_v43, inf  ;;  %v1895_v44 = vsel %vm1894_vm5, %v1890_v54, inf  ;;  %v6226_v43 = vld [vmem:[#allocation81_spill] sm:$0xff] }
 0x302   :  { %1910 = vmin.xlane.f32.xlu1 %v1909_v34  ;;  %1896 = vmin.xlane.f32.xlu0 %v1895_v44  ;;  %v1972_v54 = vand.u32 65535, %v6226_v43 }
 0x303   :  { %v5637_v14 = vpop.xlane.xlu1 %1934  ;;  %v5639_v30 = vpop.xlane.xlu0 %1920 }
 0x304   :  { %vm1936_vm6 = vcmp.eq.f32.partialorder %v5300_v45, %v5637_v14  ;;  %vm1922_vm7 = vcmp.eq.f32.partialorder %v5302_v49, %v5639_v30  ;;  %v6227_v45 = vld [vmem:[#allocation82_spill] sm:$0xff]  ;;  %v1974_v55 = vcvt.s32.f32 %v1972_v54 }
 0x305   :  { %v1937_v56 = vsel %vm1936_vm6, %v1932_v26, inf  ;;  %v1923_v11 = vsel %vm1922_vm7, %v1918_v63, inf  ;;  %v2000_v26 = vand.u32 65535, %v6228_v61  ;;  %v6233_v61 = vld [vmem:[#allocation87_spill] sm:$0xff] }
 0x306   :  { %1938 = vmin.xlane.f32.xlu1 %v1937_v56  ;;  %1924 = vmin.xlane.f32.xlu0 %v1923_v11  ;;  %v6229_v11 = vld [vmem:[#allocation84_spill] sm:$0xff] }
 0x307   :  { %v5647_v42 = vpop.xlane.xlu1 %1962  ;;  %v5649_v34 = vpop.xlane.xlu0 %1948  ;;  %v2002_v54 = vcvt.s32.f32 %v2000_v26  ;;  %v1185_v26 = vcvt.f32.s32 %v5361_v39 }
 0x308   :  { %vm1964_vm8 = vcmp.eq.f32.partialorder %v5316_v51, %v5647_v42  ;;  %vm1950_vm9 = vcmp.eq.f32.partialorder %v6227_v45, %v5649_v34  ;;  %v6230_v51 = vld [vmem:[#allocation85_spill] sm:$0xff] }
 0x309   :  { %v1965_v49 = vsel %vm1964_vm8, %v1960_v28, inf  ;;  %v1951_v44 = vsel %vm1950_vm9, %v1946_v29, inf  ;;  %v6231_v29 = vld [vmem:[#allocation86_spill] sm:$0xff] }
 0x30a   :  { %1966 = vmin.xlane.f32.xlu1 %v1965_v49  ;;  %1952 = vmin.xlane.f32.xlu0 %v1951_v44  ;;  %v2028_v45 = vand.u32 65535, %v6231_v29 }
 0x30b   :  { %v5657_v63 = vpop.xlane.xlu1 %1990  ;;  %v5659_v56 = vpop.xlane.xlu0 %1976 }
 0x30c   :  { %vm1992_vm10 = vcmp.eq.f32.partialorder %v6229_v11, %v5657_v63  ;;  %vm1978_vm11 = vcmp.eq.f32.partialorder %v6230_v51, %v5659_v56 }
 0x30d   :  { %v1993_v43 = vsel %vm1992_vm10, %v1988_v19, inf  ;;  %v1979_v28 = vsel %vm1978_vm11, %v1974_v55, inf }
 0x30e   :  { %1994 = vmin.xlane.f32.xlu1 %v1993_v43  ;;  %1980 = vmin.xlane.f32.xlu0 %v1979_v28  ;;  %v2030_v43 = vcvt.s32.f32 %v2028_v45  ;;  %v1171_v28 = vcvt.f32.s32 %v5359_v8  ;;  %v1186_v8 = vshll.u32 %v1185_v26, 16 }
 0x30f   :  { %v5667_v49 = vpop.xlane.xlu1 %2018  ;;  %v5669_v44 = vpop.xlane.xlu0 %2004 }
 0x310   :  { %6232 = vst [vmem:[#allocation48_spill] sm:$0xff] %v5669_v44  ;;  %vm2020_vm12 = vcmp.eq.f32.partialorder %v5347_v60, %v5667_v49  ;;  %vm2006_vm13 = vcmp.eq.f32.partialorder %v6233_v61, %v5669_v44  ;;  %v1172_v61 = vshll.u32 %v1171_v28, 16 }
 0x311   :  { %v2021_v19 = vsel %vm2020_vm12, %v2016_v25, inf  ;;  %v2007_v55 = vsel %vm2006_vm13, %v2002_v54, inf  ;;  %v1199_v25 = vcvt.f32.s32 %v5375_v53  ;;  %v1213_v54 = vcvt.f32.s32 %v5377_v31 }
 0x312   :  { %2022 = vmin.xlane.f32.xlu1 %v2021_v19  ;;  %2008 = vmin.xlane.f32.xlu0 %v2007_v55  ;;  %v4100_v31 = vmov 1.0  }
 0x313   :  { %v5675_v11 = vpop.xlane.xlu1 %2046  ;;  %v5677_v51 = vpop.xlane.xlu0 %2032 }
 0x314   :  { %6234 = vst [vmem:[#allocation50_spill] sm:$0xff] %v5675_v11  ;;  %6235 = vst [vmem:[#allocation25_spill] sm:$0xff] %v5677_v51  ;;  %vm2048_vm14 = vcmp.eq.f32.partialorder %v6236_v37, %v5675_v11  ;;  %vm2034_vm15 = vcmp.eq.f32.partialorder %v5365_v50, %v5677_v51  ;;  %v1200_v37 = vshll.u32 %v1199_v25, 16  ;;  %v1227_v11 = vcvt.f32.s32 %v5385_v58  ;;  %v6237_v51 = vld [vmem:[#allocation37_spill] sm:$0xff] }
 0x315   :  { %v2049_v60 = vsel %vm2048_vm14, %v2044_v23, inf  ;;  %v2035_v29 = vsel %vm2034_vm15, %v2030_v43, inf  ;;  %v1214_v50 = vshll.u32 %v1213_v54, 16  ;;  %v1241_v23 = vcvt.f32.s32 %v5387_v6 }
 0x316   :  { %2050 = vmin.xlane.f32.xlu1 %v2049_v60  ;;  %2036 = vmin.xlane.f32.xlu0 %v2035_v29  ;;  %v1228_v25 = vshll.u32 %v1227_v11, 16  ;;  %v1255_v58 = vcvt.f32.s32 %v5395_v12  ;;  %v1269_v6 = vcvt.f32.s32 %v5397_v9  ;;  %v1283_v12 = vcvt.f32.s32 %v5405_v40 }
 0x317   :  { %v1183_v35 = vpop.xlane.xlu1 %1182  ;;  %v1169_v45 = vpop.xlane.xlu0 %1168  ;;  %v1242_v54 = vshll.u32 %v1241_v23, 16  ;;  %v1297_v9 = vcvt.f32.s32 %v5407_v57  ;;  %v1311_v40 = vcvt.f32.s32 %v5415_v27  ;;  %v1325_v57 = vcvt.f32.s32 %v5417_v2 }
 0x318   :  { %v1184_v19 = vcvt.f32.s32 %v1183_v35  ;;  %v1170_v39 = vcvt.f32.s32 %v1169_v45  ;;  %v1256_v11 = vshll.u32 %v1255_v58, 16  ;;  %v1339_v27 = vcvt.f32.s32 %v5425_v22 }
 0x319   :  { %v1353_v2 = vcvt.f32.s32 %v5427_v18  ;;  %v1381_v22 = vcvt.f32.s32 %v5435_v20  ;;  %v1409_v20 = vcvt.f32.s32 %v5445_v16 }
 0x31a   :  { %v1187_v55 = vadd.s32 %v1186_v8, %v1184_v19  ;;  %v1173_v44 = vadd.s32 %v1172_v61, %v1170_v39  ;;  %v1270_v39 = vshll.u32 %v1269_v6, 16 }
 0x31b   :  { %v1211_v43 = vpop.xlane.xlu1 %1210  ;;  %v1197_v60 = vpop.xlane.xlu0 %1196 }
 0x31c   :  { %v1212_v29 = vcvt.f32.s32 %v1211_v43  ;;  %v1198_v53 = vcvt.f32.s32 %v1197_v60  ;;  %vm2056_vm0 = vcmp.eq.s32.totalorder %v6237_v51, %v1173_v44  ;;  %vm2057_vm1 = vcmp.eq.s32.totalorder %v6237_v51, %v1187_v55 }
 0x31d   :  { %3767 = vmatprep.mubr.msk.f32.mxu1 %vm2056_vm0, %v4100_v31 }
 0x31e   :  { %v1215_v28 = vadd.s32 %v1214_v50, %v1212_v29  ;;  %v1201_v26 = vadd.s32 %v1200_v37, %v1198_v53  ;;  %3768 = vmatmul.mubr.msk.f32.vlgmr.msra.gmra.mrb[0].mxu1 %vm2057_vm1, %v4100_v31  ;;  %v1284_v29 = vshll.u32 %v1283_v12, 16  ;;  %v1298_v53 = vshll.u32 %v1297_v9, 16 }
 0x31f   :  { %v1239_v35 = vpop.xlane.xlu1 %1238  ;;  %v1225_v45 = vpop.xlane.xlu0 %1224  ;;  %v1354_v9 = vshll.u32 %v1353_v2, 16 }
 0x320   :  { %v1240_v61 = vcvt.f32.s32 %v1239_v35  ;;  %v1226_v8 = vcvt.f32.s32 %v1225_v45  ;;  %vm2058_vm2 = vcmp.eq.s32.totalorder %v6237_v51, %v1201_v26  ;;  %vm2059_vm3 = vcmp.eq.s32.totalorder %v6237_v51, %v1215_v28 }
 0x321   :  { %3770 = vmatprep.mubr.msk.f32.mxu1 %vm2058_vm2, %v4100_v31  ;;  %v1312_v35 = vshll.u32 %v1311_v40, 16  ;;  %v1326_v45 = vshll.u32 %v1325_v57, 16  ;;  %v1382_v40 = vshll.u32 %v1381_v22, 16  ;;  %v6239_v57 = vld [vmem:[#allocation15_spill] sm:$0xff] }
 0x322   :  { %v1243_v44 = vadd.s32 %v1242_v54, %v1240_v61  ;;  %v1229_v19 = vadd.s32 %v1228_v25, %v1226_v8  ;;  %3771 = vmatmul.mubr.msk.f32.gmra.mrb[2].mxu1 %vm2059_vm3, %v4100_v31 }
 0x323   :  { %v1267_v55 = vpop.xlane.xlu1 %1266  ;;  %v1253_v37 = vpop.xlane.xlu0 %1252 }
 0x324   :  { %v1268_v50 = vcvt.f32.s32 %v1267_v55  ;;  %v1254_v23 = vcvt.f32.s32 %v1253_v37  ;;  %vm2060_vm4 = vcmp.eq.s32.totalorder %v6237_v51, %v1229_v19  ;;  %vm2061_vm5 = vcmp.eq.s32.totalorder %v6237_v51, %v1243_v44  ;;  %v6238_v55 = vld [vmem:[#allocation39_spill] sm:$0xff] }
 0x325   :  { %3773 = vmatprep.mubr.msk.f32.mxu1 %vm2060_vm4, %v4100_v31  ;;  %v1367_v18 = vcvt.f32.s32 %v6238_v55 }
 0x326   :  { %v1271_v43 = vadd.s32 %v1270_v39, %v1268_v50  ;;  %v1257_v60 = vadd.s32 %v1256_v11, %v1254_v23  ;;  %3774 = vmatmul.mubr.msk.f32.gmra.mrb[4].mxu1 %vm2061_vm5, %v4100_v31  ;;  %v1340_v39 = vshll.u32 %v1339_v27, 16 }
 0x327   :  { %v1295_v28 = vpop.xlane.xlu1 %1294  ;;  %v1281_v26 = vpop.xlane.xlu0 %1280 }
 0x328   :  { %v1296_v25 = vcvt.f32.s32 %v1295_v28  ;;  %v1282_v58 = vcvt.f32.s32 %v1281_v26  ;;  %vm2062_vm6 = vcmp.eq.s32.totalorder %v6237_v51, %v1257_v60  ;;  %vm2063_vm7 = vcmp.eq.s32.totalorder %v6237_v51, %v1271_v43 }
 0x329   :  { %3776 = vmatprep.mubr.msk.f32.mxu1 %vm2062_vm6, %v4100_v31  ;;  %v1395_v28 = vcvt.f32.s32 %v6239_v57 }
 0x32a   :  { %v1299_v54 = vadd.s32 %v1298_v53, %v1296_v25  ;;  %v1285_v6 = vadd.s32 %v1284_v29, %v1282_v58  ;;  %3777 = vmatmul.mubr.msk.f32.gmra.mrb[6].mxu1 %vm2063_vm7, %v4100_v31  ;;  %v1368_v53 = vshll.u32 %v1367_v18, 16 }
 0x32b   :  { %v1323_v61 = vpop.xlane.xlu1 %1322  ;;  %v1309_v8 = vpop.xlane.xlu0 %1308  ;;  %v1396_v27 = vshll.u32 %v1395_v28, 16 }
 0x32c   :  { %v1324_v44 = vcvt.f32.s32 %v1323_v61  ;;  %v1310_v19 = vcvt.f32.s32 %v1309_v8  ;;  %vm2064_vm8 = vcmp.eq.s32.totalorder %v6237_v51, %v1285_v6  ;;  %vm2065_vm9 = vcmp.eq.s32.totalorder %v6237_v51, %v1299_v54 }
 0x32d   :  { %3779 = vmatprep.mubr.msk.f32.mxu1 %vm2064_vm8, %v4100_v31 }
 0x32e   :  { %v1327_v11 = vadd.s32 %v1326_v45, %v1324_v44  ;;  %v1313_v12 = vadd.s32 %v1312_v35, %v1310_v19  ;;  %3780 = vmatmul.mubr.msk.f32.gmra.mrb[8].mxu1 %vm2065_vm9, %v4100_v31  ;;  %v1410_v45 = vshll.u32 %v1409_v20, 16  ;;  %v6243_v20 = vld [vmem:[#allocation40_spill] sm:$0xff] }
 0x32f   :  { %v1351_v37 = vpop.xlane.xlu1 %1350  ;;  %v1337_v50 = vpop.xlane.xlu0 %1336  ;;  %v1451_v57 = vcvt.f32.s32 %v6243_v20 }
 0x330   :  { %v1352_v23 = vcvt.f32.s32 %v1351_v37  ;;  %v1338_v43 = vcvt.f32.s32 %v1337_v50  ;;  %vm2066_vm10 = vcmp.eq.s32.totalorder %v6237_v51, %v1313_v12  ;;  %vm2067_vm11 = vcmp.eq.s32.totalorder %v6237_v51, %v1327_v11  ;;  %v6240_v11 = vld [vmem:[#allocation14_spill] sm:$0xff] }
 0x331   :  { %3782 = vmatprep.mubr.msk.f32.mxu1 %vm2066_vm10, %v4100_v31  ;;  %v1437_v12 = vcvt.f32.s32 %v6240_v11 }
 0x332   :  { %v1355_v60 = vadd.s32 %v1354_v9, %v1352_v23  ;;  %v1341_v29 = vadd.s32 %v1340_v39, %v1338_v43  ;;  %3783 = vmatmul.mubr.msk.f32.gmra.mrb[10].mxu1 %vm2067_vm11, %v4100_v31  ;;  %v6241_v9 = vld [vmem:[#allocation16_spill] sm:$0xff] }
 0x333   :  { %v1379_v26 = vpop.xlane.xlu1 %1378  ;;  %v1365_v25 = vpop.xlane.xlu0 %1364  ;;  %v1423_v22 = vcvt.f32.s32 %v6241_v9  ;;  %v1438_v18 = vshll.u32 %v1437_v12, 16 }
 0x334   :  { %v1380_v58 = vcvt.f32.s32 %v1379_v26  ;;  %v1366_v54 = vcvt.f32.s32 %v1365_v25  ;;  %vm2068_vm12 = vcmp.eq.s32.totalorder %v6237_v51, %v1341_v29  ;;  %vm2069_vm13 = vcmp.eq.s32.totalorder %v6237_v51, %v1355_v60  ;;  %v6242_v29 = vld [vmem:[#allocation38_spill] sm:$0xff] }
 0x335   :  { %3785 = vmatprep.mubr.msk.f32.mxu1 %vm2068_vm12, %v4100_v31  ;;  %v1424_v50 = vshll.u32 %v1423_v22, 16  ;;  %v1521_v22 = vcvt.f32.s32 %v5485_v7 }
 0x336   :  { %v1383_v6 = vadd.s32 %v1382_v40, %v1380_v58  ;;  %v1369_v35 = vadd.s32 %v1368_v53, %v1366_v54  ;;  %3786 = vmatmul.mubr.msk.f32.gmra.mrb[12].mxu1 %vm2069_vm13, %v4100_v31  ;;  %v1465_v40 = vcvt.f32.s32 %v6242_v29  ;;  %v1452_v58 = vshll.u32 %v1451_v57, 16 }
 0x337   :  { %v1407_v2 = vpop.xlane.xlu1 %1406  ;;  %v1393_v16 = vpop.xlane.xlu0 %1392 }
 0x338   :  { %v1408_v61 = vcvt.f32.s32 %v1407_v2  ;;  %v1394_v8 = vcvt.f32.s32 %v1393_v16  ;;  %vm2070_vm14 = vcmp.eq.s32.totalorder %v6237_v51, %v1369_v35  ;;  %vm2071_vm15 = vcmp.eq.s32.totalorder %v6237_v51, %v1383_v6  ;;  %v6245_v16 = vld [vmem:[#allocation43_spill] sm:$0xff] }
 0x339   :  { %3788 = vmatprep.mubr.msk.f32.mxu1 %vm2070_vm14, %v4100_v31  ;;  %v1466_v26 = vshll.u32 %v1465_v40, 16  ;;  %v6247_v40 = vld [vmem:[#allocation44_spill] sm:$0xff] }
 0x33a   :  { %v1411_v44 = vadd.s32 %v1410_v45, %v1408_v61  ;;  %v1397_v19 = vadd.s32 %v1396_v27, %v1394_v8  ;;  %3789 = vmatmul.mubr.msk.f32.gmra.mrb[14].mxu1 %vm2071_vm15, %v4100_v31  ;;  %v6244_v45 = vld [vmem:[#allocation41_spill] sm:$0xff]  ;;  %v1479_v61 = vcvt.f32.s32 %v6245_v16 }
 0x33b   :  { %v1435_v39 = vpop.xlane.xlu1 %1434  ;;  %v1493_v27 = vcvt.f32.s32 %v6244_v45 }
 0x33c   :  { %vm2072_vm0 = vcmp.eq.s32.totalorder %v6237_v51, %v1397_v19  ;;  %vm2073_vm1 = vcmp.eq.s32.totalorder %v6237_v51, %v1411_v44  ;;  %v1436_v55 = vcvt.f32.s32 %v1435_v39  ;;  %v1480_v11 = vshll.u32 %v1479_v61, 16 }
 0x33d   :  { %3791 = vmatprep.mubr.msk.f32.mxu1 %vm2072_vm0, %v4100_v31  ;;  %v1494_v44 = vshll.u32 %v1493_v27, 16 }
 0x33e   :  { %3792 = vmatmul.mubr.msk.f32.gmra.mrb[16].mxu1 %vm2073_vm1, %v4100_v31  ;;  %v1439_v43 = vadd.s32 %v1438_v18, %v1436_v55  ;;  %v6246_v18 = vld [vmem:[#allocation42_spill] sm:$0xff] }
 0x33f   :  { %v1421_v37 = vpop.xlane.xlu0 %1420 }
 0x340   :  { %v1422_v23 = vcvt.f32.s32 %v1421_v37  ;;  %vm2075_vm3 = vcmp.eq.s32.totalorder %v6237_v51, %v1439_v43  ;;  %v1507_v37 = vcvt.f32.s32 %v6246_v18  ;;  %v1549_v43 = vcvt.f32.s32 %v5497_v13 }
 0x342   :  { %v1425_v60 = vadd.s32 %v1424_v50, %v1422_v23  ;;  %v1522_v23 = vshll.u32 %v1521_v22, 16  ;;  %v1508_v29 = vshll.u32 %v1507_v37, 16 }
 0x343   :  { %v1463_v53 = vpop.xlane.xlu1 %1462 }
 0x344   :  { %vm2074_vm2 = vcmp.eq.s32.totalorder %v6237_v51, %v1425_v60  ;;  %v1464_v28 = vcvt.f32.s32 %v1463_v53  ;;  %v1535_v53 = vcvt.f32.s32 %v6247_v40 }
 0x345   :  { %3794 = vmatprep.mubr.msk.f32.mxu1 %vm2074_vm2, %v4100_v31 }
 0x346   :  { %3795 = vmatmul.mubr.msk.f32.gmra.mrb[18].mxu1 %vm2075_vm3, %v4100_v31  ;;  %v1467_v6 = vadd.s32 %v1466_v26, %v1464_v28  ;;  %v1550_v28 = vshll.u32 %v1549_v43, 16  ;;  %v1577_v26 = vcvt.f32.s32 %v5507_v10  ;;  %v1605_v10 = vcvt.f32.s32 %v5517_v15 }
 0x347   :  { %v1449_v25 = vpop.xlane.xlu0 %1448  ;;  %v1633_v15 = vcvt.f32.s32 %v5527_v3  ;;  %v1661_v3 = vcvt.f32.s32 %v5537_v47  ;;  %v1689_v47 = vcvt.f32.s32 %v5547_v59  ;;  %v1717_v59 = vcvt.f32.s32 %v5557_v46 }
 0x348   :  { %v1450_v54 = vcvt.f32.s32 %v1449_v25  ;;  %vm2077_vm5 = vcmp.eq.s32.totalorder %v6237_v51, %v1467_v6  ;;  %v1563_v25 = vcvt.f32.s32 %v5509_v33  ;;  %v1536_v6 = vshll.u32 %v1535_v53, 16  ;;  %v6248_v33 = vld [vmem:[#allocation46_spill] sm:$0xff] }
 0x349   :  { %v1591_v61 = vcvt.f32.s32 %v6248_v33  ;;  %v1634_v40 = vshll.u32 %v1633_v15, 16  ;;  %v1690_v33 = vshll.u32 %v1689_v47, 16  ;;  %v1718_v15 = vshll.u32 %v1717_v59, 16 }
 0x34a   :  { %v1453_v35 = vadd.s32 %v1452_v58, %v1450_v54  ;;  %v1564_v16 = vshll.u32 %v1563_v25, 16  ;;  %v1745_v46 = vcvt.f32.s32 %v5567_v24  ;;  %v1773_v24 = vcvt.f32.s32 %v5577_v41 }
 0x34b   :  { %v1491_v2 = vpop.xlane.xlu1 %1490  ;;  %v1592_v22 = vshll.u32 %v1591_v61, 16  ;;  %v1801_v41 = vcvt.f32.s32 %v5587_v38  ;;  %v1829_v38 = vcvt.f32.s32 %v5597_v1  ;;  %v1857_v1 = vcvt.f32.s32 %v5607_v0 }
 0x34c   :  { %vm2076_vm4 = vcmp.eq.s32.totalorder %v6237_v51, %v1453_v35  ;;  %v1492_v8 = vcvt.f32.s32 %v1491_v2  ;;  %v1578_v2 = vshll.u32 %v1577_v26, 16  ;;  %v1885_v0 = vcvt.f32.s32 %v5617_v52 }
 0x34d   :  { %3797 = vmatprep.mubr.msk.f32.mxu1 %vm2076_vm4, %v4100_v31  ;;  %v1913_v52 = vcvt.f32.s32 %v5627_v48  ;;  %v1941_v48 = vcvt.f32.s32 %v5637_v14  ;;  %v1969_v14 = vcvt.f32.s32 %v5647_v42  ;;  %v1997_v42 = vcvt.f32.s32 %v5657_v63 }
 0x34e   :  { %3798 = vmatmul.mubr.msk.f32.gmra.mrb[20].mxu1 %vm2077_vm5, %v4100_v31  ;;  %v1495_v39 = vadd.s32 %v1494_v44, %v1492_v8  ;;  %v2025_v63 = vcvt.f32.s32 %v5667_v49 }
 0x34f   :  { %v1477_v19 = vpop.xlane.xlu0 %1476 }
 0x350   :  { %v1478_v12 = vcvt.f32.s32 %v1477_v19  ;;  %vm2079_vm7 = vcmp.eq.s32.totalorder %v6237_v51, %v1495_v39 }
 0x352   :  { %v1481_v9 = vadd.s32 %v1480_v11, %v1478_v12 }
 0x353   :  { %v1519_v55 = vpop.xlane.xlu1 %1518 }
 0x354   :  { %vm2078_vm6 = vcmp.eq.s32.totalorder %v6237_v51, %v1481_v9  ;;  %v1520_v50 = vcvt.f32.s32 %v1519_v55  ;;  %v1606_v9 = vshll.u32 %v1605_v10, 16  ;;  %v6249_v55 = vld [vmem:[#allocation45_spill] sm:$0xff] }
 0x355   :  { %3800 = vmatprep.mubr.msk.f32.mxu1 %vm2078_vm6, %v4100_v31  ;;  %v1619_v18 = vcvt.f32.s32 %v6249_v55 }
 0x356   :  { %3801 = vmatmul.mubr.msk.f32.gmra.mrb[22].mxu1 %vm2079_vm7, %v4100_v31  ;;  %v1523_v20 = vadd.s32 %v1522_v23, %v1520_v50 }
 0x357   :  { %v1505_v60 = vpop.xlane.xlu0 %1504  ;;  %v1620_v53 = vshll.u32 %v1619_v18, 16  ;;  %v1731_v18 = vcvt.f32.s32 %v5569_v5 }
 0x358   :  { %v1506_v7 = vcvt.f32.s32 %v1505_v60  ;;  %vm2081_vm9 = vcmp.eq.s32.totalorder %v6237_v51, %v1523_v20 }
 0x35a   :  { %v1509_v57 = vadd.s32 %v1508_v29, %v1506_v7  ;;  %v1647_v7 = vcvt.f32.s32 %v5539_v17 }
 0x35b   :  { %v1547_v58 = vpop.xlane.xlu1 %1546  ;;  %v1533_v54 = vpop.xlane.xlu0 %1532 }
 0x35c   :  { %v1548_v35 = vcvt.f32.s32 %v1547_v58  ;;  %v1534_v45 = vcvt.f32.s32 %v1533_v54  ;;  %vm2080_vm8 = vcmp.eq.s32.totalorder %v6237_v51, %v1509_v57  ;;  %v1662_v54 = vshll.u32 %v1661_v3, 16  ;;  %v6252_v3 = vld [vmem:[#allocation49_spill] sm:$0xff] }
 0x35d   :  { %3803 = vmatprep.mubr.msk.f32.mxu1 %vm2080_vm8, %v4100_v31  ;;  %v1759_v5 = vcvt.f32.s32 %v6252_v3 }
 0x35e   :  { %v1551_v13 = vadd.s32 %v1550_v28, %v1548_v35  ;;  %v1537_v27 = vadd.s32 %v1536_v6, %v1534_v45  ;;  %3804 = vmatmul.mubr.msk.f32.gmra.mrb[24].mxu1 %vm2081_vm9, %v4100_v31  ;;  %v1648_v6 = vshll.u32 %v1647_v7, 16  ;;  %v6250_v35 = vld [vmem:[#allocation47_spill] sm:$0xff] }
 0x35f   :  { %v1575_v8 = vpop.xlane.xlu1 %1574  ;;  %v1561_v44 = vpop.xlane.xlu0 %1560  ;;  %v1675_v17 = vcvt.f32.s32 %v6250_v35 }
 0x360   :  { %v1576_v19 = vcvt.f32.s32 %v1575_v8  ;;  %v1562_v11 = vcvt.f32.s32 %v1561_v44  ;;  %vm2082_vm10 = vcmp.eq.s32.totalorder %v6237_v51, %v1537_v27  ;;  %vm2083_vm11 = vcmp.eq.s32.totalorder %v6237_v51, %v1551_v13  ;;  %v6251_v8 = vld [vmem:[#allocation22_spill] sm:$0xff] }
 0x361   :  { %3806 = vmatprep.mubr.msk.f32.mxu1 %vm2082_vm10, %v4100_v31  ;;  %v1676_v61 = vshll.u32 %v1675_v17, 16  ;;  %v1703_v44 = vcvt.f32.s32 %v6251_v8 }
 0x362   :  { %v1579_v12 = vadd.s32 %v1578_v2, %v1576_v19  ;;  %v1565_v39 = vadd.s32 %v1564_v16, %v1562_v11  ;;  %3807 = vmatmul.mubr.msk.f32.gmra.mrb[26].mxu1 %vm2083_vm11, %v4100_v31 }
 0x363   :  { %v1603_v37 = vpop.xlane.xlu1 %1602  ;;  %v1589_v50 = vpop.xlane.xlu0 %1588  ;;  %v1704_v55 = vshll.u32 %v1703_v44, 16 }
 0x364   :  { %v1604_v23 = vcvt.f32.s32 %v1603_v37  ;;  %v1590_v43 = vcvt.f32.s32 %v1589_v50  ;;  %vm2084_vm12 = vcmp.eq.s32.totalorder %v6237_v51, %v1565_v39  ;;  %vm2085_vm13 = vcmp.eq.s32.totalorder %v6237_v51, %v1579_v12 }
 0x365   :  { %3809 = vmatprep.mubr.msk.f32.mxu1 %vm2084_vm12, %v4100_v31 }
 0x366   :  { %v1607_v60 = vadd.s32 %v1606_v9, %v1604_v23  ;;  %v1593_v29 = vadd.s32 %v1592_v22, %v1590_v43  ;;  %3810 = vmatmul.mubr.msk.f32.gmra.mrb[28].mxu1 %vm2085_vm13, %v4100_v31 }
 0x367   :  { %v1631_v20 = vpop.xlane.xlu1 %1630  ;;  %v1617_v57 = vpop.xlane.xlu0 %1616 }
 0x368   :  { %v1632_v28 = vcvt.f32.s32 %v1631_v20  ;;  %v1618_v26 = vcvt.f32.s32 %v1617_v57  ;;  %vm2086_vm14 = vcmp.eq.s32.totalorder %v6237_v51, %v1593_v29  ;;  %vm2087_vm15 = vcmp.eq.s32.totalorder %v6237_v51, %v1607_v60 }
 0x369   :  { %3812 = vmatprep.mubr.msk.f32.mxu1 %vm2086_vm14, %v4100_v31 }
 0x36a   :  { %v1635_v25 = vadd.s32 %v1634_v40, %v1632_v28  ;;  %v1621_v58 = vadd.s32 %v1620_v53, %v1618_v26  ;;  %3813 = vmatmul.mubr.msk.f32.gmra.mrb[30].mxu1 %vm2087_vm15, %v4100_v31  ;;  %v1746_v40 = vshll.u32 %v1745_v46, 16  ;;  %v1732_v53 = vshll.u32 %v1731_v18, 16 }
 0x36b   :  { %v1659_v45 = vpop.xlane.xlu1 %1658  ;;  %v1645_v13 = vpop.xlane.xlu0 %1644  ;;  %v1858_v46 = vshll.u32 %v1857_v1, 16 }
 0x36c   :  { %v1660_v27 = vcvt.f32.s32 %v1659_v45  ;;  %v1646_v2 = vcvt.f32.s32 %v1645_v13  ;;  %vm2088_vm0 = vcmp.eq.s32.totalorder %v6237_v51, %v1621_v58  ;;  %vm2089_vm1 = vcmp.eq.s32.totalorder %v6237_v51, %v1635_v25 }
 0x36d   :  { %3815 = vmatprep.mubr.msk.f32.mxu1 %vm2088_vm0, %v4100_v31  ;;  %v1774_v58 = vshll.u32 %v1773_v24, 16 }
 0x36e   :  { %v1663_v16 = vadd.s32 %v1662_v54, %v1660_v27  ;;  %v1649_v10 = vadd.s32 %v1648_v6, %v1646_v2  ;;  %3816 = vmatmul.mubr.msk.f32.gmra.mrb[32].mxu1 %vm2089_vm1, %v4100_v31  ;;  %v1760_v54 = vshll.u32 %v1759_v5, 16  ;;  %v1787_v6 = vcvt.f32.s32 %v5589_v4 }
 0x36f   :  { %v1687_v19 = vpop.xlane.xlu1 %1686  ;;  %v1673_v11 = vpop.xlane.xlu0 %1672  ;;  %v1802_v2 = vshll.u32 %v1801_v41, 16  ;;  %v1815_v4 = vcvt.f32.s32 %v5599_v36  ;;  %v1843_v36 = vcvt.f32.s32 %v5609_v62  ;;  %v1871_v62 = vcvt.f32.s32 %v5619_v21 }
 0x370   :  { %v1688_v12 = vcvt.f32.s32 %v1687_v19  ;;  %v1674_v39 = vcvt.f32.s32 %v1673_v11  ;;  %vm2090_vm2 = vcmp.eq.s32.totalorder %v6237_v51, %v1649_v10  ;;  %vm2091_vm3 = vcmp.eq.s32.totalorder %v6237_v51, %v1663_v16 }
 0x371   :  { %3818 = vmatprep.mubr.msk.f32.mxu1 %vm2090_vm2, %v4100_v31  ;;  %v1788_v16 = vshll.u32 %v1787_v6, 16  ;;  %v1830_v19 = vshll.u32 %v1829_v38, 16  ;;  %v1816_v11 = vshll.u32 %v1815_v4, 16  ;;  %v1844_v18 = vshll.u32 %v1843_v36, 16  ;;  %v6253_v36 = vld [vmem:[#allocation48_spill] sm:$0xff] }
 0x372   :  { %v1691_v9 = vadd.s32 %v1690_v33, %v1688_v12  ;;  %v1677_v22 = vadd.s32 %v1676_v61, %v1674_v39  ;;  %3819 = vmatmul.mubr.msk.f32.gmra.mrb[34].mxu1 %vm2091_vm3, %v4100_v31  ;;  %v1899_v21 = vcvt.f32.s32 %v5629_v32  ;;  %v1927_v32 = vcvt.f32.s32 %v5639_v30 }
 0x373   :  { %v1715_v37 = vpop.xlane.xlu1 %1714  ;;  %v1701_v50 = vpop.xlane.xlu0 %1700  ;;  %v1955_v30 = vcvt.f32.s32 %v5649_v34  ;;  %v1970_v4 = vshll.u32 %v1969_v14, 16  ;;  %v1983_v34 = vcvt.f32.s32 %v5659_v56  ;;  %v2011_v56 = vcvt.f32.s32 %v6253_v36 }
 0x374   :  { %v1716_v23 = vcvt.f32.s32 %v1715_v37  ;;  %v1702_v43 = vcvt.f32.s32 %v1701_v50  ;;  %vm2092_vm4 = vcmp.eq.s32.totalorder %v6237_v51, %v1677_v22  ;;  %vm2093_vm5 = vcmp.eq.s32.totalorder %v6237_v51, %v1691_v9 }
 0x375   :  { %3821 = vmatprep.mubr.msk.f32.mxu1 %vm2092_vm4, %v4100_v31  ;;  %v1984_v1 = vshll.u32 %v1983_v34, 16 }
 0x376   :  { %v1719_v60 = vadd.s32 %v1718_v15, %v1716_v23  ;;  %v1705_v29 = vadd.s32 %v1704_v55, %v1702_v43  ;;  %3822 = vmatmul.mubr.msk.f32.gmra.mrb[36].mxu1 %vm2093_vm5, %v4100_v31 }
 0x377   :  { %v1743_v7 = vpop.xlane.xlu1 %1742  ;;  %v1729_v20 = vpop.xlane.xlu0 %1728 }
 0x378   :  { %v1744_v57 = vcvt.f32.s32 %v1743_v7  ;;  %v1730_v28 = vcvt.f32.s32 %v1729_v20  ;;  %vm2094_vm6 = vcmp.eq.s32.totalorder %v6237_v51, %v1705_v29  ;;  %vm2095_vm7 = vcmp.eq.s32.totalorder %v6237_v51, %v1719_v60 }
 0x379   :  { %3824 = vmatprep.mubr.msk.f32.mxu1 %vm2094_vm6, %v4100_v31 }
 0x37a   :  { %v1747_v26 = vadd.s32 %v1746_v40, %v1744_v57  ;;  %v1733_v25 = vadd.s32 %v1732_v53, %v1730_v28  ;;  %3825 = vmatmul.mubr.msk.f32.gmra.mrb[38].mxu1 %vm2095_vm7, %v4100_v31  ;;  %v1886_v40 = vshll.u32 %v1885_v0, 16  ;;  %v1872_v53 = vshll.u32 %v1871_v62, 16  ;;  %v6254_v0 = vld [vmem:[#allocation50_spill] sm:$0xff]  ;;  %v6255_v62 = vld [vmem:[#allocation25_spill] sm:$0xff] }
 0x37b   :  { %v1771_v47 = vpop.xlane.xlu1 %1770  ;;  %v1757_v35 = vpop.xlane.xlu0 %1756  ;;  %v1914_v28 = vshll.u32 %v1913_v52, 16  ;;  %v2053_v49 = vcvt.f32.s32 %v6254_v0 }
 0x37c   :  { %v1772_v17 = vcvt.f32.s32 %v1771_v47  ;;  %v1758_v45 = vcvt.f32.s32 %v1757_v35  ;;  %vm2096_vm8 = vcmp.eq.s32.totalorder %v6237_v51, %v1733_v25  ;;  %vm2097_vm9 = vcmp.eq.s32.totalorder %v6237_v51, %v1747_v26 }
 0x37d   :  { %3827 = vmatprep.mubr.msk.f32.mxu1 %vm2096_vm8, %v4100_v31  ;;  %v1900_v26 = vshll.u32 %v1899_v21, 16  ;;  %v1942_v35 = vshll.u32 %v1941_v48, 16 }
 0x37e   :  { %v1775_v13 = vadd.s32 %v1774_v58, %v1772_v17  ;;  %v1761_v27 = vadd.s32 %v1760_v54, %v1758_v45  ;;  %3828 = vmatmul.mubr.msk.f32.gmra.mrb[40].mxu1 %vm2097_vm9, %v4100_v31  ;;  %v1928_v17 = vshll.u32 %v1927_v32, 16  ;;  %v3937_v32 = vld [vmem:[#allocation2] sm:$0xff] }
 0x37f   :  { %v1799_v10 = vpop.xlane.xlu1 %1798  ;;  %v1785_v33 = vpop.xlane.xlu0 %1784 }
 0x380   :  { %v1800_v61 = vcvt.f32.s32 %v1799_v10  ;;  %v1786_v59 = vcvt.f32.s32 %v1785_v33  ;;  %vm2098_vm10 = vcmp.eq.s32.totalorder %v6237_v51, %v1761_v27  ;;  %vm2099_vm11 = vcmp.eq.s32.totalorder %v6237_v51, %v1775_v13 }
 0x381   :  { %3830 = vmatprep.mubr.msk.f32.mxu1 %vm2098_vm10, %v4100_v31  ;;  %v1956_v10 = vshll.u32 %v1955_v30, 16 }
 0x382   :  { %v1803_v8 = vadd.s32 %v1802_v2, %v1800_v61  ;;  %v1789_v44 = vadd.s32 %v1788_v16, %v1786_v59  ;;  %3831 = vmatmul.mubr.msk.f32.gmra.mrb[42].mxu1 %vm2099_vm11, %v4100_v31 }
 0x383   :  { %v1827_v12 = vpop.xlane.xlu1 %1826  ;;  %v1813_v39 = vpop.xlane.xlu0 %1812 }
 0x384   :  { %v1828_v9 = vcvt.f32.s32 %v1827_v12  ;;  %v1814_v22 = vcvt.f32.s32 %v1813_v39  ;;  %vm2100_vm12 = vcmp.eq.s32.totalorder %v6237_v51, %v1789_v44  ;;  %vm2101_vm13 = vcmp.eq.s32.totalorder %v6237_v51, %v1803_v8 }
 0x385   :  { %3833 = vmatprep.mubr.msk.f32.mxu1 %vm2100_vm12, %v4100_v31 }
 0x386   :  { %v1831_v15 = vadd.s32 %v1830_v19, %v1828_v9  ;;  %v1817_v55 = vadd.s32 %v1816_v11, %v1814_v22  ;;  %3834 = vmatmul.mubr.msk.f32.gmra.mrb[44].mxu1 %vm2101_vm13, %v4100_v31  ;;  %v1998_v11 = vshll.u32 %v1997_v42, 16 }
 0x387   :  { %v1855_v37 = vpop.xlane.xlu1 %1854  ;;  %v1841_v50 = vpop.xlane.xlu0 %1840 }
 0x388   :  { %v1856_v23 = vcvt.f32.s32 %v1855_v37  ;;  %v1842_v43 = vcvt.f32.s32 %v1841_v50  ;;  %vm2102_vm14 = vcmp.eq.s32.totalorder %v6237_v51, %v1817_v55  ;;  %vm2103_vm15 = vcmp.eq.s32.totalorder %v6237_v51, %v1831_v15 }
 0x389   :  { %3836 = vmatprep.mubr.msk.f32.mxu1 %vm2102_vm14, %v4100_v31  ;;  %v2039_v37 = vcvt.f32.s32 %v6255_v62 }
 0x38a   :  { %v1859_v60 = vadd.s32 %v1858_v46, %v1856_v23  ;;  %v1845_v29 = vadd.s32 %v1844_v18, %v1842_v43  ;;  %3837 = vmatmul.mubr.msk.f32.gmra.mrb[46].mxu1 %vm2103_vm15, %v4100_v31  ;;  %v2026_v46 = vshll.u32 %v2025_v63, 16  ;;  %v2012_v18 = vshll.u32 %v2011_v56, 16 }
 0x38b   :  { %v1883_v24 = vpop.xlane.xlu1 %1882  ;;  %v1869_v3 = vpop.xlane.xlu0 %1868  ;;  %v2040_v52 = vshll.u32 %v2039_v37, 16 }
 0x38c   :  { %v1884_v5 = vcvt.f32.s32 %v1883_v24  ;;  %v1870_v7 = vcvt.f32.s32 %v1869_v3  ;;  %vm2104_vm0 = vcmp.eq.s32.totalorder %v6237_v51, %v1845_v29  ;;  %vm2105_vm1 = vcmp.eq.s32.totalorder %v6237_v51, %v1859_v60 }
 0x38d   :  { %3839 = vmatprep.mubr.msk.f32.mxu1 %vm2104_vm0, %v4100_v31 }
 0x38e   :  { %v1887_v20 = vadd.s32 %v1886_v40, %v1884_v5  ;;  %v1873_v57 = vadd.s32 %v1872_v53, %v1870_v7  ;;  %3840 = vmatmul.mubr.msk.f32.gmra.mrb[48].mxu1 %vm2105_vm1, %v4100_v31  ;;  %v2054_v53 = vshll.u32 %v2053_v49, 16 }
 0x38f   :  { %v1911_v25 = vpop.xlane.xlu1 %1910  ;;  %v1897_v58 = vpop.xlane.xlu0 %1896 }
 0x390   :  { %v1912_v54 = vcvt.f32.s32 %v1911_v25  ;;  %v1898_v41 = vcvt.f32.s32 %v1897_v58  ;;  %vm2106_vm2 = vcmp.eq.s32.totalorder %v6237_v51, %v1873_v57  ;;  %vm2107_vm3 = vcmp.eq.s32.totalorder %v6237_v51, %v1887_v20 }
 0x391   :  { %3842 = vmatprep.mubr.msk.f32.mxu1 %vm2106_vm2, %v4100_v31 }
 0x392   :  { %v1915_v6 = vadd.s32 %v1914_v28, %v1912_v54  ;;  %v1901_v47 = vadd.s32 %v1900_v26, %v1898_v41  ;;  %3843 = vmatmul.mubr.msk.f32.gmra.mrb[50].mxu1 %vm2107_vm3, %v4100_v31  ;;  %v3936_v28 = vld [vmem:[#allocation2 + $0x8] sm:$0xff] }
 0x393   :  { %v1939_v45 = vpop.xlane.xlu1 %1938  ;;  %v1925_v13 = vpop.xlane.xlu0 %1924 }
 0x394   :  { %v1940_v27 = vcvt.f32.s32 %v1939_v45  ;;  %v1926_v2 = vcvt.f32.s32 %v1925_v13  ;;  %vm2108_vm4 = vcmp.eq.s32.totalorder %v6237_v51, %v1901_v47  ;;  %vm2109_vm5 = vcmp.eq.s32.totalorder %v6237_v51, %v1915_v6 }
 0x395   :  { %3845 = vmatprep.mubr.msk.f32.mxu1 %vm2108_vm4, %v4100_v31 }
 0x396   :  { %v1943_v16 = vadd.s32 %v1942_v35, %v1940_v27  ;;  %v1929_v38 = vadd.s32 %v1928_v17, %v1926_v2  ;;  %3846 = vmatmul.mubr.msk.f32.gmra.mrb[52].mxu1 %vm2109_vm5, %v4100_v31  ;;  %v3938_v35 = vld [vmem:[#allocation2 + $0x18] sm:$0xff]  ;;  %v3939_v17 = vld [vmem:[#allocation2 + $0x10] sm:$0xff]  ;;  %v3940_v2 = vld [vmem:[#allocation2 + $0x28] sm:$0xff] }
 0x397   :  { %v1967_v33 = vpop.xlane.xlu1 %1966  ;;  %v1953_v61 = vpop.xlane.xlu0 %1952 }
 0x398   :  { %v1968_v59 = vcvt.f32.s32 %v1967_v33  ;;  %v1954_v8 = vcvt.f32.s32 %v1953_v61  ;;  %vm2110_vm6 = vcmp.eq.s32.totalorder %v6237_v51, %v1929_v38  ;;  %vm2111_vm7 = vcmp.eq.s32.totalorder %v6237_v51, %v1943_v16  ;;  %v3941_v38 = vld [vmem:[#allocation2 + $0x20] sm:$0xff] }
 0x399   :  { %3848 = vmatprep.mubr.msk.f32.mxu1 %vm2110_vm6, %v4100_v31 }
 0x39a   :  { %v1971_v44 = vadd.s32 %v1970_v4, %v1968_v59  ;;  %v1957_v19 = vadd.s32 %v1956_v10, %v1954_v8  ;;  %3849 = vmatmul.mubr.msk.f32.gmra.mrb[54].mxu1 %vm2111_vm7, %v4100_v31  ;;  %v3942_v8 = vld [vmem:[#allocation2 + $0x38] sm:$0xff] }
 0x39b   :  { %v1995_v12 = vpop.xlane.xlu1 %1994  ;;  %v1981_v39 = vpop.xlane.xlu0 %1980 }
 0x39c   :  { %v1996_v9 = vcvt.f32.s32 %v1995_v12  ;;  %v1982_v22 = vcvt.f32.s32 %v1981_v39  ;;  %vm2112_vm8 = vcmp.eq.s32.totalorder %v6237_v51, %v1957_v19  ;;  %vm2113_vm9 = vcmp.eq.s32.totalorder %v6237_v51, %v1971_v44  ;;  %v3943_v19 = vld [vmem:[#allocation2 + $0x30] sm:$0xff] }
 0x39d   :  { %3851 = vmatprep.mubr.msk.f32.mxu1 %vm2112_vm8, %v4100_v31 }
 0x39e   :  { %v1999_v15 = vadd.s32 %v1998_v11, %v1996_v9  ;;  %v1985_v55 = vadd.s32 %v1984_v1, %v1982_v22  ;;  %3852 = vmatmul.mubr.msk.f32.gmra.mrb[56].mxu1 %vm2113_vm9, %v4100_v31  ;;  %v3944_v9 = vld [vmem:[#allocation2 + $0x48] sm:$0xff] }
 0x39f   :  { %v2023_v50 = vpop.xlane.xlu1 %2022  ;;  %v2009_v23 = vpop.xlane.xlu0 %2008 }
 0x3a0   :  { %v2024_v43 = vcvt.f32.s32 %v2023_v50  ;;  %v2010_v60 = vcvt.f32.s32 %v2009_v23  ;;  %vm2114_vm10 = vcmp.eq.s32.totalorder %v6237_v51, %v1985_v55  ;;  %vm2115_vm11 = vcmp.eq.s32.totalorder %v6237_v51, %v1999_v15  ;;  %v3945_v15 = vld [vmem:[#allocation2 + $0x40] sm:$0xff]  ;;  %v3946_v50 = vld [vmem:[#allocation2 + $0x58] sm:$0xff] }
 0x3a1   :  { %3854 = vmatprep.mubr.msk.f32.mxu1 %vm2114_vm10, %v4100_v31 }
 0x3a2   :  { %v2027_v29 = vadd.s32 %v2026_v46, %v2024_v43  ;;  %v2013_v40 = vadd.s32 %v2012_v18, %v2010_v60  ;;  %3855 = vmatmul.mubr.msk.f32.gmra.mrb[58].mxu1 %vm2115_vm11, %v4100_v31  ;;  %v3947_v43 = vld [vmem:[#allocation2 + $0x50] sm:$0xff] }
 0x3a3   :  { %v2051_v21 = vpop.xlane.xlu1 %2050  ;;  %v2037_v24 = vpop.xlane.xlu0 %2036 }
 0x3a4   :  { %v2052_v3 = vcvt.f32.s32 %v2051_v21  ;;  %v2038_v5 = vcvt.f32.s32 %v2037_v24  ;;  %vm2116_vm12 = vcmp.eq.s32.totalorder %v6237_v51, %v2013_v40  ;;  %vm2117_vm13 = vcmp.eq.s32.totalorder %v6237_v51, %v2027_v29 }
 0x3a5   :  { %3857 = vmatprep.mubr.msk.f32.mxu1 %vm2116_vm12, %v4100_v31 }
 0x3a6   :  { %v2055_v7 = vadd.s32 %v2054_v53, %v2052_v3  ;;  %v2041_v20 = vadd.s32 %v2040_v52, %v2038_v5  ;;  %3858 = vmatmul.mubr.msk.f32.gmra.mrb[60].mxu1 %vm2117_vm13, %v4100_v31  ;;  %v3948_v3 = vld [vmem:[#allocation2 + $0x68] sm:$0xff] }
 0x3a8   :  { %vm2118_vm14 = vcmp.eq.s32.totalorder %v6237_v51, %v2041_v20  ;;  %vm2119_vm15 = vcmp.eq.s32.totalorder %v6237_v51, %v2055_v7  ;;  %v3949_v7 = vld [vmem:[#allocation2 + $0x60] sm:$0xff] }
 0x3a9   :  { %3860 = vmatprep.mubr.msk.f32.mxu1 %vm2118_vm14, %v4100_v31 }
 0x3aa   :  { %3861 = vmatmul.mubr.msk.f32.gmra.mrb[62].mxu1 %vm2119_vm15, %v4100_v31 }
 0x3f1   :  { %v3769_v57 = vpop.f32.mrb[0].mxu1 }
 0x3f2   :  { %2634 = vst [vmem:[#allocation7 + $0x8] sm:$0xff] %v3769_v57  ;;  %v2698_v26 = vsub.f32 %v3769_v57, %v3936_v28  ;;  %v2314_v48 = vpop.f32.mrb[1].mxu1 }
 0x3f3   :  { %2633 = vst [vmem:[#allocation7] sm:$0xff] %v2314_v48  ;;  %v2697_v25 = vsub.f32 %v2314_v48, %v3937_v32 }
 0x3f4   :  { %v3085_v58 = vmul.f32 %v2698_v26, %v2698_v26 }
 0x3f5   :  { %v3084_v54 = vmul.f32 %v2697_v25, %v2697_v25  ;;  %v3772_v41 = vpop.f32.mrb[2].mxu1 }
 0x3f6   :  { %2636 = vst [vmem:[#allocation7 + $0x18] sm:$0xff] %v3772_v41  ;;  %v2324_v6 = vpop.f32.mrb[3].mxu1  ;;  %v2700_v51 = vsub.f32 %v3772_v41, %v3938_v35  ;;  %v3951_v41 = vld [vmem:[#allocation2 + $0x70] sm:$0xff] }
 0x3f7   :  { %v3212_v47 = vadd.f32 %v3085_v58, %v3084_v54  ;;  %2635 = vst [vmem:[#allocation7 + $0x10] sm:$0xff] %v2324_v6  ;;  %v2699_v14 = vsub.f32 %v2324_v6, %v3939_v17  ;;  %v3950_v58 = vld [vmem:[#allocation2 + $0x78] sm:$0xff] }
 0x3f8   :  { %v3087_v13 = vmul.f32 %v2700_v51, %v2700_v51 }
 0x3f9   :  { %v3086_v31 = vmul.f32 %v2699_v14, %v2699_v14  ;;  %v3775_v30 = vpop.f32.mrb[4].mxu1 }
 0x3fa   :  { %2638 = vst [vmem:[#allocation7 + $0x28] sm:$0xff] %v3775_v30  ;;  %v2334_v45 = vpop.f32.mrb[5].mxu1  ;;  %v2702_v16 = vsub.f32 %v3775_v30, %v3940_v2  ;;  %v3952_v30 = vld [vmem:[#allocation2 + $0x88] sm:$0xff] }
 0x3fb   :  { %v3213_v27 = vadd.f32 %v3212_v47, %v3086_v31  ;;  %2637 = vst [vmem:[#allocation7 + $0x20] sm:$0xff] %v2334_v45  ;;  %v2701_v4 = vsub.f32 %v2334_v45, %v3941_v38 }
 0x3fc   :  { %v3089_v61 = vmul.f32 %v2702_v16, %v2702_v16 }
 0x3fd   :  { %v3214_v10 = vadd.f32 %v3213_v27, %v3087_v13  ;;  %v3088_v42 = vmul.f32 %v2701_v4, %v2701_v4  ;;  %v3778_v34 = vpop.f32.mrb[6].mxu1  ;;  %v3953_v13 = vld [vmem:[#allocation2 + $0x80] sm:$0xff] }
 0x3fe   :  { %2640 = vst [vmem:[#allocation7 + $0x38] sm:$0xff] %v3778_v34  ;;  %v2344_v33 = vpop.f32.mrb[7].mxu1  ;;  %v2704_v44 = vsub.f32 %v3778_v34, %v3942_v8 }
 0x3ff   :  { %v3215_v59 = vadd.f32 %v3214_v10, %v3088_v42  ;;  %2639 = vst [vmem:[#allocation7 + $0x30] sm:$0xff] %v2344_v33  ;;  %v2703_v11 = vsub.f32 %v2344_v33, %v3943_v19  ;;  %v3954_v33 = vld [vmem:[#allocation2 + $0x98] sm:$0xff] }
 0x400   :  { %v3091_v12 = vmul.f32 %v2704_v44, %v2704_v44 }
 0x401   :  { %v3090_v1 = vmul.f32 %v2703_v11, %v2703_v11  ;;  %v3216_v63 = vadd.f32 %v3215_v59, %v3089_v61  ;;  %v3781_v36 = vpop.f32.mrb[8].mxu1  ;;  %v3955_v59 = vld [vmem:[#allocation2 + $0x90] sm:$0xff] }
 0x402   :  { %2642 = vst [vmem:[#allocation7 + $0x48] sm:$0xff] %v3781_v36  ;;  %v2354_v56 = vpop.f32.mrb[9].mxu1  ;;  %v2706_v22 = vsub.f32 %v3781_v36, %v3944_v9 }
 0x403   :  { %v3217_v39 = vadd.f32 %v3216_v63, %v3090_v1  ;;  %2641 = vst [vmem:[#allocation7 + $0x40] sm:$0xff] %v2354_v56  ;;  %v2705_v55 = vsub.f32 %v2354_v56, %v3945_v15  ;;  %v3956_v56 = vld [vmem:[#allocation2 + $0xa8] sm:$0xff] }
 0x404   :  { %v3093_v62 = vmul.f32 %v2706_v22, %v2706_v22 }
 0x405   :  { %v3092_v46 = vmul.f32 %v2705_v55, %v2705_v55  ;;  %v3218_v18 = vadd.f32 %v3217_v39, %v3091_v12  ;;  %v3784_v0 = vpop.f32.mrb[10].mxu1  ;;  %v3957_v39 = vld [vmem:[#allocation2 + $0xa0] sm:$0xff] }
 0x406   :  { %2644 = vst [vmem:[#allocation7 + $0x58] sm:$0xff] %v3784_v0  ;;  %v2364_v49 = vpop.f32.mrb[11].mxu1  ;;  %v2708_v23 = vsub.f32 %v3784_v0, %v3946_v50 }
 0x407   :  { %v3219_v37 = vadd.f32 %v3218_v18, %v3092_v46  ;;  %2643 = vst [vmem:[#allocation7 + $0x50] sm:$0xff] %v2364_v49  ;;  %v2707_v60 = vsub.f32 %v2364_v49, %v3947_v43  ;;  %v3958_v49 = vld [vmem:[#allocation2 + $0xb8] sm:$0xff] }
 0x408   :  { %v3095_v21 = vmul.f32 %v2708_v23, %v2708_v23 }
 0x409   :  { %v3094_v29 = vmul.f32 %v2707_v60, %v2707_v60  ;;  %v3220_v40 = vadd.f32 %v3219_v37, %v3093_v62  ;;  %v3787_v53 = vpop.f32.mrb[12].mxu1  ;;  %v3959_v37 = vld [vmem:[#allocation2 + $0xb0] sm:$0xff] }
 0x40a   :  { %2646 = vst [vmem:[#allocation7 + $0x68] sm:$0xff] %v3787_v53  ;;  %v2374_v52 = vpop.f32.mrb[13].mxu1  ;;  %v2710_v5 = vsub.f32 %v3787_v53, %v3948_v3 }
 0x40b   :  { %v3221_v24 = vadd.f32 %v3220_v40, %v3094_v29  ;;  %2645 = vst [vmem:[#allocation7 + $0x60] sm:$0xff] %v2374_v52  ;;  %v2709_v20 = vsub.f32 %v2374_v52, %v3949_v7  ;;  %v3960_v52 = vld [vmem:[#allocation2 + $0xc8] sm:$0xff] }
 0x40c   :  { %v3097_v32 = vmul.f32 %v2710_v5, %v2710_v5 }
 0x40d   :  { %v3096_v57 = vmul.f32 %v2709_v20, %v2709_v20  ;;  %v3222_v28 = vadd.f32 %v3221_v24, %v3095_v21  ;;  %v3790_v26 = vpop.f32.mrb[14].mxu1  ;;  %v3961_v24 = vld [vmem:[#allocation2 + $0xc0] sm:$0xff] }
 0x40e   :  { %2648 = vst [vmem:[#allocation7 + $0x78] sm:$0xff] %v3790_v26  ;;  %v2384_v48 = vpop.f32.mrb[15].mxu1  ;;  %v2712_v54 = vsub.f32 %v3790_v26, %v3950_v58  ;;  %v3962_v26 = vld [vmem:[#allocation2 + $0xd8] sm:$0xff] }
 0x40f   :  { %v3223_v25 = vadd.f32 %v3222_v28, %v3096_v57  ;;  %2647 = vst [vmem:[#allocation7 + $0x70] sm:$0xff] %v2384_v48  ;;  %v2711_v6 = vsub.f32 %v2384_v48, %v3951_v41 }
 0x410   :  { %v3099_v14 = vmul.f32 %v2712_v54, %v2712_v54 }
 0x411   :  { %v3098_v47 = vmul.f32 %v2711_v6, %v2711_v6  ;;  %v3224_v35 = vadd.f32 %v3223_v25, %v3097_v32  ;;  %v3793_v51 = vpop.f32.mrb[16].mxu1  ;;  %v3963_v32 = vld [vmem:[#allocation2 + $0xd0] sm:$0xff] }
 0x412   :  { %2650 = vst [vmem:[#allocation7 + $0x88] sm:$0xff] %v3793_v51  ;;  %v2394_v17 = vpop.f32.mrb[17].mxu1  ;;  %v2714_v45 = vsub.f32 %v3793_v51, %v3952_v30  ;;  %v3964_v51 = vld [vmem:[#allocation2 + $0xe8] sm:$0xff] }
 0x413   :  { %v3225_v31 = vadd.f32 %v3224_v35, %v3098_v47  ;;  %2649 = vst [vmem:[#allocation7 + $0x80] sm:$0xff] %v2394_v17  ;;  %v2713_v27 = vsub.f32 %v2394_v17, %v3953_v13 }
 0x414   :  { %v3101_v38 = vmul.f32 %v2714_v45, %v2714_v45 }
 0x415   :  { %v3100_v2 = vmul.f32 %v2713_v27, %v2713_v27  ;;  %v3226_v16 = vadd.f32 %v3225_v31, %v3099_v14  ;;  %v3965_v14 = vld [vmem:[#allocation2 + $0xe0] sm:$0xff] }
 0x417   :  { %v3227_v4 = vadd.f32 %v3226_v16, %v3100_v2 }
 0x419   :  { %v3796_v10 = vpop.f32.mrb[18].mxu1  ;;  %v3228_v42 = vadd.f32 %v3227_v4, %v3101_v38  ;;  %v3966_v38 = vld [vmem:[#allocation2 + $0xf8] sm:$0xff] }
 0x41a   :  { %2652 = vst [vmem:[#allocation7 + $0x98] sm:$0xff] %v3796_v10  ;;  %v2404_v34 = vpop.f32.mrb[19].mxu1  ;;  %v2716_v61 = vsub.f32 %v3796_v10, %v3954_v33  ;;  %v3967_v10 = vld [vmem:[#allocation2 + $0xf0] sm:$0xff] }
 0x41b   :  { %2651 = vst [vmem:[#allocation7 + $0x90] sm:$0xff] %v2404_v34  ;;  %v2715_v8 = vsub.f32 %v2404_v34, %v3955_v59 }
 0x41c   :  { %v3103_v19 = vmul.f32 %v2716_v61, %v2716_v61 }
 0x41d   :  { %v3102_v44 = vmul.f32 %v2715_v8, %v2715_v8 }
 0x41f   :  { %v3229_v11 = vadd.f32 %v3228_v42, %v3102_v44 }
 0x421   :  { %v3799_v1 = vpop.f32.mrb[20].mxu1  ;;  %v3230_v63 = vadd.f32 %v3229_v11, %v3103_v19  ;;  %v3968_v19 = vld [vmem:[#allocation2 + $0x108] sm:$0xff] }
 0x422   :  { %2654 = vst [vmem:[#allocation7 + $0xa8] sm:$0xff] %v3799_v1  ;;  %v2414_v36 = vpop.f32.mrb[21].mxu1  ;;  %v2718_v12 = vsub.f32 %v3799_v1, %v3956_v56  ;;  %v3969_v1 = vld [vmem:[#allocation2 + $0x100] sm:$0xff] }
 0x423   :  { %2653 = vst [vmem:[#allocation7 + $0xa0] sm:$0xff] %v2414_v36  ;;  %v2717_v9 = vsub.f32 %v2414_v36, %v3957_v39 }
 0x424   :  { %v3105_v15 = vmul.f32 %v2718_v12, %v2718_v12 }
 0x425   :  { %v3104_v22 = vmul.f32 %v2717_v9, %v2717_v9 }
 0x427   :  { %v3231_v55 = vadd.f32 %v3230_v63, %v3104_v22 }
 0x429   :  { %v3802_v46 = vpop.f32.mrb[22].mxu1  ;;  %v3232_v18 = vadd.f32 %v3231_v55, %v3105_v15  ;;  %v3970_v15 = vld [vmem:[#allocation2 + $0x118] sm:$0xff] }
 0x42a   :  { %2656 = vst [vmem:[#allocation7 + $0xb8] sm:$0xff] %v3802_v46  ;;  %v2424_v0 = vpop.f32.mrb[23].mxu1  ;;  %v2720_v62 = vsub.f32 %v3802_v46, %v3958_v49  ;;  %v3971_v46 = vld [vmem:[#allocation2 + $0x110] sm:$0xff] }
 0x42b   :  { %2655 = vst [vmem:[#allocation7 + $0xb0] sm:$0xff] %v2424_v0  ;;  %v2719_v50 = vsub.f32 %v2424_v0, %v3959_v37 }
 0x42c   :  { %v3107_v43 = vmul.f32 %v2720_v62, %v2720_v62 }
 0x42d   :  { %v3106_v23 = vmul.f32 %v2719_v50, %v2719_v50 }
 0x42f   :  { %v3233_v60 = vadd.f32 %v3232_v18, %v3106_v23 }
 0x431   :  { %v3805_v29 = vpop.f32.mrb[24].mxu1  ;;  %v3234_v40 = vadd.f32 %v3233_v60, %v3107_v43  ;;  %v3972_v43 = vld [vmem:[#allocation2 + $0x128] sm:$0xff] }
 0x432   :  { %2658 = vst [vmem:[#allocation7 + $0xc8] sm:$0xff] %v3805_v29  ;;  %v2434_v53 = vpop.f32.mrb[25].mxu1  ;;  %v2722_v21 = vsub.f32 %v3805_v29, %v3960_v52  ;;  %v3973_v29 = vld [vmem:[#allocation2 + $0x120] sm:$0xff] }
 0x433   :  { %2657 = vst [vmem:[#allocation7 + $0xc0] sm:$0xff] %v2434_v53  ;;  %v2721_v3 = vsub.f32 %v2434_v53, %v3961_v24 }
 0x434   :  { %v3109_v57 = vmul.f32 %v2722_v21, %v2722_v21 }
 0x435   :  { %v3108_v5 = vmul.f32 %v2721_v3, %v2721_v3  ;;  %v3808_v7 = vpop.f32.mrb[26].mxu1 }
 0x436   :  { %2660 = vst [vmem:[#allocation7 + $0xd8] sm:$0xff] %v3808_v7  ;;  %v2444_v20 = vpop.f32.mrb[27].mxu1  ;;  %v2724_v48 = vsub.f32 %v3808_v7, %v3962_v26  ;;  %v3974_v7 = vld [vmem:[#allocation2 + $0x138] sm:$0xff] }
 0x437   :  { %v3235_v28 = vadd.f32 %v3234_v40, %v3108_v5  ;;  %2659 = vst [vmem:[#allocation7 + $0xd0] sm:$0xff] %v2444_v20  ;;  %v2723_v25 = vsub.f32 %v2444_v20, %v3963_v32 }
 0x438   :  { %v3111_v47 = vmul.f32 %v2724_v48, %v2724_v48 }
 0x439   :  { %v3110_v58 = vmul.f32 %v2723_v25, %v2723_v25  ;;  %v3236_v54 = vadd.f32 %v3235_v28, %v3109_v57  ;;  %v3811_v41 = vpop.f32.mrb[28].mxu1  ;;  %v3975_v57 = vld [vmem:[#allocation2 + $0x130] sm:$0xff] }
 0x43a   :  { %2662 = vst [vmem:[#allocation7 + $0xe8] sm:$0xff] %v3811_v41  ;;  %v2454_v6 = vpop.f32.mrb[29].mxu1  ;;  %v2726_v17 = vsub.f32 %v3811_v41, %v3964_v51  ;;  %v3976_v41 = vld [vmem:[#allocation2 + $0x148] sm:$0xff] }
 0x43b   :  { %v3237_v35 = vadd.f32 %v3236_v54, %v3110_v58  ;;  %2661 = vst [vmem:[#allocation7 + $0xe0] sm:$0xff] %v2454_v6  ;;  %v2725_v31 = vsub.f32 %v2454_v6, %v3965_v14 }
 0x43c   :  { %v3113_v2 = vmul.f32 %v2726_v17, %v2726_v17 }
 0x43d   :  { %v3112_v30 = vmul.f32 %v2725_v31, %v2725_v31  ;;  %v3238_v45 = vadd.f32 %v3237_v35, %v3111_v47  ;;  %v3814_v13 = vpop.f32.mrb[30].mxu1  ;;  %v3977_v47 = vld [vmem:[#allocation2 + $0x140] sm:$0xff] }
 0x43e   :  { %2664 = vst [vmem:[#allocation7 + $0xf8] sm:$0xff] %v3814_v13  ;;  %v2464_v27 = vpop.f32.mrb[31].mxu1  ;;  %v2728_v4 = vsub.f32 %v3814_v13, %v3966_v38  ;;  %v3978_v13 = vld [vmem:[#allocation2 + $0x158] sm:$0xff] }
 0x43f   :  { %v3239_v16 = vadd.f32 %v3238_v45, %v3112_v30  ;;  %2663 = vst [vmem:[#allocation7 + $0xf0] sm:$0xff] %v2464_v27  ;;  %v2727_v42 = vsub.f32 %v2464_v27, %v3967_v10 }
 0x440   :  { %v3115_v8 = vmul.f32 %v2728_v4, %v2728_v4 }
 0x441   :  { %v3114_v34 = vmul.f32 %v2727_v42, %v2727_v42  ;;  %v3240_v33 = vadd.f32 %v3239_v16, %v3113_v2  ;;  %v3817_v61 = vpop.f32.mrb[32].mxu1  ;;  %v3979_v2 = vld [vmem:[#allocation2 + $0x150] sm:$0xff] }
 0x442   :  { %2666 = vst [vmem:[#allocation7 + $0x108] sm:$0xff] %v3817_v61  ;;  %v2474_v59 = vpop.f32.mrb[33].mxu1  ;;  %v2730_v11 = vsub.f32 %v3817_v61, %v3968_v19  ;;  %v3980_v61 = vld [vmem:[#allocation2 + $0x168] sm:$0xff] }
 0x443   :  { %v3241_v44 = vadd.f32 %v3240_v33, %v3114_v34  ;;  %2665 = vst [vmem:[#allocation7 + $0x100] sm:$0xff] %v2474_v59  ;;  %v2729_v63 = vsub.f32 %v2474_v59, %v3969_v1 }
 0x444   :  { %v3117_v9 = vmul.f32 %v2730_v11, %v2730_v11 }
 0x445   :  { %v3116_v36 = vmul.f32 %v2729_v63, %v2729_v63  ;;  %v3242_v56 = vadd.f32 %v3241_v44, %v3115_v8  ;;  %v3820_v12 = vpop.f32.mrb[34].mxu1  ;;  %v3981_v8 = vld [vmem:[#allocation2 + $0x160] sm:$0xff] }
 0x446   :  { %2668 = vst [vmem:[#allocation7 + $0x118] sm:$0xff] %v3820_v12  ;;  %v2484_v39 = vpop.f32.mrb[35].mxu1  ;;  %v2732_v55 = vsub.f32 %v3820_v12, %v3970_v15  ;;  %v3982_v12 = vld [vmem:[#allocation2 + $0x178] sm:$0xff] }
 0x447   :  { %v3243_v22 = vadd.f32 %v3242_v56, %v3116_v36  ;;  %2667 = vst [vmem:[#allocation7 + $0x110] sm:$0xff] %v2484_v39  ;;  %v2731_v18 = vsub.f32 %v2484_v39, %v3971_v46 }
 0x448   :  { %v3119_v50 = vmul.f32 %v2732_v55, %v2732_v55 }
 0x449   :  { %v3118_v0 = vmul.f32 %v2731_v18, %v2731_v18  ;;  %v3244_v49 = vadd.f32 %v3243_v22, %v3117_v9  ;;  %v3823_v62 = vpop.f32.mrb[36].mxu1  ;;  %v3983_v9 = vld [vmem:[#allocation2 + $0x170] sm:$0xff] }
 0x44a   :  { %2670 = vst [vmem:[#allocation7 + $0x128] sm:$0xff] %v3823_v62  ;;  %v2494_v37 = vpop.f32.mrb[37].mxu1  ;;  %v2734_v60 = vsub.f32 %v3823_v62, %v3972_v43  ;;  %v3984_v62 = vld [vmem:[#allocation2 + $0x188] sm:$0xff] }
 0x44b   :  { %v3245_v23 = vadd.f32 %v3244_v49, %v3118_v0  ;;  %2669 = vst [vmem:[#allocation7 + $0x120] sm:$0xff] %v2494_v37  ;;  %v2733_v40 = vsub.f32 %v2494_v37, %v3973_v29 }
 0x44c   :  { %v3121_v3 = vmul.f32 %v2734_v60, %v2734_v60 }
 0x44d   :  { %v3120_v53 = vmul.f32 %v2733_v40, %v2733_v40  ;;  %v3246_v52 = vadd.f32 %v3245_v23, %v3119_v50  ;;  %v3826_v21 = vpop.f32.mrb[38].mxu1  ;;  %v3985_v50 = vld [vmem:[#allocation2 + $0x180] sm:$0xff] }
 0x44e   :  { %2672 = vst [vmem:[#allocation7 + $0x138] sm:$0xff] %v3826_v21  ;;  %v2504_v24 = vpop.f32.mrb[39].mxu1  ;;  %v2736_v20 = vsub.f32 %v3826_v21, %v3974_v7  ;;  %v3986_v21 = vld [vmem:[#allocation2 + $0x198] sm:$0xff] }
 0x44f   :  { %v3247_v5 = vadd.f32 %v3246_v52, %v3120_v53  ;;  %2671 = vst [vmem:[#allocation7 + $0x130] sm:$0xff] %v2504_v24  ;;  %v2735_v28 = vsub.f32 %v2504_v24, %v3975_v57 }
 0x450   :  { %v3123_v58 = vmul.f32 %v2736_v20, %v2736_v20 }
 0x451   :  { %v3122_v26 = vmul.f32 %v2735_v28, %v2735_v28  ;;  %v3248_v48 = vadd.f32 %v3247_v5, %v3121_v3  ;;  %v3829_v32 = vpop.f32.mrb[40].mxu1  ;;  %v3987_v3 = vld [vmem:[#allocation2 + $0x190] sm:$0xff] }
 0x452   :  { %2674 = vst [vmem:[#allocation7 + $0x148] sm:$0xff] %v3829_v32  ;;  %v2514_v25 = vpop.f32.mrb[41].mxu1  ;;  %v2738_v6 = vsub.f32 %v3829_v32, %v3976_v41  ;;  %v3988_v32 = vld [vmem:[#allocation2 + $0x1a8] sm:$0xff] }
 0x453   :  { %v3249_v54 = vadd.f32 %v3248_v48, %v3122_v26  ;;  %2673 = vst [vmem:[#allocation7 + $0x140] sm:$0xff] %v2514_v25  ;;  %v2737_v35 = vsub.f32 %v2514_v25, %v3977_v47 }
 0x454   :  { %v3125_v30 = vmul.f32 %v2738_v6, %v2738_v6 }
 0x455   :  { %v3124_v51 = vmul.f32 %v2737_v35, %v2737_v35  ;;  %v3250_v17 = vadd.f32 %v3249_v54, %v3123_v58  ;;  %v3832_v14 = vpop.f32.mrb[42].mxu1  ;;  %v3989_v58 = vld [vmem:[#allocation2 + $0x1a0] sm:$0xff] }
 0x456   :  { %2676 = vst [vmem:[#allocation7 + $0x158] sm:$0xff] %v3832_v14  ;;  %v2524_v31 = vpop.f32.mrb[43].mxu1  ;;  %v2740_v27 = vsub.f32 %v3832_v14, %v3978_v13  ;;  %v3990_v14 = vld [vmem:[#allocation2 + $0x1b8] sm:$0xff] }
 0x457   :  { %v3251_v45 = vadd.f32 %v3250_v17, %v3124_v51  ;;  %2675 = vst [vmem:[#allocation7 + $0x150] sm:$0xff] %v2524_v31  ;;  %v2739_v16 = vsub.f32 %v2524_v31, %v3979_v2 }
 0x458   :  { %v3127_v34 = vmul.f32 %v2740_v27, %v2740_v27 }
 0x459   :  { %v3126_v38 = vmul.f32 %v2739_v16, %v2739_v16  ;;  %v3252_v4 = vadd.f32 %v3251_v45, %v3125_v30  ;;  %v3835_v10 = vpop.f32.mrb[44].mxu1  ;;  %v3991_v30 = vld [vmem:[#allocation2 + $0x1b0] sm:$0xff] }
 0x45a   :  { %2678 = vst [vmem:[#allocation7 + $0x168] sm:$0xff] %v3835_v10  ;;  %v2534_v42 = vpop.f32.mrb[45].mxu1  ;;  %v2742_v59 = vsub.f32 %v3835_v10, %v3980_v61  ;;  %v3992_v10 = vld [vmem:[#allocation2 + $0x1c8] sm:$0xff] }
 0x45b   :  { %v3253_v33 = vadd.f32 %v3252_v4, %v3126_v38  ;;  %2677 = vst [vmem:[#allocation7 + $0x160] sm:$0xff] %v2534_v42  ;;  %v2741_v44 = vsub.f32 %v2534_v42, %v3981_v8 }
 0x45c   :  { %v3129_v36 = vmul.f32 %v2742_v59, %v2742_v59 }
 0x45d   :  { %v3128_v19 = vmul.f32 %v2741_v44, %v2741_v44  ;;  %v3254_v11 = vadd.f32 %v3253_v33, %v3127_v34  ;;  %v3838_v1 = vpop.f32.mrb[46].mxu1  ;;  %v3993_v34 = vld [vmem:[#allocation2 + $0x1c0] sm:$0xff] }
 0x45e   :  { %2680 = vst [vmem:[#allocation7 + $0x178] sm:$0xff] %v3838_v1  ;;  %v2544_v63 = vpop.f32.mrb[47].mxu1  ;;  %v2744_v39 = vsub.f32 %v3838_v1, %v3982_v12  ;;  %v3994_v1 = vld [vmem:[#allocation2 + $0x1d8] sm:$0xff] }
 0x45f   :  { %v3255_v56 = vadd.f32 %v3254_v11, %v3128_v19  ;;  %2679 = vst [vmem:[#allocation7 + $0x170] sm:$0xff] %v2544_v63  ;;  %v2743_v22 = vsub.f32 %v2544_v63, %v3983_v9 }
 0x460   :  { %v3131_v0 = vmul.f32 %v2744_v39, %v2744_v39 }
 0x461   :  { %v3130_v15 = vmul.f32 %v2743_v22, %v2743_v22  ;;  %v3256_v55 = vadd.f32 %v3255_v56, %v3129_v36  ;;  %v3841_v46 = vpop.f32.mrb[48].mxu1  ;;  %v3995_v36 = vld [vmem:[#allocation2 + $0x1d0] sm:$0xff] }
 0x462   :  { %2682 = vst [vmem:[#allocation7 + $0x188] sm:$0xff] %v3841_v46  ;;  %v2554_v18 = vpop.f32.mrb[49].mxu1  ;;  %v2746_v37 = vsub.f32 %v3841_v46, %v3984_v62  ;;  %v3996_v46 = vld [vmem:[#allocation2 + $0x1e8] sm:$0xff] }
 0x463   :  { %v3257_v49 = vadd.f32 %v3256_v55, %v3130_v15  ;;  %2681 = vst [vmem:[#allocation7 + $0x180] sm:$0xff] %v2554_v18  ;;  %v2745_v23 = vsub.f32 %v2554_v18, %v3985_v50 }
 0x464   :  { %v3133_v53 = vmul.f32 %v2746_v37, %v2746_v37 }
 0x465   :  { %v3132_v43 = vmul.f32 %v2745_v23, %v2745_v23  ;;  %v3258_v60 = vadd.f32 %v3257_v49, %v3131_v0  ;;  %v3844_v29 = vpop.f32.mrb[50].mxu1  ;;  %v3997_v0 = vld [vmem:[#allocation2 + $0x1e0] sm:$0xff] }
 0x466   :  { %2684 = vst [vmem:[#allocation7 + $0x198] sm:$0xff] %v3844_v29  ;;  %v2564_v40 = vpop.f32.mrb[51].mxu1  ;;  %v2748_v24 = vsub.f32 %v3844_v29, %v3986_v21  ;;  %v3998_v29 = vld [vmem:[#allocation2 + $0x1f8] sm:$0xff] }
 0x467   :  { %v3259_v52 = vadd.f32 %v3258_v60, %v3132_v43  ;;  %2683 = vst [vmem:[#allocation7 + $0x190] sm:$0xff] %v2564_v40  ;;  %v2747_v5 = vsub.f32 %v2564_v40, %v3987_v3 }
 0x468   :  { %v3135_v26 = vmul.f32 %v2748_v24, %v2748_v24 }
 0x469   :  { %v3134_v7 = vmul.f32 %v2747_v5, %v2747_v5  ;;  %v3260_v20 = vadd.f32 %v3259_v52, %v3133_v53  ;;  %v3847_v57 = vpop.f32.mrb[52].mxu1  ;;  %v3999_v53 = vld [vmem:[#allocation2 + $0x1f0] sm:$0xff] }
 0x46a   :  { %2686 = vst [vmem:[#allocation7 + $0x1a8] sm:$0xff] %v3847_v57  ;;  %v2574_v28 = vpop.f32.mrb[53].mxu1  ;;  %v2750_v25 = vsub.f32 %v3847_v57, %v3988_v32 }
 0x46b   :  { %v3261_v48 = vadd.f32 %v3260_v20, %v3134_v7  ;;  %2685 = vst [vmem:[#allocation7 + $0x1a0] sm:$0xff] %v2574_v28  ;;  %v2749_v54 = vsub.f32 %v2574_v28, %v3989_v58 }
 0x46c   :  { %v3137_v51 = vmul.f32 %v2750_v25, %v2750_v25 }
 0x46d   :  { %v3136_v41 = vmul.f32 %v2749_v54, %v2749_v54  ;;  %v3262_v6 = vadd.f32 %v3261_v48, %v3135_v26  ;;  %v3850_v47 = vpop.f32.mrb[54].mxu1 }
 0x46e   :  { %2688 = vst [vmem:[#allocation7 + $0x1b8] sm:$0xff] %v3850_v47  ;;  %v2584_v35 = vpop.f32.mrb[55].mxu1  ;;  %v2752_v31 = vsub.f32 %v3850_v47, %v3990_v14 }
 0x46f   :  { %v3263_v17 = vadd.f32 %v3262_v6, %v3136_v41  ;;  %2687 = vst [vmem:[#allocation7 + $0x1b0] sm:$0xff] %v2584_v35  ;;  %v2751_v45 = vsub.f32 %v2584_v35, %v3991_v30 }
 0x470   :  { %v3139_v38 = vmul.f32 %v2752_v31, %v2752_v31 }
 0x471   :  { %v3138_v13 = vmul.f32 %v2751_v45, %v2751_v45  ;;  %v3264_v27 = vadd.f32 %v3263_v17, %v3137_v51  ;;  %v3853_v2 = vpop.f32.mrb[56].mxu1 }
 0x472   :  { %2690 = vst [vmem:[#allocation7 + $0x1c8] sm:$0xff] %v3853_v2  ;;  %v2594_v16 = vpop.f32.mrb[57].mxu1  ;;  %v2754_v42 = vsub.f32 %v3853_v2, %v3992_v10 }
 0x473   :  { %v3265_v4 = vadd.f32 %v3264_v27, %v3138_v13  ;;  %2689 = vst [vmem:[#allocation7 + $0x1c0] sm:$0xff] %v2594_v16  ;;  %v2753_v33 = vsub.f32 %v2594_v16, %v3993_v34 }
 0x474   :  { %v3141_v19 = vmul.f32 %v2754_v42, %v2754_v42 }
 0x475   :  { %v3140_v61 = vmul.f32 %v2753_v33, %v2753_v33  ;;  %v3266_v59 = vadd.f32 %v3265_v4, %v3139_v38  ;;  %v3856_v8 = vpop.f32.mrb[58].mxu1 }
 0x476   :  { %2692 = vst [vmem:[#allocation7 + $0x1d8] sm:$0xff] %v3856_v8  ;;  %v2604_v44 = vpop.f32.mrb[59].mxu1  ;;  %v2756_v63 = vsub.f32 %v3856_v8, %v3994_v1 }
 0x477   :  { %v3267_v11 = vadd.f32 %v3266_v59, %v3140_v61  ;;  %2691 = vst [vmem:[#allocation7 + $0x1d0] sm:$0xff] %v2604_v44  ;;  %v2755_v56 = vsub.f32 %v2604_v44, %v3995_v36 }
 0x478   :  { %v3143_v15 = vmul.f32 %v2756_v63, %v2756_v63 }
 0x479   :  { %v3142_v12 = vmul.f32 %v2755_v56, %v2755_v56  ;;  %v3268_v39 = vadd.f32 %v3267_v11, %v3141_v19  ;;  %v3859_v9 = vpop.f32.mrb[60].mxu1 }
 0x47a   :  { %2694 = vst [vmem:[#allocation7 + $0x1e8] sm:$0xff] %v3859_v9  ;;  %v2614_v22 = vpop.f32.mrb[61].mxu1  ;;  %v2758_v18 = vsub.f32 %v3859_v9, %v3996_v46 }
 0x47b   :  { %v3269_v55 = vadd.f32 %v3268_v39, %v3142_v12  ;;  %2693 = vst [vmem:[#allocation7 + $0x1e0] sm:$0xff] %v2614_v22  ;;  %v2757_v49 = vsub.f32 %v2614_v22, %v3997_v0 }
 0x47c   :  { %v3145_v43 = vmul.f32 %v2758_v18, %v2758_v18 }
 0x47d   :  { %v3144_v62 = vmul.f32 %v2757_v49, %v2757_v49  ;;  %v3270_v37 = vadd.f32 %v3269_v55, %v3143_v15  ;;  %v3862_v50 = vpop.f32.mrb[62].mxu1 }
 0x47e   :  { %2696 = vst [vmem:[#allocation7 + $0x1f8] sm:$0xff] %v3862_v50  ;;  %v2624_v23 = vpop.f32.mrb[63].mxu1  ;;  %v2760_v40 = vsub.f32 %v3862_v50, %v3998_v29 }
 0x47f   :  { %v3271_v60 = vadd.f32 %v3270_v37, %v3144_v62  ;;  %2695 = vst [vmem:[#allocation7 + $0x1f0] sm:$0xff] %v2624_v23  ;;  %v2759_v52 = vsub.f32 %v2624_v23, %v3999_v53 }
 0x480   :  { %v3147_v3 = vmul.f32 %v2760_v40, %v2760_v40 }
 0x481   :  { %v3146_v21 = vmul.f32 %v2759_v52, %v2759_v52  ;;  %v3272_v24 = vadd.f32 %v3271_v60, %v3145_v43 }
 0x483   :  { %v3273_v5 = vadd.f32 %v3272_v24, %v3146_v21 }
 0x485   :  { %v3274_v7 = vadd.f32 %v3273_v5, %v3147_v3 }
 0x487   :  { %3275 = vadd.xlane.f32.xlu0 %v3274_v7 }
 0x488   :  { %4055 = shalt.err (!%p4052_p6)
}
 0x489   :  { %s4056_s19 = scalar_lea.hbm %s5905_s3, 8192 }
 0x48a   :  { %p4057_p7 = scmp.ne.s32.totalorder %s5905_s3, %s4056_s19  ;;  %p4060_p8 = scmp.lt.u32.totalorder %s4056_s19, %s5905_s3 }
 0x48c   :  { %p4062_p9 = pnand %p4060_p8, %p4057_p7 }
 0x48e   :  { %4065 = shalt.err (!%p4062_p9)
}
 0x48f   :  { %3297 = dma.vmem_to_hbm [thread:$0]  %s3292_s15, 8192, %s5905_s3, [#allocation4], %s4097_s25, %s4097_s25, %s4098_s26  }
 0x490   :  { %s4102_s28 = smov [#allocation8]  }
 0x491   :  { %s3304_s29 = sshll.u32 %s4102_s28, 4  ;;  %s3305_s29 = int_to_ptr.vmem [resolvable:$true] %s3304_s29 }
 0x492   :  { %s4066_s5 = scalar_lea.vmem %s3305_s29, 128  ;;  %p4071_p11 = scmp.lt.s32.totalorder %s3305_s29, %s3305_s29 }
 0x493   :  { %p4067_p10 = scmp.ne.s32.totalorder %s3305_s29, %s4066_s5  ;;  %p4072_p12 = scmp.lt.s32.totalorder %s4066_s5, %s4066_s5 }
 0x495   :  { %p4073_p13 = por %p4072_p12, %p4071_p11 }
 0x497   :  { %p4074_p0 = pnand %p4073_p13, %p4067_p10 }
 0x514   :  { %v3276_v20 = vpop.xlane.xlu0 %3275 }
 0x515   :  { %v3277_v57 = vrot.slane %v3276_v20, 4 }
 0x517   :  { %v3278_v28 = vadd.f32 %v3277_v57, %v3276_v20 }
 0x519   :  { %v3279_v26 = vrot.slane %v3278_v28, 2 }
 0x51b   :  { %v3280_v48 = vadd.f32 %v3279_v26, %v3278_v28 }
 0x51d   :  { %v3281_v32 = vrot.slane %v3280_v48, 1 }
 0x51f   :  { %v3282_v25 = vadd.f32 %v3281_v32, %v3280_v48 }
 0x521   :  { %3927 = vpush %v3282_v25 }
 0x552   :  { %s3928_s30 = spop %3927 }
 0x553   :  { %v3284_v58 = vstv %s3928_s30 }
 0x554   :  { %3285 = vst [vmem:[#allocation8] sm:$0xff] %v3284_v58 }
 0x555   :  { %4077 = shalt.err (!%p4074_p0)
}
 0x556   :  { %s4078_s26 = scalar_lea.hbm %s5906_s4, 128 }
 0x557   :  { %p4079_p1 = scmp.ne.s32.totalorder %s5906_s4, %s4078_s26  ;;  %p4082_p2 = scmp.lt.u32.totalorder %s4078_s26, %s5906_s4 }
 0x559   :  { %p4084_p3 = pnand %p4082_p2, %p4079_p1 }
 0x55b   :  { %4087 = shalt.err (!%p4084_p3)
}
 0x55c   :  { %3307 = dma.vmem_to_hbm [thread:$0]  %s3305_s29, 128, %s5906_s4, [#allocation9]  }
 0x55d   :  { %4092 = dma.done.wait [#allocation4], 8192  }
 0x55e   :  { %4093 = vsyncadd [#allocation4], 4294959104 }
 0x55f   :  { %4094 = dma.done.wait [#allocation9], 128  }
 0x560   :  { %4095 = vsyncadd [#allocation9], 4294967168 }
 0x561   :  { %3314 = vsyncpa [#allocation3], 1 }
 0x562   :  { %3315 = vsyncpa [#allocation6], 1 }
 0x563   :  { %3316 = vsyncpa [#allocation4], 1 }
 0x564   :  { %3317 = vsyncpa [#allocation9], 1 }

</bundles_post_ra>
